<compile_context>
chip_gen: v7x
topology: tpu7x:2x2x1
jax: 0.10.0
libtpu: 0.0.40
codegen_flags: <defaults>
</compile_context>

<pallas_src>
import math

import jax
import jax.numpy as jnp
from jax.experimental import pallas as pl
from jax.experimental.pallas import tpu as pltpu  # noqa: F401  (TPU backend)

# ----------------------------- configuration ------------------------------ #
B = 2                        # batch
CHANNELS = 3                 # `channels`
Z_COND_DIM = 1               # `z_cond_dim`
CIN = CHANNELS + Z_COND_DIM  # DiT in_channels = channels + z_cond_dim = 4
H = W = 8                    # spatial
PATCH = 2                    # DiT patch size
GH, GW = H // PATCH, W // PATCH
T = GH * GW                  # 16 tokens per batch element
BT = B * T                   # 32 tokens total (batch folded)
HIDDEN = 32                  # DiT hidden_size
NUM_HEADS = 4
HEAD_DIM = HIDDEN // NUM_HEADS
DEPTH = 2                    # number of DiT blocks
MLP_HIDDEN = 4 * HIDDEN      # mlp_ratio = 4
SIN_DIM = 16                 # `dim` (sinusoidal pos emb dim)
TIME_EMB_DIM = HIDDEN // 2   # 16
EXT_COND_DIM = 2             # `external_cond_dim`
EXT_EMB_DIM = HIDDEN // 2    # 16
EXT_PER = EXT_EMB_DIM // EXT_COND_DIM   # embedding width per action = 8
NUM_ACTIONS = 10             # config.world_model_action_num
OUT_DIM = CHANNELS           # learned_variance = False
THETA = 10000.0
# config.use_tanh = True (use_lrelu path not exercised)
LN_EPS = 1e-6

PATCH_DIM = CIN * PATCH * PATCH        # 16
FINAL_DIM = PATCH * PATCH * CIN        # 16  (per-token final-layer width)
HEAD_OUT_DIM = PATCH * PATCH * OUT_DIM  # 12  (per-token head-conv width)

# ----------------------- weight-slab row offsets --------------------------- #
# Slab WC (bf16, (128, 128)): non-block weight matrices, row-stacked.
WC_TW1, WC_TW2P, WC_PATCH, WC_FWADA, WC_FWLIN, WC_WFC = 0, 16, 32, 48, 80, 112
WC_ROWS, WC_LANES = 128, 128
# Slab BC (f32, (104, 128)): non-block biases, pos-emb term, sel / mask consts.
BC_TB1, BC_TB2P, BC_FBADA, BC_FBLIN, BC_BFC = 0, 1, 2, 3, 4
BC_POS, BC_SEL, BC_MASK = 8, 40, 72
BC_ROWS, BC_LANES = 104, 128
# Slab WB (bf16, (DEPTH, 256, 192)): per-block weight matrices, row-stacked.
WB_WADA, WB_WQKV, WB_WPROJ, WB_WFC1, WB_WFC2 = 0, 32, 64, 96, 128
WB_ROWS, WB_LANES = 256, 192
# Slab BB (f32, (DEPTH, 8, 192)): per-block biases, one per row.
BB_BADA, BB_BQKV, BB_BPROJ, BB_BFC1, BB_BFC2 = 0, 1, 2, 3, 4
BB_ROWS, BB_LANES = 8, 192


# ----------------------------- fused kernel -------------------------------- #
def _fused_dit_kernel(cond_ref, patch_ref, wc_ref, bc_ref, wb_ref, bb_ref, o_ref):
    """Single invocation: whole batch (B*T tokens), everything VMEM-resident."""
    f32 = jnp.float32
    bf16 = jnp.bfloat16

    def bdot(a, w):  # bf16 MXU feeding, f32 accumulation
        return jnp.dot(a.astype(bf16), w.astype(bf16), preferred_element_type=f32)

    def layernorm(v):  # LayerNorm, no affine, eps=1e-6 (f32 stats)
        m = jnp.mean(v, axis=-1, keepdims=True)
        var = jnp.mean((v - m) ** 2, axis=-1, keepdims=True)
        return (v - m) * jax.lax.rsqrt(var + LN_EPS)

    # ---- static slab views (zero-cost ref slices) -------------------------- #
    tw1 = wc_ref[WC_TW1:WC_TW1 + SIN_DIM, 0:TIME_EMB_DIM]
    tw2p = wc_ref[WC_TW2P:WC_TW2P + TIME_EMB_DIM, 0:HIDDEN]
    patch_w = wc_ref[WC_PATCH:WC_PATCH + PATCH_DIM, 0:HIDDEN]
    fwada = wc_ref[WC_FWADA:WC_FWADA + HIDDEN, 0:2 * HIDDEN]
    fwlin = wc_ref[WC_FWLIN:WC_FWLIN + HIDDEN, 0:FINAL_DIM]
    wfc = wc_ref[WC_WFC:WC_WFC + FINAL_DIM, 0:HEAD_OUT_DIM]

    tb1 = bc_ref[BC_TB1:BC_TB1 + 1, 0:TIME_EMB_DIM]
    tb2p = bc_ref[BC_TB2P:BC_TB2P + 1, 0:HIDDEN]
    fbada = bc_ref[BC_FBADA:BC_FBADA + 1, 0:2 * HIDDEN]
    fblin = bc_ref[BC_FBLIN:BC_FBLIN + 1, 0:FINAL_DIM]
    bfc = bc_ref[BC_BFC:BC_BFC + 1, 0:HEAD_OUT_DIM]
    pos_b = bc_ref[BC_POS:BC_POS + BT, 0:HIDDEN]          # pos-emb + patch bias, tiled
    sel = bc_ref[BC_SEL:BC_SEL + BT, 0:B]                 # (BT, B) one-hot row->batch
    neg_mask = bc_ref[BC_MASK:BC_MASK + BT, 0:BT]         # block-diag attention mask

    # ---- time MLP + external-cond concat (padded add, no in-kernel concat) - #
    sinu = cond_ref[:, 0:SIN_DIM]                          # (B, 16)
    ext_add = cond_ref[:, SIN_DIM:SIN_DIM + HIDDEN]        # (B, 32) = [0 | ext_emb]
    t1 = bdot(sinu, tw1) + tb1
    # TODO(synk): nn.GELU() in time_mlp is erf-exact; tanh approximation used in-kernel.
    t1 = jax.nn.gelu(t1, approximate=True)
    c = bdot(t1, tw2p) + tb2p + ext_add                    # (B, 32) = [time_emb | ext_emb]
    c_silu = jax.nn.silu(c)

    # per-token conditioning: c_tok[b*T + i] = c_silu[b]
    c_tok = jnp.dot(sel, c_silu, preferred_element_type=f32)   # (BT, 32)

    # ---- patch embed + (pos emb + patch bias) ------------------------------ #
    x = bdot(patch_ref[...], patch_w) + pos_b              # (BT, 32)

    sm_scale = 1.0 / math.sqrt(HEAD_DIM)

    # ---- DiT blocks --------------------------------------------------------- #
    for d in range(DEPTH):
        wada = wb_ref[d, WB_WADA:WB_WADA + HIDDEN, 0:6 * HIDDEN]
        wqkv = wb_ref[d, WB_WQKV:WB_WQKV + HIDDEN, 0:3 * HIDDEN]
        wproj = wb_ref[d, WB_WPROJ:WB_WPROJ + HIDDEN, 0:HIDDEN]
        wfc1 = wb_ref[d, WB_WFC1:WB_WFC1 + HIDDEN, 0:MLP_HIDDEN]
        wfc2 = wb_ref[d, WB_WFC2:WB_WFC2 + MLP_HIDDEN, 0:HIDDEN]
        bada = bb_ref[d, BB_BADA:BB_BADA + 1, 0:6 * HIDDEN]
        bqkv = bb_ref[d, BB_BQKV:BB_BQKV + 1, 0:3 * HIDDEN]
        bproj = bb_ref[d, BB_BPROJ:BB_BPROJ + 1, 0:HIDDEN]
        bfc1 = bb_ref[d, BB_BFC1:BB_BFC1 + 1, 0:MLP_HIDDEN]
        bfc2 = bb_ref[d, BB_BFC2:BB_BFC2 + 1, 0:HIDDEN]

        mod = bdot(c_tok, wada) + bada                     # (BT, 192) per-token adaLN
        shift_msa = mod[:, 0 * HIDDEN:1 * HIDDEN]
        scale_msa = mod[:, 1 * HIDDEN:2 * HIDDEN]
        gate_msa = mod[:, 2 * HIDDEN:3 * HIDDEN]
        shift_mlp = mod[:, 3 * HIDDEN:4 * HIDDEN]
        scale_mlp = mod[:, 4 * HIDDEN:5 * HIDDEN]
        gate_mlp = mod[:, 5 * HIDDEN:6 * HIDDEN]

        # --------------------------- attention ------------------------------ #
        xm = layernorm(x) * (1.0 + scale_msa) + shift_msa  # (BT, 32)
        qkv = bdot(xm, wqkv) + bqkv                        # (BT, 96), single matmul
        attn = None
        for h in range(NUM_HEADS):
            lo, hi = h * HEAD_DIM, (h + 1) * HEAD_DIM
            q_h = qkv[:, lo:hi] * sm_scale                                   # (BT, 8)
            k_h = qkv[:, HIDDEN + lo:HIDDEN + hi]
            v_h = qkv[:, 2 * HIDDEN + lo:2 * HIDDEN + hi]
            s = jnp.dot(q_h.astype(bf16), k_h.astype(bf16).T,
                        preferred_element_type=f32) + neg_mask               # (BT, BT)
            s = s - jnp.max(s, axis=-1, keepdims=True)
            p = jnp.exp(s)
            p = p * pl.reciprocal(jnp.sum(p, axis=-1, keepdims=True), approx=True)
            o_h = jnp.dot(p.astype(bf16), v_h.astype(bf16),
                          preferred_element_type=f32)                        # (BT, 8)
            contrib = bdot(o_h, wproj[lo:hi, :])                             # (BT, 32)
            attn = contrib if attn is None else attn + contrib
        x = x + gate_msa * (attn + bproj)

        # ------------------------------- MLP -------------------------------- #
        xm2 = layernorm(x) * (1.0 + scale_mlp) + shift_mlp
        h1 = jax.nn.gelu(bdot(xm2, wfc1) + bfc1, approximate=True)  # tanh GELU (matches DiT)
        x = x + gate_mlp * (bdot(h1, wfc2) + bfc2)

    # ---- final layer (tanh-conv linear part already folded into fwlin/fblin) -- #
    modf = bdot(c_tok, fwada) + fbada                      # (BT, 64)
    shift_f = modf[:, 0:HIDDEN]
    scale_f = modf[:, HIDDEN:2 * HIDDEN]
    xf = layernorm(x) * (1.0 + scale_f) + shift_f
    hh = jnp.tanh(bdot(xf, fwlin) + fblin)                 # (BT, 16)  == tanh_layer output
    out = bdot(hh, wfc) + bfc                              # (BT, 12)  == final 1x1 conv
    o_ref[...] = out.astype(o_ref.dtype)


# ------------------------------ parameters ---------------------------------- #
def pos_embed_2d(embed_dim, gh, gw):
    def emb_1d(d, pos):
        omega = jnp.arange(d // 2, dtype=jnp.float32) / (d / 2.0)
        omega = 1.0 / (10000.0 ** omega)
        out = pos[:, None] * omega[None, :]
        return jnp.concatenate([jnp.sin(out), jnp.cos(out)], axis=1)
    ww = jnp.arange(gw, dtype=jnp.float32)
    hh = jnp.arange(gh, dtype=jnp.float32)
    wg, hg = jnp.meshgrid(ww, hh)
    emb_w = emb_1d(embed_dim // 2, wg.reshape(-1))
    emb_h = emb_1d(embed_dim // 2, hg.reshape(-1))
    return jnp.concatenate([emb_w, emb_h], axis=1)   # (T, embed_dim)


def init_params(key):
    keys = iter(jax.random.split(key, 64))

    def w(shape, scale=0.05):
        return scale * jax.random.normal(next(keys), shape, jnp.float32)

    params = {
        'time_w1': w((SIN_DIM, TIME_EMB_DIM)), 'time_b1': w((1, TIME_EMB_DIM), 0.02),
        'time_w2': w((TIME_EMB_DIM, TIME_EMB_DIM)), 'time_b2': w((1, TIME_EMB_DIM), 0.02),
        'ext_table': w((NUM_ACTIONS, EXT_PER), 0.5),
        'patch_w': w((PATCH_DIM, HIDDEN)), 'patch_b': w((1, HIDDEN), 0.02),
        'pos_emb': pos_embed_2d(HIDDEN, GH, GW),
        'blocks': [],
        'final': {
            'wada': w((HIDDEN, 2 * HIDDEN)), 'bada': w((1, 2 * HIDDEN), 0.02),
            'wlin': w((HIDDEN, FINAL_DIM)), 'blin': w((1, FINAL_DIM), 0.02),
        },
        'tanh_w': w((CIN, CIN), 0.3), 'tanh_b': w((1, CIN), 0.02),
        'fc_w': w((CIN, OUT_DIM), 0.3), 'fc_b': w((1, OUT_DIM), 0.02),
    }
    for _ in range(DEPTH):
        params['blocks'].append({
            'wada': w((HIDDEN, 6 * HIDDEN)), 'bada': w((1, 6 * HIDDEN), 0.02),
            'wqkv': w((HIDDEN, 3 * HIDDEN)), 'bqkv': w((1, 3 * HIDDEN), 0.02),
            'wproj': w((HIDDEN, HIDDEN)), 'bproj': w((1, HIDDEN), 0.02),
            'wfc1': w((HIDDEN, MLP_HIDDEN)), 'bfc1': w((1, MLP_HIDDEN), 0.02),
            'wfc2': w((MLP_HIDDEN, HIDDEN)), 'bfc2': w((1, HIDDEN), 0.02),
        })
    return params


# ----------------------- trace-time weight packing --------------------------- #
def prepare_slabs(params):
    """Pack all parameters into 4 lane-dense slabs + trace-time weight folding."""
    f32 = jnp.float32
    bf16 = jnp.bfloat16

    eye_pix = jnp.eye(PATCH * PATCH, dtype=f32)
    # 1x1 convs as block-diagonal matmuls on the (pixel, channel) token layout
    wth_bd = jnp.kron(eye_pix, params['tanh_w'])                  # (16, 16)
    bth_t = jnp.tile(params['tanh_b'], (1, PATCH * PATCH))        # (1, 16)
    wfc_bd = jnp.kron(eye_pix, params['fc_w'])                    # (16, 12)
    bfc_t = jnp.tile(params['fc_b'], (1, PATCH * PATCH))          # (1, 12)
    # fold the tanh-conv linear part into the final linear (exact linear fold)
    fwlin2 = params['final']['wlin'] @ wth_bd                     # (32, 16)
    fblin2 = params['final']['blin'] @ wth_bd + bth_t             # (1, 16)
    # pad time_mlp second linear so c = t @ tw2p + tb2p + [0 | ext]  (no concat)
    tw2_pad = jnp.zeros((TIME_EMB_DIM, HIDDEN), f32).at[:, :TIME_EMB_DIM].set(params['time_w2'])
    tb2_pad = jnp.zeros((1, HIDDEN), f32).at[:, :TIME_EMB_DIM].set(params['time_b2'])
    # pos-emb + patch-embed bias folded into one additive term, tiled over batch
    pos_bias = jnp.tile(params['pos_emb'] + params['patch_b'], (B, 1))   # (BT, 32)
    # per-token batch selection (one-hot) and block-diagonal attention mask
    row_batch = jnp.arange(BT, dtype=jnp.int32) // T
    sel = (row_batch[:, None] == jnp.arange(B, dtype=jnp.int32)[None, :]).astype(f32)
    neg_mask = jnp.where(row_batch[:, None] == row_batch[None, :], 0.0, -1e30).astype(f32)

    def place(slab, r, c, mat):
        return slab.at[r:r + mat.shape[0], c:c + mat.shape[1]].set(mat)

    wc = jnp.zeros((WC_ROWS, WC_LANES), f32)
    wc = place(wc, WC_TW1, 0, params['time_w1'])
    wc = place(wc, WC_TW2P, 0, tw2_pad)
    wc = place(wc, WC_PATCH, 0, params['patch_w'])
    wc = place(wc, WC_FWADA, 0, params['final']['wada'])
    wc = place(wc, WC_FWLIN, 0, fwlin2)
    wc = place(wc, WC_WFC, 0, wfc_bd)

    bc = jnp.zeros((BC_ROWS, BC_LANES), f32)
    bc = place(bc, BC_TB1, 0, params['time_b1'])
    bc = place(bc, BC_TB2P, 0, tb2_pad)
    bc = place(bc, BC_FBADA, 0, params['final']['bada'])
    bc = place(bc, BC_FBLIN, 0, fblin2)
    bc = place(bc, BC_BFC, 0, bfc_t)
    bc = place(bc, BC_POS, 0, pos_bias)
    bc = place(bc, BC_SEL, 0, sel)
    bc = place(bc, BC_MASK, 0, neg_mask)

    wb = jnp.zeros((DEPTH, WB_ROWS, WB_LANES), f32)
    bb = jnp.zeros((DEPTH, BB_ROWS, BB_LANES), f32)
    for d, blk in enumerate(params['blocks']):
        wb = wb.at[d, WB_WADA:WB_WADA + HIDDEN, 0:6 * HIDDEN].set(blk['wada'])
        wb = wb.at[d, WB_WQKV:WB_WQKV + HIDDEN, 0:3 * HIDDEN].set(blk['wqkv'])
        wb = wb.at[d, WB_WPROJ:WB_WPROJ + HIDDEN, 0:HIDDEN].set(blk['wproj'])
        wb = wb.at[d, WB_WFC1:WB_WFC1 + HIDDEN, 0:MLP_HIDDEN].set(blk['wfc1'])
        wb = wb.at[d, WB_WFC2:WB_WFC2 + MLP_HIDDEN, 0:HIDDEN].set(blk['wfc2'])
        bb = bb.at[d, BB_BADA:BB_BADA + 1, 0:6 * HIDDEN].set(blk['bada'])
        bb = bb.at[d, BB_BQKV:BB_BQKV + 1, 0:3 * HIDDEN].set(blk['bqkv'])
        bb = bb.at[d, BB_BPROJ:BB_BPROJ + 1, 0:HIDDEN].set(blk['bproj'])
        bb = bb.at[d, BB_BFC1:BB_BFC1 + 1, 0:MLP_HIDDEN].set(blk['bfc1'])
        bb = bb.at[d, BB_BFC2:BB_BFC2 + 1, 0:HIDDEN].set(blk['bfc2'])

    return wc.astype(bf16), bc, wb.astype(bf16), bb


# ------------------------------ forward pass -------------------------------- #
def dit_forward(params, x, time, z_cond, external_cond):
    # x: (B, C, H, W), z_cond: (B, Zc, H, W), time: (B,), external_cond: (B, EXT_COND_DIM)
    # self_condition = False ; z_cond_dim truthy -> concat([z_cond, x]) along channels.
    xz = jnp.concatenate([z_cond, x], axis=1)                      # (B, CIN, H, W)

    # ---- SinusoidalPosEmb(dim=SIN_DIM, theta=THETA) (tiny JAX glue) ----
    half = SIN_DIM // 2
    freq = jnp.exp(jnp.arange(half, dtype=jnp.float32) *
                   (-math.log(THETA) / (half - 1)))
    arg = time[:, None] * freq[None, :]
    sinu = jnp.concatenate([jnp.sin(arg), jnp.cos(arg)], axis=-1)  # (B, SIN_DIM)

    # ---- external cond embedding gather (JAX glue), packed as [sinu | 0 | ext] ----
    ext = jnp.take(params['ext_table'], external_cond.astype(jnp.int32), axis=0)
    ext = ext.reshape(B, EXT_EMB_DIM)                               # (B, 16)
    cond = jnp.concatenate(
        [sinu, jnp.zeros((B, TIME_EMB_DIM), jnp.float32), ext], axis=-1)  # (B, 48)

    # ---- patchify (layout glue; data is tiny) ----
    patches = xz.reshape(B, CIN, GH, PATCH, GW, PATCH)
    patches = patches.transpose(0, 2, 4, 1, 3, 5).reshape(BT, PATCH_DIM)  # (32, 16)

    wc, bc, wb, bb = prepare_slabs(params)

    # Single invocation, no grid: whole problem (<1 MiB) stays VMEM-resident.
    out_tok = pl.pallas_call(
        _fused_dit_kernel,
        out_shape=jax.ShapeDtypeStruct((BT, HEAD_OUT_DIM), jnp.float32),
    )(cond, patches, wc, bc, wb, bb)

    # ---- unpatchify (layout glue): (B*T, P*P*OUT_DIM) -> (B, OUT_DIM, H, W) ----
    y = out_tok.reshape(B, GH, GW, PATCH, PATCH, OUT_DIM)
    y = y.transpose(0, 5, 1, 3, 2, 4).reshape(B, OUT_DIM, H, W)
    return y


# --------------------------------- main -------------------------------------- #
if __name__ == "__main__":
    key = jax.random.PRNGKey(0)
    kx, kz, kt, ke, kp = jax.random.split(key, 5)
    x = jax.random.normal(kx, (B, CHANNELS, H, W), jnp.float32)
    z_cond = jax.random.normal(kz, (B, Z_COND_DIM, H, W), jnp.float32)
    time = jax.random.uniform(kt, (B,), jnp.float32, 0.0, 1000.0)
    external_cond = jax.random.randint(ke, (B, EXT_COND_DIM), 0, NUM_ACTIONS)
    params = init_params(kp)

    out = jax.jit(dit_forward)(params, x, time, z_cond, external_cond)
    out = jax.block_until_ready(out)

    assert out.shape == (B, OUT_DIM, H, W), out.shape
    assert bool(jnp.all(jnp.isfinite(out)))
    print("KERNEL_OK")
</pallas_src>

<mosaic_0001>
module attributes {stable_mosaic.version = 11 : i64} {
  func.func @_fused_dit_kernel(%arg0: memref<2x48xf32, #tpu.memory_space<vmem>>, %arg1: memref<32x16xf32, #tpu.memory_space<vmem>>, %arg2: memref<128x128xbf16, #tpu.memory_space<vmem>>, %arg3: memref<104x128xf32, #tpu.memory_space<vmem>>, %arg4: memref<2x256x192xbf16, #tpu.memory_space<vmem>>, %arg5: memref<2x8x192xf32, #tpu.memory_space<vmem>>, %arg6: memref<32x12xf32, #tpu.memory_space<vmem>>) attributes {dimension_semantics = [], scalar_prefetch = 0 : i64, scratch_operands = 0 : i64, tpu.core_type = #tpu.core_type<tc>} {
    %c0 = arith.constant 0 : index
    %c0_0 = arith.constant 0 : index
    %0 = vector.load %arg2[%c0, %c0_0] : memref<128x128xbf16, #tpu.memory_space<vmem>>, vector<16x16xbf16>
    %c16 = arith.constant 16 : index
    %c0_1 = arith.constant 0 : index
    %1 = vector.load %arg2[%c16, %c0_1] : memref<128x128xbf16, #tpu.memory_space<vmem>>, vector<16x32xbf16>
    %c32 = arith.constant 32 : index
    %c0_2 = arith.constant 0 : index
    %2 = vector.load %arg2[%c32, %c0_2] : memref<128x128xbf16, #tpu.memory_space<vmem>>, vector<16x32xbf16>
    %c48 = arith.constant 48 : index
    %c0_3 = arith.constant 0 : index
    %3 = vector.load %arg2[%c48, %c0_3] : memref<128x128xbf16, #tpu.memory_space<vmem>>, vector<32x64xbf16>
    %c80 = arith.constant 80 : index
    %c0_4 = arith.constant 0 : index
    %4 = vector.load %arg2[%c80, %c0_4] : memref<128x128xbf16, #tpu.memory_space<vmem>>, vector<32x16xbf16>
    %c112 = arith.constant 112 : index
    %c0_5 = arith.constant 0 : index
    %5 = vector.load %arg2[%c112, %c0_5] : memref<128x128xbf16, #tpu.memory_space<vmem>>, vector<16x12xbf16>
    %c0_6 = arith.constant 0 : index
    %c0_7 = arith.constant 0 : index
    %6 = vector.load %arg3[%c0_6, %c0_7] : memref<104x128xf32, #tpu.memory_space<vmem>>, vector<1x16xf32>
    %c1 = arith.constant 1 : index
    %c0_8 = arith.constant 0 : index
    %7 = vector.load %arg3[%c1, %c0_8] : memref<104x128xf32, #tpu.memory_space<vmem>>, vector<1x32xf32>
    %c2 = arith.constant 2 : index
    %c0_9 = arith.constant 0 : index
    %8 = vector.load %arg3[%c2, %c0_9] : memref<104x128xf32, #tpu.memory_space<vmem>>, vector<1x64xf32>
    %c3 = arith.constant 3 : index
    %c0_10 = arith.constant 0 : index
    %9 = vector.load %arg3[%c3, %c0_10] : memref<104x128xf32, #tpu.memory_space<vmem>>, vector<1x16xf32>
    %c4 = arith.constant 4 : index
    %c0_11 = arith.constant 0 : index
    %10 = vector.load %arg3[%c4, %c0_11] : memref<104x128xf32, #tpu.memory_space<vmem>>, vector<1x12xf32>
    %c8 = arith.constant 8 : index
    %c0_12 = arith.constant 0 : index
    %11 = vector.load %arg3[%c8, %c0_12] : memref<104x128xf32, #tpu.memory_space<vmem>>, vector<32x32xf32>
    %c40 = arith.constant 40 : index
    %c0_13 = arith.constant 0 : index
    %12 = vector.load %arg3[%c40, %c0_13] : memref<104x128xf32, #tpu.memory_space<vmem>>, vector<32x2xf32>
    %c72 = arith.constant 72 : index
    %c0_14 = arith.constant 0 : index
    %13 = vector.load %arg3[%c72, %c0_14] : memref<104x128xf32, #tpu.memory_space<vmem>>, vector<32x32xf32>
    %c0_15 = arith.constant 0 : index
    %c0_16 = arith.constant 0 : index
    %14 = vector.load %arg0[%c0_15, %c0_16] : memref<2x48xf32, #tpu.memory_space<vmem>>, vector<2x16xf32>
    %c0_17 = arith.constant 0 : index
    %c16_18 = arith.constant 16 : index
    %15 = vector.load %arg0[%c0_17, %c16_18] : memref<2x48xf32, #tpu.memory_space<vmem>>, vector<2x32xf32>
    %16 = arith.truncf %14 : vector<2x16xf32> to vector<2x16xbf16>
    %cst = arith.constant dense<0.000000e+00> : vector<2x16xf32>
    %17 = tpu.matmul %16, %0, %cst {dimension_numbers = #tpu.dot_dimension_numbers<[1], [0], [0], [1], [0, 0, 1, 1], [], []>} : vector<2x16xbf16>, vector<16x16xbf16>, vector<2x16xf32> -> vector<2x16xf32>
    %18 = vector.broadcast %6 : vector<1x16xf32> to vector<2x16xf32>
    %19 = arith.addf %17, %18 : vector<2x16xf32>
    %20 = arith.mulf %19, %19 : vector<2x16xf32>
    %21 = arith.mulf %19, %20 : vector<2x16xf32>
    %cst_19 = arith.constant 4.471500e-02 : f32
    %22 = vector.broadcast %cst_19 : f32 to vector<2x16xf32>
    %23 = arith.mulf %22, %21 : vector<2x16xf32>
    %24 = arith.addf %19, %23 : vector<2x16xf32>
    %cst_20 = arith.constant 0.797884583 : f32
    %25 = vector.broadcast %cst_20 : f32 to vector<2x16xf32>
    %26 = arith.mulf %25, %24 : vector<2x16xf32>
    %27 = math.tanh %26 : vector<2x16xf32>
    %cst_21 = arith.constant 1.000000e+00 : f32
    %28 = vector.broadcast %cst_21 : f32 to vector<2x16xf32>
    %29 = arith.addf %28, %27 : vector<2x16xf32>
    %cst_22 = arith.constant 5.000000e-01 : f32
    %30 = vector.broadcast %cst_22 : f32 to vector<2x16xf32>
    %31 = arith.mulf %30, %29 : vector<2x16xf32>
    %32 = arith.mulf %19, %31 : vector<2x16xf32>
    %33 = arith.truncf %32 : vector<2x16xf32> to vector<2x16xbf16>
    %cst_23 = arith.constant dense<0.000000e+00> : vector<2x32xf32>
    %34 = tpu.matmul %33, %1, %cst_23 {dimension_numbers = #tpu.dot_dimension_numbers<[1], [0], [0], [1], [0, 0, 1, 1], [], []>} : vector<2x16xbf16>, vector<16x32xbf16>, vector<2x32xf32> -> vector<2x32xf32>
    %35 = vector.broadcast %7 : vector<1x32xf32> to vector<2x32xf32>
    %36 = arith.addf %34, %35 : vector<2x32xf32>
    %37 = arith.addf %36, %15 : vector<2x32xf32>
    %38 = arith.negf %37 : vector<2x32xf32>
    %39 = math.exp %38 : vector<2x32xf32>
    %cst_24 = arith.constant 1.000000e+00 : f32
    %40 = vector.broadcast %cst_24 : f32 to vector<2x32xf32>
    %41 = arith.addf %40, %39 : vector<2x32xf32>
    %42 = arith.divf %40, %41 : vector<2x32xf32>
    %43 = arith.mulf %37, %42 : vector<2x32xf32>
    %cst_25 = arith.constant dense<0.000000e+00> : vector<32x32xf32>
    %44 = tpu.matmul %12, %43, %cst_25 {dimension_numbers = #tpu.dot_dimension_numbers<[1], [0], [0], [1], [0, 0, 1, 1], [], []>} : vector<32x2xf32>, vector<2x32xf32>, vector<32x32xf32> -> vector<32x32xf32>
    %c0_26 = arith.constant 0 : index
    %c0_27 = arith.constant 0 : index
    %45 = vector.load %arg1[%c0_26, %c0_27] : memref<32x16xf32, #tpu.memory_space<vmem>>, vector<32x16xf32>
    %46 = arith.truncf %45 : vector<32x16xf32> to vector<32x16xbf16>
    %cst_28 = arith.constant dense<0.000000e+00> : vector<32x32xf32>
    %47 = tpu.matmul %46, %2, %cst_28 {dimension_numbers = #tpu.dot_dimension_numbers<[1], [0], [0], [1], [0, 0, 1, 1], [], []>} : vector<32x16xbf16>, vector<16x32xbf16>, vector<32x32xf32> -> vector<32x32xf32>
    %48 = arith.addf %47, %11 : vector<32x32xf32>
    %c0_29 = arith.constant 0 : index
    %c0_30 = arith.constant 0 : index
    %c0_31 = arith.constant 0 : index
    %49 = vector.load %arg4[%c0_29, %c0_30, %c0_31] : memref<2x256x192xbf16, #tpu.memory_space<vmem>>, vector<1x32x192xbf16>
    %50 = vector.shape_cast %49 : vector<1x32x192xbf16> to vector<32x192xbf16>
    %c0_32 = arith.constant 0 : index
    %c32_33 = arith.constant 32 : index
    %c0_34 = arith.constant 0 : index
    %51 = vector.load %arg4[%c0_32, %c32_33, %c0_34] : memref<2x256x192xbf16, #tpu.memory_space<vmem>>, vector<1x32x96xbf16>
    %52 = vector.shape_cast %51 : vector<1x32x96xbf16> to vector<32x96xbf16>
    %c0_35 = arith.constant 0 : index
    %c64 = arith.constant 64 : index
    %c0_36 = arith.constant 0 : index
    %53 = vector.load %arg4[%c0_35, %c64, %c0_36] : memref<2x256x192xbf16, #tpu.memory_space<vmem>>, vector<1x32x32xbf16>
    %54 = vector.shape_cast %53 : vector<1x32x32xbf16> to vector<32x32xbf16>
    %c0_37 = arith.constant 0 : index
    %c96 = arith.constant 96 : index
    %c0_38 = arith.constant 0 : index
    %55 = vector.load %arg4[%c0_37, %c96, %c0_38] : memref<2x256x192xbf16, #tpu.memory_space<vmem>>, vector<1x32x128xbf16>
    %56 = vector.shape_cast %55 : vector<1x32x128xbf16> to vector<32x128xbf16>
    %c0_39 = arith.constant 0 : index
    %c128 = arith.constant 128 : index
    %c0_40 = arith.constant 0 : index
    %57 = vector.load %arg4[%c0_39, %c128, %c0_40] : memref<2x256x192xbf16, #tpu.memory_space<vmem>>, vector<1x128x32xbf16>
    %58 = vector.shape_cast %57 : vector<1x128x32xbf16> to vector<128x32xbf16>
    %c0_41 = arith.constant 0 : index
    %c0_42 = arith.constant 0 : index
    %c0_43 = arith.constant 0 : index
    %59 = vector.load %arg5[%c0_41, %c0_42, %c0_43] : memref<2x8x192xf32, #tpu.memory_space<vmem>>, vector<1x1x192xf32>
    %60 = vector.shape_cast %59 : vector<1x1x192xf32> to vector<1x192xf32>
    %c0_44 = arith.constant 0 : index
    %c1_45 = arith.constant 1 : index
    %c0_46 = arith.constant 0 : index
    %61 = vector.load %arg5[%c0_44, %c1_45, %c0_46] : memref<2x8x192xf32, #tpu.memory_space<vmem>>, vector<1x1x96xf32>
    %62 = vector.shape_cast %61 : vector<1x1x96xf32> to vector<1x96xf32>
    %c0_47 = arith.constant 0 : index
    %c2_48 = arith.constant 2 : index
    %c0_49 = arith.constant 0 : index
    %63 = vector.load %arg5[%c0_47, %c2_48, %c0_49] : memref<2x8x192xf32, #tpu.memory_space<vmem>>, vector<1x1x32xf32>
    %64 = vector.shape_cast %63 : vector<1x1x32xf32> to vector<1x32xf32>
    %c0_50 = arith.constant 0 : index
    %c3_51 = arith.constant 3 : index
    %c0_52 = arith.constant 0 : index
    %65 = vector.load %arg5[%c0_50, %c3_51, %c0_52] : memref<2x8x192xf32, #tpu.memory_space<vmem>>, vector<1x1x128xf32>
    %66 = vector.shape_cast %65 : vector<1x1x128xf32> to vector<1x128xf32>
    %c0_53 = arith.constant 0 : index
    %c4_54 = arith.constant 4 : index
    %c0_55 = arith.constant 0 : index
    %67 = vector.load %arg5[%c0_53, %c4_54, %c0_55] : memref<2x8x192xf32, #tpu.memory_space<vmem>>, vector<1x1x32xf32>
    %68 = vector.shape_cast %67 : vector<1x1x32xf32> to vector<1x32xf32>
    %69 = arith.truncf %44 : vector<32x32xf32> to vector<32x32xbf16>
    %cst_56 = arith.constant dense<0.000000e+00> : vector<32x192xf32>
    %70 = tpu.matmul %69, %50, %cst_56 {dimension_numbers = #tpu.dot_dimension_numbers<[1], [0], [0], [1], [0, 0, 1, 1], [], []>} : vector<32x32xbf16>, vector<32x192xbf16>, vector<32x192xf32> -> vector<32x192xf32>
    %71 = vector.broadcast %60 : vector<1x192xf32> to vector<32x192xf32>
    %72 = arith.addf %70, %71 : vector<32x192xf32>
    %73 = vector.extract_strided_slice %72 {offsets = [0, 0], sizes = [32, 32], strides = [1, 1]} : vector<32x192xf32> to vector<32x32xf32>
    %74 = vector.extract_strided_slice %72 {offsets = [0, 32], sizes = [32, 32], strides = [1, 1]} : vector<32x192xf32> to vector<32x32xf32>
    %75 = vector.extract_strided_slice %72 {offsets = [0, 64], sizes = [32, 32], strides = [1, 1]} : vector<32x192xf32> to vector<32x32xf32>
    %76 = vector.extract_strided_slice %72 {offsets = [0, 96], sizes = [32, 32], strides = [1, 1]} : vector<32x192xf32> to vector<32x32xf32>
    %77 = vector.extract_strided_slice %72 {offsets = [0, 128], sizes = [32, 32], strides = [1, 1]} : vector<32x192xf32> to vector<32x32xf32>
    %78 = vector.extract_strided_slice %72 {offsets = [0, 160], sizes = [32, 32], strides = [1, 1]} : vector<32x192xf32> to vector<32x32xf32>
    %cst_57 = arith.constant dense<0.000000e+00> : vector<32xf32>
    %79 = vector.multi_reduction <add>, %48, %cst_57 [1] : vector<32x32xf32> to vector<32xf32>
    %80 = vector.shape_cast %79 : vector<32xf32> to vector<32x1xf32>
    %cst_58 = arith.constant 3.200000e+01 : f32
    %81 = vector.broadcast %cst_58 : f32 to vector<32x1xf32>
    %82 = arith.divf %80, %81 : vector<32x1xf32>
    %83 = vector.broadcast %82 : vector<32x1xf32> to vector<32x32xf32>
    %84 = arith.subf %48, %83 : vector<32x32xf32>
    %85 = arith.mulf %84, %84 : vector<32x32xf32>
    %cst_59 = arith.constant dense<0.000000e+00> : vector<32xf32>
    %86 = vector.multi_reduction <add>, %85, %cst_59 [1] : vector<32x32xf32> to vector<32xf32>
    %87 = vector.shape_cast %86 : vector<32xf32> to vector<32x1xf32>
    %cst_60 = arith.constant 3.200000e+01 : f32
    %88 = vector.broadcast %cst_60 : f32 to vector<32x1xf32>
    %89 = arith.divf %87, %88 : vector<32x1xf32>
    %90 = vector.broadcast %82 : vector<32x1xf32> to vector<32x32xf32>
    %91 = arith.subf %48, %90 : vector<32x32xf32>
    %cst_61 = arith.constant 9.99999997E-7 : f32
    %92 = vector.broadcast %cst_61 : f32 to vector<32x1xf32>
    %93 = arith.addf %89, %92 : vector<32x1xf32>
    %94 = math.rsqrt %93 : vector<32x1xf32>
    %95 = vector.broadcast %94 : vector<32x1xf32> to vector<32x32xf32>
    %96 = arith.mulf %91, %95 : vector<32x32xf32>
    %cst_62 = arith.constant 1.000000e+00 : f32
    %97 = vector.broadcast %cst_62 : f32 to vector<32x32xf32>
    %98 = arith.addf %97, %74 : vector<32x32xf32>
    %99 = arith.mulf %96, %98 : vector<32x32xf32>
    %100 = arith.addf %99, %73 : vector<32x32xf32>
    %101 = arith.truncf %100 : vector<32x32xf32> to vector<32x32xbf16>
    %cst_63 = arith.constant dense<0.000000e+00> : vector<32x96xf32>
    %102 = tpu.matmul %101, %52, %cst_63 {dimension_numbers = #tpu.dot_dimension_numbers<[1], [0], [0], [1], [0, 0, 1, 1], [], []>} : vector<32x32xbf16>, vector<32x96xbf16>, vector<32x96xf32> -> vector<32x96xf32>
    %103 = vector.broadcast %62 : vector<1x96xf32> to vector<32x96xf32>
    %104 = arith.addf %102, %103 : vector<32x96xf32>
    %105 = vector.extract_strided_slice %104 {offsets = [0, 0], sizes = [32, 8], strides = [1, 1]} : vector<32x96xf32> to vector<32x8xf32>
    %cst_64 = arith.constant 0.353553385 : f32
    %106 = vector.broadcast %cst_64 : f32 to vector<32x8xf32>
    %107 = arith.mulf %105, %106 : vector<32x8xf32>
    %108 = vector.extract_strided_slice %104 {offsets = [0, 32], sizes = [32, 8], strides = [1, 1]} : vector<32x96xf32> to vector<32x8xf32>
    %109 = vector.extract_strided_slice %104 {offsets = [0, 64], sizes = [32, 8], strides = [1, 1]} : vector<32x96xf32> to vector<32x8xf32>
    %110 = arith.truncf %107 : vector<32x8xf32> to vector<32x8xbf16>
    %111 = arith.truncf %108 : vector<32x8xf32> to vector<32x8xbf16>
    %112 = tpu.transpose %111, [1, 0] : vector<32x8xbf16> -> vector<8x32xbf16>
    %cst_65 = arith.constant dense<0.000000e+00> : vector<32x32xf32>
    %113 = tpu.matmul %110, %112, %cst_65 {dimension_numbers = #tpu.dot_dimension_numbers<[1], [0], [0], [1], [0, 0, 1, 1], [], []>} : vector<32x8xbf16>, vector<8x32xbf16>, vector<32x32xf32> -> vector<32x32xf32>
    %114 = arith.addf %113, %13 : vector<32x32xf32>
    %cst_66 = arith.constant dense<0xFF800000> : vector<32xf32>
    %115 = vector.multi_reduction <maximumf>, %114, %cst_66 [1] : vector<32x32xf32> to vector<32xf32>
    %116 = vector.shape_cast %115 : vector<32xf32> to vector<32x1xf32>
    %117 = vector.broadcast %116 : vector<32x1xf32> to vector<32x32xf32>
    %118 = arith.subf %114, %117 : vector<32x32xf32>
    %119 = math.exp %118 : vector<32x32xf32>
    %cst_67 = arith.constant dense<0.000000e+00> : vector<32xf32>
    %120 = vector.multi_reduction <add>, %119, %cst_67 [1] : vector<32x32xf32> to vector<32xf32>
    %121 = vector.shape_cast %120 : vector<32xf32> to vector<32x1xf32>
    %122 = tpu.reciprocal %121 {approx = true} : vector<32x1xf32> -> vector<32x1xf32>
    %123 = vector.broadcast %122 : vector<32x1xf32> to vector<32x32xf32>
    %124 = arith.mulf %119, %123 : vector<32x32xf32>
    %125 = arith.truncf %124 : vector<32x32xf32> to vector<32x32xbf16>
    %126 = arith.truncf %109 : vector<32x8xf32> to vector<32x8xbf16>
    %cst_68 = arith.constant dense<0.000000e+00> : vector<32x8xf32>
    %127 = tpu.matmul %125, %126, %cst_68 {dimension_numbers = #tpu.dot_dimension_numbers<[1], [0], [0], [1], [0, 0, 1, 1], [], []>} : vector<32x32xbf16>, vector<32x8xbf16>, vector<32x8xf32> -> vector<32x8xf32>
    %128 = vector.extract_strided_slice %54 {offsets = [0, 0], sizes = [8, 32], strides = [1, 1]} : vector<32x32xbf16> to vector<8x32xbf16>
    %129 = arith.truncf %127 : vector<32x8xf32> to vector<32x8xbf16>
    %cst_69 = arith.constant dense<0.000000e+00> : vector<32x32xf32>
    %130 = tpu.matmul %129, %128, %cst_69 {dimension_numbers = #tpu.dot_dimension_numbers<[1], [0], [0], [1], [0, 0, 1, 1], [], []>} : vector<32x8xbf16>, vector<8x32xbf16>, vector<32x32xf32> -> vector<32x32xf32>
    %131 = vector.extract_strided_slice %104 {offsets = [0, 8], sizes = [32, 8], strides = [1, 1]} : vector<32x96xf32> to vector<32x8xf32>
    %cst_70 = arith.constant 0.353553385 : f32
    %132 = vector.broadcast %cst_70 : f32 to vector<32x8xf32>
    %133 = arith.mulf %131, %132 : vector<32x8xf32>
    %134 = vector.extract_strided_slice %104 {offsets = [0, 40], sizes = [32, 8], strides = [1, 1]} : vector<32x96xf32> to vector<32x8xf32>
    %135 = vector.extract_strided_slice %104 {offsets = [0, 72], sizes = [32, 8], strides = [1, 1]} : vector<32x96xf32> to vector<32x8xf32>
    %136 = arith.truncf %133 : vector<32x8xf32> to vector<32x8xbf16>
    %137 = arith.truncf %134 : vector<32x8xf32> to vector<32x8xbf16>
    %138 = tpu.transpose %137, [1, 0] : vector<32x8xbf16> -> vector<8x32xbf16>
    %cst_71 = arith.constant dense<0.000000e+00> : vector<32x32xf32>
    %139 = tpu.matmul %136, %138, %cst_71 {dimension_numbers = #tpu.dot_dimension_numbers<[1], [0], [0], [1], [0, 0, 1, 1], [], []>} : vector<32x8xbf16>, vector<8x32xbf16>, vector<32x32xf32> -> vector<32x32xf32>
    %140 = arith.addf %139, %13 : vector<32x32xf32>
    %cst_72 = arith.constant dense<0xFF800000> : vector<32xf32>
    %141 = vector.multi_reduction <maximumf>, %140, %cst_72 [1] : vector<32x32xf32> to vector<32xf32>
    %142 = vector.shape_cast %141 : vector<32xf32> to vector<32x1xf32>
    %143 = vector.broadcast %142 : vector<32x1xf32> to vector<32x32xf32>
    %144 = arith.subf %140, %143 : vector<32x32xf32>
    %145 = math.exp %144 : vector<32x32xf32>
    %cst_73 = arith.constant dense<0.000000e+00> : vector<32xf32>
    %146 = vector.multi_reduction <add>, %145, %cst_73 [1] : vector<32x32xf32> to vector<32xf32>
    %147 = vector.shape_cast %146 : vector<32xf32> to vector<32x1xf32>
    %148 = tpu.reciprocal %147 {approx = true} : vector<32x1xf32> -> vector<32x1xf32>
    %149 = vector.broadcast %148 : vector<32x1xf32> to vector<32x32xf32>
    %150 = arith.mulf %145, %149 : vector<32x32xf32>
    %151 = arith.truncf %150 : vector<32x32xf32> to vector<32x32xbf16>
    %152 = arith.truncf %135 : vector<32x8xf32> to vector<32x8xbf16>
    %cst_74 = arith.constant dense<0.000000e+00> : vector<32x8xf32>
    %153 = tpu.matmul %151, %152, %cst_74 {dimension_numbers = #tpu.dot_dimension_numbers<[1], [0], [0], [1], [0, 0, 1, 1], [], []>} : vector<32x32xbf16>, vector<32x8xbf16>, vector<32x8xf32> -> vector<32x8xf32>
    %154 = vector.extract_strided_slice %54 {offsets = [8, 0], sizes = [8, 32], strides = [1, 1]} : vector<32x32xbf16> to vector<8x32xbf16>
    %155 = arith.truncf %153 : vector<32x8xf32> to vector<32x8xbf16>
    %cst_75 = arith.constant dense<0.000000e+00> : vector<32x32xf32>
    %156 = tpu.matmul %155, %154, %cst_75 {dimension_numbers = #tpu.dot_dimension_numbers<[1], [0], [0], [1], [0, 0, 1, 1], [], []>} : vector<32x8xbf16>, vector<8x32xbf16>, vector<32x32xf32> -> vector<32x32xf32>
    %157 = arith.addf %130, %156 : vector<32x32xf32>
    %158 = vector.extract_strided_slice %104 {offsets = [0, 16], sizes = [32, 8], strides = [1, 1]} : vector<32x96xf32> to vector<32x8xf32>
    %cst_76 = arith.constant 0.353553385 : f32
    %159 = vector.broadcast %cst_76 : f32 to vector<32x8xf32>
    %160 = arith.mulf %158, %159 : vector<32x8xf32>
    %161 = vector.extract_strided_slice %104 {offsets = [0, 48], sizes = [32, 8], strides = [1, 1]} : vector<32x96xf32> to vector<32x8xf32>
    %162 = vector.extract_strided_slice %104 {offsets = [0, 80], sizes = [32, 8], strides = [1, 1]} : vector<32x96xf32> to vector<32x8xf32>
    %163 = arith.truncf %160 : vector<32x8xf32> to vector<32x8xbf16>
    %164 = arith.truncf %161 : vector<32x8xf32> to vector<32x8xbf16>
    %165 = tpu.transpose %164, [1, 0] : vector<32x8xbf16> -> vector<8x32xbf16>
    %cst_77 = arith.constant dense<0.000000e+00> : vector<32x32xf32>
    %166 = tpu.matmul %163, %165, %cst_77 {dimension_numbers = #tpu.dot_dimension_numbers<[1], [0], [0], [1], [0, 0, 1, 1], [], []>} : vector<32x8xbf16>, vector<8x32xbf16>, vector<32x32xf32> -> vector<32x32xf32>
    %167 = arith.addf %166, %13 : vector<32x32xf32>
    %cst_78 = arith.constant dense<0xFF800000> : vector<32xf32>
    %168 = vector.multi_reduction <maximumf>, %167, %cst_78 [1] : vector<32x32xf32> to vector<32xf32>
    %169 = vector.shape_cast %168 : vector<32xf32> to vector<32x1xf32>
    %170 = vector.broadcast %169 : vector<32x1xf32> to vector<32x32xf32>
    %171 = arith.subf %167, %170 : vector<32x32xf32>
    %172 = math.exp %171 : vector<32x32xf32>
    %cst_79 = arith.constant dense<0.000000e+00> : vector<32xf32>
    %173 = vector.multi_reduction <add>, %172, %cst_79 [1] : vector<32x32xf32> to vector<32xf32>
    %174 = vector.shape_cast %173 : vector<32xf32> to vector<32x1xf32>
    %175 = tpu.reciprocal %174 {approx = true} : vector<32x1xf32> -> vector<32x1xf32>
    %176 = vector.broadcast %175 : vector<32x1xf32> to vector<32x32xf32>
    %177 = arith.mulf %172, %176 : vector<32x32xf32>
    %178 = arith.truncf %177 : vector<32x32xf32> to vector<32x32xbf16>
    %179 = arith.truncf %162 : vector<32x8xf32> to vector<32x8xbf16>
    %cst_80 = arith.constant dense<0.000000e+00> : vector<32x8xf32>
    %180 = tpu.matmul %178, %179, %cst_80 {dimension_numbers = #tpu.dot_dimension_numbers<[1], [0], [0], [1], [0, 0, 1, 1], [], []>} : vector<32x32xbf16>, vector<32x8xbf16>, vector<32x8xf32> -> vector<32x8xf32>
    %181 = vector.extract_strided_slice %54 {offsets = [16, 0], sizes = [8, 32], strides = [1, 1]} : vector<32x32xbf16> to vector<8x32xbf16>
    %182 = arith.truncf %180 : vector<32x8xf32> to vector<32x8xbf16>
    %cst_81 = arith.constant dense<0.000000e+00> : vector<32x32xf32>
    %183 = tpu.matmul %182, %181, %cst_81 {dimension_numbers = #tpu.dot_dimension_numbers<[1], [0], [0], [1], [0, 0, 1, 1], [], []>} : vector<32x8xbf16>, vector<8x32xbf16>, vector<32x32xf32> -> vector<32x32xf32>
    %184 = arith.addf %157, %183 : vector<32x32xf32>
    %185 = vector.extract_strided_slice %104 {offsets = [0, 24], sizes = [32, 8], strides = [1, 1]} : vector<32x96xf32> to vector<32x8xf32>
    %cst_82 = arith.constant 0.353553385 : f32
    %186 = vector.broadcast %cst_82 : f32 to vector<32x8xf32>
    %187 = arith.mulf %185, %186 : vector<32x8xf32>
    %188 = vector.extract_strided_slice %104 {offsets = [0, 56], sizes = [32, 8], strides = [1, 1]} : vector<32x96xf32> to vector<32x8xf32>
    %189 = vector.extract_strided_slice %104 {offsets = [0, 88], sizes = [32, 8], strides = [1, 1]} : vector<32x96xf32> to vector<32x8xf32>
    %190 = arith.truncf %187 : vector<32x8xf32> to vector<32x8xbf16>
    %191 = arith.truncf %188 : vector<32x8xf32> to vector<32x8xbf16>
    %192 = tpu.transpose %191, [1, 0] : vector<32x8xbf16> -> vector<8x32xbf16>
    %cst_83 = arith.constant dense<0.000000e+00> : vector<32x32xf32>
    %193 = tpu.matmul %190, %192, %cst_83 {dimension_numbers = #tpu.dot_dimension_numbers<[1], [0], [0], [1], [0, 0, 1, 1], [], []>} : vector<32x8xbf16>, vector<8x32xbf16>, vector<32x32xf32> -> vector<32x32xf32>
    %194 = arith.addf %193, %13 : vector<32x32xf32>
    %cst_84 = arith.constant dense<0xFF800000> : vector<32xf32>
    %195 = vector.multi_reduction <maximumf>, %194, %cst_84 [1] : vector<32x32xf32> to vector<32xf32>
    %196 = vector.shape_cast %195 : vector<32xf32> to vector<32x1xf32>
    %197 = vector.broadcast %196 : vector<32x1xf32> to vector<32x32xf32>
    %198 = arith.subf %194, %197 : vector<32x32xf32>
    %199 = math.exp %198 : vector<32x32xf32>
    %cst_85 = arith.constant dense<0.000000e+00> : vector<32xf32>
    %200 = vector.multi_reduction <add>, %199, %cst_85 [1] : vector<32x32xf32> to vector<32xf32>
    %201 = vector.shape_cast %200 : vector<32xf32> to vector<32x1xf32>
    %202 = tpu.reciprocal %201 {approx = true} : vector<32x1xf32> -> vector<32x1xf32>
    %203 = vector.broadcast %202 : vector<32x1xf32> to vector<32x32xf32>
    %204 = arith.mulf %199, %203 : vector<32x32xf32>
    %205 = arith.truncf %204 : vector<32x32xf32> to vector<32x32xbf16>
    %206 = arith.truncf %189 : vector<32x8xf32> to vector<32x8xbf16>
    %cst_86 = arith.constant dense<0.000000e+00> : vector<32x8xf32>
    %207 = tpu.matmul %205, %206, %cst_86 {dimension_numbers = #tpu.dot_dimension_numbers<[1], [0], [0], [1], [0, 0, 1, 1], [], []>} : vector<32x32xbf16>, vector<32x8xbf16>, vector<32x8xf32> -> vector<32x8xf32>
    %208 = vector.extract_strided_slice %54 {offsets = [24, 0], sizes = [8, 32], strides = [1, 1]} : vector<32x32xbf16> to vector<8x32xbf16>
    %209 = arith.truncf %207 : vector<32x8xf32> to vector<32x8xbf16>
    %cst_87 = arith.constant dense<0.000000e+00> : vector<32x32xf32>
    %210 = tpu.matmul %209, %208, %cst_87 {dimension_numbers = #tpu.dot_dimension_numbers<[1], [0], [0], [1], [0, 0, 1, 1], [], []>} : vector<32x8xbf16>, vector<8x32xbf16>, vector<32x32xf32> -> vector<32x32xf32>
    %211 = arith.addf %184, %210 : vector<32x32xf32>
    %212 = vector.broadcast %64 : vector<1x32xf32> to vector<32x32xf32>
    %213 = arith.addf %211, %212 : vector<32x32xf32>
    %214 = arith.mulf %75, %213 : vector<32x32xf32>
    %215 = arith.addf %48, %214 : vector<32x32xf32>
    %cst_88 = arith.constant dense<0.000000e+00> : vector<32xf32>
    %216 = vector.multi_reduction <add>, %215, %cst_88 [1] : vector<32x32xf32> to vector<32xf32>
    %217 = vector.shape_cast %216 : vector<32xf32> to vector<32x1xf32>
    %cst_89 = arith.constant 3.200000e+01 : f32
    %218 = vector.broadcast %cst_89 : f32 to vector<32x1xf32>
    %219 = arith.divf %217, %218 : vector<32x1xf32>
    %220 = vector.broadcast %219 : vector<32x1xf32> to vector<32x32xf32>
    %221 = arith.subf %215, %220 : vector<32x32xf32>
    %222 = arith.mulf %221, %221 : vector<32x32xf32>
    %cst_90 = arith.constant dense<0.000000e+00> : vector<32xf32>
    %223 = vector.multi_reduction <add>, %222, %cst_90 [1] : vector<32x32xf32> to vector<32xf32>
    %224 = vector.shape_cast %223 : vector<32xf32> to vector<32x1xf32>
    %cst_91 = arith.constant 3.200000e+01 : f32
    %225 = vector.broadcast %cst_91 : f32 to vector<32x1xf32>
    %226 = arith.divf %224, %225 : vector<32x1xf32>
    %227 = vector.broadcast %219 : vector<32x1xf32> to vector<32x32xf32>
    %228 = arith.subf %215, %227 : vector<32x32xf32>
    %cst_92 = arith.constant 9.99999997E-7 : f32
    %229 = vector.broadcast %cst_92 : f32 to vector<32x1xf32>
    %230 = arith.addf %226, %229 : vector<32x1xf32>
    %231 = math.rsqrt %230 : vector<32x1xf32>
    %232 = vector.broadcast %231 : vector<32x1xf32> to vector<32x32xf32>
    %233 = arith.mulf %228, %232 : vector<32x32xf32>
    %cst_93 = arith.constant 1.000000e+00 : f32
    %234 = vector.broadcast %cst_93 : f32 to vector<32x32xf32>
    %235 = arith.addf %234, %77 : vector<32x32xf32>
    %236 = arith.mulf %233, %235 : vector<32x32xf32>
    %237 = arith.addf %236, %76 : vector<32x32xf32>
    %238 = arith.truncf %237 : vector<32x32xf32> to vector<32x32xbf16>
    %cst_94 = arith.constant dense<0.000000e+00> : vector<32x128xf32>
    %239 = tpu.matmul %238, %56, %cst_94 {dimension_numbers = #tpu.dot_dimension_numbers<[1], [0], [0], [1], [0, 0, 1, 1], [], []>} : vector<32x32xbf16>, vector<32x128xbf16>, vector<32x128xf32> -> vector<32x128xf32>
    %240 = vector.broadcast %66 : vector<1x128xf32> to vector<32x128xf32>
    %241 = arith.addf %239, %240 : vector<32x128xf32>
    %242 = arith.mulf %241, %241 : vector<32x128xf32>
    %243 = arith.mulf %241, %242 : vector<32x128xf32>
    %cst_95 = arith.constant 4.471500e-02 : f32
    %244 = vector.broadcast %cst_95 : f32 to vector<32x128xf32>
    %245 = arith.mulf %244, %243 : vector<32x128xf32>
    %246 = arith.addf %241, %245 : vector<32x128xf32>
    %cst_96 = arith.constant 0.797884583 : f32
    %247 = vector.broadcast %cst_96 : f32 to vector<32x128xf32>
    %248 = arith.mulf %247, %246 : vector<32x128xf32>
    %249 = math.tanh %248 : vector<32x128xf32>
    %cst_97 = arith.constant 1.000000e+00 : f32
    %250 = vector.broadcast %cst_97 : f32 to vector<32x128xf32>
    %251 = arith.addf %250, %249 : vector<32x128xf32>
    %cst_98 = arith.constant 5.000000e-01 : f32
    %252 = vector.broadcast %cst_98 : f32 to vector<32x128xf32>
    %253 = arith.mulf %252, %251 : vector<32x128xf32>
    %254 = arith.mulf %241, %253 : vector<32x128xf32>
    %255 = arith.truncf %254 : vector<32x128xf32> to vector<32x128xbf16>
    %cst_99 = arith.constant dense<0.000000e+00> : vector<32x32xf32>
    %256 = tpu.matmul %255, %58, %cst_99 {dimension_numbers = #tpu.dot_dimension_numbers<[1], [0], [0], [1], [0, 0, 1, 1], [], []>} : vector<32x128xbf16>, vector<128x32xbf16>, vector<32x32xf32> -> vector<32x32xf32>
    %257 = vector.broadcast %68 : vector<1x32xf32> to vector<32x32xf32>
    %258 = arith.addf %256, %257 : vector<32x32xf32>
    %259 = arith.mulf %78, %258 : vector<32x32xf32>
    %260 = arith.addf %215, %259 : vector<32x32xf32>
    %c1_100 = arith.constant 1 : index
    %c0_101 = arith.constant 0 : index
    %c0_102 = arith.constant 0 : index
    %261 = vector.load %arg4[%c1_100, %c0_101, %c0_102] : memref<2x256x192xbf16, #tpu.memory_space<vmem>>, vector<1x32x192xbf16>
    %262 = vector.shape_cast %261 : vector<1x32x192xbf16> to vector<32x192xbf16>
    %c1_103 = arith.constant 1 : index
    %c32_104 = arith.constant 32 : index
    %c0_105 = arith.constant 0 : index
    %263 = vector.load %arg4[%c1_103, %c32_104, %c0_105] : memref<2x256x192xbf16, #tpu.memory_space<vmem>>, vector<1x32x96xbf16>
    %264 = vector.shape_cast %263 : vector<1x32x96xbf16> to vector<32x96xbf16>
    %c1_106 = arith.constant 1 : index
    %c64_107 = arith.constant 64 : index
    %c0_108 = arith.constant 0 : index
    %265 = vector.load %arg4[%c1_106, %c64_107, %c0_108] : memref<2x256x192xbf16, #tpu.memory_space<vmem>>, vector<1x32x32xbf16>
    %266 = vector.shape_cast %265 : vector<1x32x32xbf16> to vector<32x32xbf16>
    %c1_109 = arith.constant 1 : index
    %c96_110 = arith.constant 96 : index
    %c0_111 = arith.constant 0 : index
    %267 = vector.load %arg4[%c1_109, %c96_110, %c0_111] : memref<2x256x192xbf16, #tpu.memory_space<vmem>>, vector<1x32x128xbf16>
    %268 = vector.shape_cast %267 : vector<1x32x128xbf16> to vector<32x128xbf16>
    %c1_112 = arith.constant 1 : index
    %c128_113 = arith.constant 128 : index
    %c0_114 = arith.constant 0 : index
    %269 = vector.load %arg4[%c1_112, %c128_113, %c0_114] : memref<2x256x192xbf16, #tpu.memory_space<vmem>>, vector<1x128x32xbf16>
    %270 = vector.shape_cast %269 : vector<1x128x32xbf16> to vector<128x32xbf16>
    %c1_115 = arith.constant 1 : index
    %c0_116 = arith.constant 0 : index
    %c0_117 = arith.constant 0 : index
    %271 = vector.load %arg5[%c1_115, %c0_116, %c0_117] : memref<2x8x192xf32, #tpu.memory_space<vmem>>, vector<1x1x192xf32>
    %272 = vector.shape_cast %271 : vector<1x1x192xf32> to vector<1x192xf32>
    %c1_118 = arith.constant 1 : index
    %c1_119 = arith.constant 1 : index
    %c0_120 = arith.constant 0 : index
    %273 = vector.load %arg5[%c1_118, %c1_119, %c0_120] : memref<2x8x192xf32, #tpu.memory_space<vmem>>, vector<1x1x96xf32>
    %274 = vector.shape_cast %273 : vector<1x1x96xf32> to vector<1x96xf32>
    %c1_121 = arith.constant 1 : index
    %c2_122 = arith.constant 2 : index
    %c0_123 = arith.constant 0 : index
    %275 = vector.load %arg5[%c1_121, %c2_122, %c0_123] : memref<2x8x192xf32, #tpu.memory_space<vmem>>, vector<1x1x32xf32>
    %276 = vector.shape_cast %275 : vector<1x1x32xf32> to vector<1x32xf32>
    %c1_124 = arith.constant 1 : index
    %c3_125 = arith.constant 3 : index
    %c0_126 = arith.constant 0 : index
    %277 = vector.load %arg5[%c1_124, %c3_125, %c0_126] : memref<2x8x192xf32, #tpu.memory_space<vmem>>, vector<1x1x128xf32>
    %278 = vector.shape_cast %277 : vector<1x1x128xf32> to vector<1x128xf32>
    %c1_127 = arith.constant 1 : index
    %c4_128 = arith.constant 4 : index
    %c0_129 = arith.constant 0 : index
    %279 = vector.load %arg5[%c1_127, %c4_128, %c0_129] : memref<2x8x192xf32, #tpu.memory_space<vmem>>, vector<1x1x32xf32>
    %280 = vector.shape_cast %279 : vector<1x1x32xf32> to vector<1x32xf32>
    %281 = arith.truncf %44 : vector<32x32xf32> to vector<32x32xbf16>
    %cst_130 = arith.constant dense<0.000000e+00> : vector<32x192xf32>
    %282 = tpu.matmul %281, %262, %cst_130 {dimension_numbers = #tpu.dot_dimension_numbers<[1], [0], [0], [1], [0, 0, 1, 1], [], []>} : vector<32x32xbf16>, vector<32x192xbf16>, vector<32x192xf32> -> vector<32x192xf32>
    %283 = vector.broadcast %272 : vector<1x192xf32> to vector<32x192xf32>
    %284 = arith.addf %282, %283 : vector<32x192xf32>
    %285 = vector.extract_strided_slice %284 {offsets = [0, 0], sizes = [32, 32], strides = [1, 1]} : vector<32x192xf32> to vector<32x32xf32>
    %286 = vector.extract_strided_slice %284 {offsets = [0, 32], sizes = [32, 32], strides = [1, 1]} : vector<32x192xf32> to vector<32x32xf32>
    %287 = vector.extract_strided_slice %284 {offsets = [0, 64], sizes = [32, 32], strides = [1, 1]} : vector<32x192xf32> to vector<32x32xf32>
    %288 = vector.extract_strided_slice %284 {offsets = [0, 96], sizes = [32, 32], strides = [1, 1]} : vector<32x192xf32> to vector<32x32xf32>
    %289 = vector.extract_strided_slice %284 {offsets = [0, 128], sizes = [32, 32], strides = [1, 1]} : vector<32x192xf32> to vector<32x32xf32>
    %290 = vector.extract_strided_slice %284 {offsets = [0, 160], sizes = [32, 32], strides = [1, 1]} : vector<32x192xf32> to vector<32x32xf32>
    %cst_131 = arith.constant dense<0.000000e+00> : vector<32xf32>
    %291 = vector.multi_reduction <add>, %260, %cst_131 [1] : vector<32x32xf32> to vector<32xf32>
    %292 = vector.shape_cast %291 : vector<32xf32> to vector<32x1xf32>
    %cst_132 = arith.constant 3.200000e+01 : f32
    %293 = vector.broadcast %cst_132 : f32 to vector<32x1xf32>
    %294 = arith.divf %292, %293 : vector<32x1xf32>
    %295 = vector.broadcast %294 : vector<32x1xf32> to vector<32x32xf32>
    %296 = arith.subf %260, %295 : vector<32x32xf32>
    %297 = arith.mulf %296, %296 : vector<32x32xf32>
    %cst_133 = arith.constant dense<0.000000e+00> : vector<32xf32>
    %298 = vector.multi_reduction <add>, %297, %cst_133 [1] : vector<32x32xf32> to vector<32xf32>
    %299 = vector.shape_cast %298 : vector<32xf32> to vector<32x1xf32>
    %cst_134 = arith.constant 3.200000e+01 : f32
    %300 = vector.broadcast %cst_134 : f32 to vector<32x1xf32>
    %301 = arith.divf %299, %300 : vector<32x1xf32>
    %302 = vector.broadcast %294 : vector<32x1xf32> to vector<32x32xf32>
    %303 = arith.subf %260, %302 : vector<32x32xf32>
    %cst_135 = arith.constant 9.99999997E-7 : f32
    %304 = vector.broadcast %cst_135 : f32 to vector<32x1xf32>
    %305 = arith.addf %301, %304 : vector<32x1xf32>
    %306 = math.rsqrt %305 : vector<32x1xf32>
    %307 = vector.broadcast %306 : vector<32x1xf32> to vector<32x32xf32>
    %308 = arith.mulf %303, %307 : vector<32x32xf32>
    %cst_136 = arith.constant 1.000000e+00 : f32
    %309 = vector.broadcast %cst_136 : f32 to vector<32x32xf32>
    %310 = arith.addf %309, %286 : vector<32x32xf32>
    %311 = arith.mulf %308, %310 : vector<32x32xf32>
    %312 = arith.addf %311, %285 : vector<32x32xf32>
    %313 = arith.truncf %312 : vector<32x32xf32> to vector<32x32xbf16>
    %cst_137 = arith.constant dense<0.000000e+00> : vector<32x96xf32>
    %314 = tpu.matmul %313, %264, %cst_137 {dimension_numbers = #tpu.dot_dimension_numbers<[1], [0], [0], [1], [0, 0, 1, 1], [], []>} : vector<32x32xbf16>, vector<32x96xbf16>, vector<32x96xf32> -> vector<32x96xf32>
    %315 = vector.broadcast %274 : vector<1x96xf32> to vector<32x96xf32>
    %316 = arith.addf %314, %315 : vector<32x96xf32>
    %317 = vector.extract_strided_slice %316 {offsets = [0, 0], sizes = [32, 8], strides = [1, 1]} : vector<32x96xf32> to vector<32x8xf32>
    %cst_138 = arith.constant 0.353553385 : f32
    %318 = vector.broadcast %cst_138 : f32 to vector<32x8xf32>
    %319 = arith.mulf %317, %318 : vector<32x8xf32>
    %320 = vector.extract_strided_slice %316 {offsets = [0, 32], sizes = [32, 8], strides = [1, 1]} : vector<32x96xf32> to vector<32x8xf32>
    %321 = vector.extract_strided_slice %316 {offsets = [0, 64], sizes = [32, 8], strides = [1, 1]} : vector<32x96xf32> to vector<32x8xf32>
    %322 = arith.truncf %319 : vector<32x8xf32> to vector<32x8xbf16>
    %323 = arith.truncf %320 : vector<32x8xf32> to vector<32x8xbf16>
    %324 = tpu.transpose %323, [1, 0] : vector<32x8xbf16> -> vector<8x32xbf16>
    %cst_139 = arith.constant dense<0.000000e+00> : vector<32x32xf32>
    %325 = tpu.matmul %322, %324, %cst_139 {dimension_numbers = #tpu.dot_dimension_numbers<[1], [0], [0], [1], [0, 0, 1, 1], [], []>} : vector<32x8xbf16>, vector<8x32xbf16>, vector<32x32xf32> -> vector<32x32xf32>
    %326 = arith.addf %325, %13 : vector<32x32xf32>
    %cst_140 = arith.constant dense<0xFF800000> : vector<32xf32>
    %327 = vector.multi_reduction <maximumf>, %326, %cst_140 [1] : vector<32x32xf32> to vector<32xf32>
    %328 = vector.shape_cast %327 : vector<32xf32> to vector<32x1xf32>
    %329 = vector.broadcast %328 : vector<32x1xf32> to vector<32x32xf32>
    %330 = arith.subf %326, %329 : vector<32x32xf32>
    %331 = math.exp %330 : vector<32x32xf32>
    %cst_141 = arith.constant dense<0.000000e+00> : vector<32xf32>
    %332 = vector.multi_reduction <add>, %331, %cst_141 [1] : vector<32x32xf32> to vector<32xf32>
    %333 = vector.shape_cast %332 : vector<32xf32> to vector<32x1xf32>
    %334 = tpu.reciprocal %333 {approx = true} : vector<32x1xf32> -> vector<32x1xf32>
    %335 = vector.broadcast %334 : vector<32x1xf32> to vector<32x32xf32>
    %336 = arith.mulf %331, %335 : vector<32x32xf32>
    %337 = arith.truncf %336 : vector<32x32xf32> to vector<32x32xbf16>
    %338 = arith.truncf %321 : vector<32x8xf32> to vector<32x8xbf16>
    %cst_142 = arith.constant dense<0.000000e+00> : vector<32x8xf32>
    %339 = tpu.matmul %337, %338, %cst_142 {dimension_numbers = #tpu.dot_dimension_numbers<[1], [0], [0], [1], [0, 0, 1, 1], [], []>} : vector<32x32xbf16>, vector<32x8xbf16>, vector<32x8xf32> -> vector<32x8xf32>
    %340 = vector.extract_strided_slice %266 {offsets = [0, 0], sizes = [8, 32], strides = [1, 1]} : vector<32x32xbf16> to vector<8x32xbf16>
    %341 = arith.truncf %339 : vector<32x8xf32> to vector<32x8xbf16>
    %cst_143 = arith.constant dense<0.000000e+00> : vector<32x32xf32>
    %342 = tpu.matmul %341, %340, %cst_143 {dimension_numbers = #tpu.dot_dimension_numbers<[1], [0], [0], [1], [0, 0, 1, 1], [], []>} : vector<32x8xbf16>, vector<8x32xbf16>, vector<32x32xf32> -> vector<32x32xf32>
    %343 = vector.extract_strided_slice %316 {offsets = [0, 8], sizes = [32, 8], strides = [1, 1]} : vector<32x96xf32> to vector<32x8xf32>
    %cst_144 = arith.constant 0.353553385 : f32
    %344 = vector.broadcast %cst_144 : f32 to vector<32x8xf32>
    %345 = arith.mulf %343, %344 : vector<32x8xf32>
    %346 = vector.extract_strided_slice %316 {offsets = [0, 40], sizes = [32, 8], strides = [1, 1]} : vector<32x96xf32> to vector<32x8xf32>
    %347 = vector.extract_strided_slice %316 {offsets = [0, 72], sizes = [32, 8], strides = [1, 1]} : vector<32x96xf32> to vector<32x8xf32>
    %348 = arith.truncf %345 : vector<32x8xf32> to vector<32x8xbf16>
    %349 = arith.truncf %346 : vector<32x8xf32> to vector<32x8xbf16>
    %350 = tpu.transpose %349, [1, 0] : vector<32x8xbf16> -> vector<8x32xbf16>
    %cst_145 = arith.constant dense<0.000000e+00> : vector<32x32xf32>
    %351 = tpu.matmul %348, %350, %cst_145 {dimension_numbers = #tpu.dot_dimension_numbers<[1], [0], [0], [1], [0, 0, 1, 1], [], []>} : vector<32x8xbf16>, vector<8x32xbf16>, vector<32x32xf32> -> vector<32x32xf32>
    %352 = arith.addf %351, %13 : vector<32x32xf32>
    %cst_146 = arith.constant dense<0xFF800000> : vector<32xf32>
    %353 = vector.multi_reduction <maximumf>, %352, %cst_146 [1] : vector<32x32xf32> to vector<32xf32>
    %354 = vector.shape_cast %353 : vector<32xf32> to vector<32x1xf32>
    %355 = vector.broadcast %354 : vector<32x1xf32> to vector<32x32xf32>
    %356 = arith.subf %352, %355 : vector<32x32xf32>
    %357 = math.exp %356 : vector<32x32xf32>
    %cst_147 = arith.constant dense<0.000000e+00> : vector<32xf32>
    %358 = vector.multi_reduction <add>, %357, %cst_147 [1] : vector<32x32xf32> to vector<32xf32>
    %359 = vector.shape_cast %358 : vector<32xf32> to vector<32x1xf32>
    %360 = tpu.reciprocal %359 {approx = true} : vector<32x1xf32> -> vector<32x1xf32>
    %361 = vector.broadcast %360 : vector<32x1xf32> to vector<32x32xf32>
    %362 = arith.mulf %357, %361 : vector<32x32xf32>
    %363 = arith.truncf %362 : vector<32x32xf32> to vector<32x32xbf16>
    %364 = arith.truncf %347 : vector<32x8xf32> to vector<32x8xbf16>
    %cst_148 = arith.constant dense<0.000000e+00> : vector<32x8xf32>
    %365 = tpu.matmul %363, %364, %cst_148 {dimension_numbers = #tpu.dot_dimension_numbers<[1], [0], [0], [1], [0, 0, 1, 1], [], []>} : vector<32x32xbf16>, vector<32x8xbf16>, vector<32x8xf32> -> vector<32x8xf32>
    %366 = vector.extract_strided_slice %266 {offsets = [8, 0], sizes = [8, 32], strides = [1, 1]} : vector<32x32xbf16> to vector<8x32xbf16>
    %367 = arith.truncf %365 : vector<32x8xf32> to vector<32x8xbf16>
    %cst_149 = arith.constant dense<0.000000e+00> : vector<32x32xf32>
    %368 = tpu.matmul %367, %366, %cst_149 {dimension_numbers = #tpu.dot_dimension_numbers<[1], [0], [0], [1], [0, 0, 1, 1], [], []>} : vector<32x8xbf16>, vector<8x32xbf16>, vector<32x32xf32> -> vector<32x32xf32>
    %369 = arith.addf %342, %368 : vector<32x32xf32>
    %370 = vector.extract_strided_slice %316 {offsets = [0, 16], sizes = [32, 8], strides = [1, 1]} : vector<32x96xf32> to vector<32x8xf32>
    %cst_150 = arith.constant 0.353553385 : f32
    %371 = vector.broadcast %cst_150 : f32 to vector<32x8xf32>
    %372 = arith.mulf %370, %371 : vector<32x8xf32>
    %373 = vector.extract_strided_slice %316 {offsets = [0, 48], sizes = [32, 8], strides = [1, 1]} : vector<32x96xf32> to vector<32x8xf32>
    %374 = vector.extract_strided_slice %316 {offsets = [0, 80], sizes = [32, 8], strides = [1, 1]} : vector<32x96xf32> to vector<32x8xf32>
    %375 = arith.truncf %372 : vector<32x8xf32> to vector<32x8xbf16>
    %376 = arith.truncf %373 : vector<32x8xf32> to vector<32x8xbf16>
    %377 = tpu.transpose %376, [1, 0] : vector<32x8xbf16> -> vector<8x32xbf16>
    %cst_151 = arith.constant dense<0.000000e+00> : vector<32x32xf32>
    %378 = tpu.matmul %375, %377, %cst_151 {dimension_numbers = #tpu.dot_dimension_numbers<[1], [0], [0], [1], [0, 0, 1, 1], [], []>} : vector<32x8xbf16>, vector<8x32xbf16>, vector<32x32xf32> -> vector<32x32xf32>
    %379 = arith.addf %378, %13 : vector<32x32xf32>
    %cst_152 = arith.constant dense<0xFF800000> : vector<32xf32>
    %380 = vector.multi_reduction <maximumf>, %379, %cst_152 [1] : vector<32x32xf32> to vector<32xf32>
    %381 = vector.shape_cast %380 : vector<32xf32> to vector<32x1xf32>
    %382 = vector.broadcast %381 : vector<32x1xf32> to vector<32x32xf32>
    %383 = arith.subf %379, %382 : vector<32x32xf32>
    %384 = math.exp %383 : vector<32x32xf32>
    %cst_153 = arith.constant dense<0.000000e+00> : vector<32xf32>
    %385 = vector.multi_reduction <add>, %384, %cst_153 [1] : vector<32x32xf32> to vector<32xf32>
    %386 = vector.shape_cast %385 : vector<32xf32> to vector<32x1xf32>
    %387 = tpu.reciprocal %386 {approx = true} : vector<32x1xf32> -> vector<32x1xf32>
    %388 = vector.broadcast %387 : vector<32x1xf32> to vector<32x32xf32>
    %389 = arith.mulf %384, %388 : vector<32x32xf32>
    %390 = arith.truncf %389 : vector<32x32xf32> to vector<32x32xbf16>
    %391 = arith.truncf %374 : vector<32x8xf32> to vector<32x8xbf16>
    %cst_154 = arith.constant dense<0.000000e+00> : vector<32x8xf32>
    %392 = tpu.matmul %390, %391, %cst_154 {dimension_numbers = #tpu.dot_dimension_numbers<[1], [0], [0], [1], [0, 0, 1, 1], [], []>} : vector<32x32xbf16>, vector<32x8xbf16>, vector<32x8xf32> -> vector<32x8xf32>
    %393 = vector.extract_strided_slice %266 {offsets = [16, 0], sizes = [8, 32], strides = [1, 1]} : vector<32x32xbf16> to vector<8x32xbf16>
    %394 = arith.truncf %392 : vector<32x8xf32> to vector<32x8xbf16>
    %cst_155 = arith.constant dense<0.000000e+00> : vector<32x32xf32>
    %395 = tpu.matmul %394, %393, %cst_155 {dimension_numbers = #tpu.dot_dimension_numbers<[1], [0], [0], [1], [0, 0, 1, 1], [], []>} : vector<32x8xbf16>, vector<8x32xbf16>, vector<32x32xf32> -> vector<32x32xf32>
    %396 = arith.addf %369, %395 : vector<32x32xf32>
    %397 = vector.extract_strided_slice %316 {offsets = [0, 24], sizes = [32, 8], strides = [1, 1]} : vector<32x96xf32> to vector<32x8xf32>
    %cst_156 = arith.constant 0.353553385 : f32
    %398 = vector.broadcast %cst_156 : f32 to vector<32x8xf32>
    %399 = arith.mulf %397, %398 : vector<32x8xf32>
    %400 = vector.extract_strided_slice %316 {offsets = [0, 56], sizes = [32, 8], strides = [1, 1]} : vector<32x96xf32> to vector<32x8xf32>
    %401 = vector.extract_strided_slice %316 {offsets = [0, 88], sizes = [32, 8], strides = [1, 1]} : vector<32x96xf32> to vector<32x8xf32>
    %402 = arith.truncf %399 : vector<32x8xf32> to vector<32x8xbf16>
    %403 = arith.truncf %400 : vector<32x8xf32> to vector<32x8xbf16>
    %404 = tpu.transpose %403, [1, 0] : vector<32x8xbf16> -> vector<8x32xbf16>
    %cst_157 = arith.constant dense<0.000000e+00> : vector<32x32xf32>
    %405 = tpu.matmul %402, %404, %cst_157 {dimension_numbers = #tpu.dot_dimension_numbers<[1], [0], [0], [1], [0, 0, 1, 1], [], []>} : vector<32x8xbf16>, vector<8x32xbf16>, vector<32x32xf32> -> vector<32x32xf32>
    %406 = arith.addf %405, %13 : vector<32x32xf32>
    %cst_158 = arith.constant dense<0xFF800000> : vector<32xf32>
    %407 = vector.multi_reduction <maximumf>, %406, %cst_158 [1] : vector<32x32xf32> to vector<32xf32>
    %408 = vector.shape_cast %407 : vector<32xf32> to vector<32x1xf32>
    %409 = vector.broadcast %408 : vector<32x1xf32> to vector<32x32xf32>
    %410 = arith.subf %406, %409 : vector<32x32xf32>
    %411 = math.exp %410 : vector<32x32xf32>
    %cst_159 = arith.constant dense<0.000000e+00> : vector<32xf32>
    %412 = vector.multi_reduction <add>, %411, %cst_159 [1] : vector<32x32xf32> to vector<32xf32>
    %413 = vector.shape_cast %412 : vector<32xf32> to vector<32x1xf32>
    %414 = tpu.reciprocal %413 {approx = true} : vector<32x1xf32> -> vector<32x1xf32>
    %415 = vector.broadcast %414 : vector<32x1xf32> to vector<32x32xf32>
    %416 = arith.mulf %411, %415 : vector<32x32xf32>
    %417 = arith.truncf %416 : vector<32x32xf32> to vector<32x32xbf16>
    %418 = arith.truncf %401 : vector<32x8xf32> to vector<32x8xbf16>
    %cst_160 = arith.constant dense<0.000000e+00> : vector<32x8xf32>
    %419 = tpu.matmul %417, %418, %cst_160 {dimension_numbers = #tpu.dot_dimension_numbers<[1], [0], [0], [1], [0, 0, 1, 1], [], []>} : vector<32x32xbf16>, vector<32x8xbf16>, vector<32x8xf32> -> vector<32x8xf32>
    %420 = vector.extract_strided_slice %266 {offsets = [24, 0], sizes = [8, 32], strides = [1, 1]} : vector<32x32xbf16> to vector<8x32xbf16>
    %421 = arith.truncf %419 : vector<32x8xf32> to vector<32x8xbf16>
    %cst_161 = arith.constant dense<0.000000e+00> : vector<32x32xf32>
    %422 = tpu.matmul %421, %420, %cst_161 {dimension_numbers = #tpu.dot_dimension_numbers<[1], [0], [0], [1], [0, 0, 1, 1], [], []>} : vector<32x8xbf16>, vector<8x32xbf16>, vector<32x32xf32> -> vector<32x32xf32>
    %423 = arith.addf %396, %422 : vector<32x32xf32>
    %424 = vector.broadcast %276 : vector<1x32xf32> to vector<32x32xf32>
    %425 = arith.addf %423, %424 : vector<32x32xf32>
    %426 = arith.mulf %287, %425 : vector<32x32xf32>
    %427 = arith.addf %260, %426 : vector<32x32xf32>
    %cst_162 = arith.constant dense<0.000000e+00> : vector<32xf32>
    %428 = vector.multi_reduction <add>, %427, %cst_162 [1] : vector<32x32xf32> to vector<32xf32>
    %429 = vector.shape_cast %428 : vector<32xf32> to vector<32x1xf32>
    %cst_163 = arith.constant 3.200000e+01 : f32
    %430 = vector.broadcast %cst_163 : f32 to vector<32x1xf32>
    %431 = arith.divf %429, %430 : vector<32x1xf32>
    %432 = vector.broadcast %431 : vector<32x1xf32> to vector<32x32xf32>
    %433 = arith.subf %427, %432 : vector<32x32xf32>
    %434 = arith.mulf %433, %433 : vector<32x32xf32>
    %cst_164 = arith.constant dense<0.000000e+00> : vector<32xf32>
    %435 = vector.multi_reduction <add>, %434, %cst_164 [1] : vector<32x32xf32> to vector<32xf32>
    %436 = vector.shape_cast %435 : vector<32xf32> to vector<32x1xf32>
    %cst_165 = arith.constant 3.200000e+01 : f32
    %437 = vector.broadcast %cst_165 : f32 to vector<32x1xf32>
    %438 = arith.divf %436, %437 : vector<32x1xf32>
    %439 = vector.broadcast %431 : vector<32x1xf32> to vector<32x32xf32>
    %440 = arith.subf %427, %439 : vector<32x32xf32>
    %cst_166 = arith.constant 9.99999997E-7 : f32
    %441 = vector.broadcast %cst_166 : f32 to vector<32x1xf32>
    %442 = arith.addf %438, %441 : vector<32x1xf32>
    %443 = math.rsqrt %442 : vector<32x1xf32>
    %444 = vector.broadcast %443 : vector<32x1xf32> to vector<32x32xf32>
    %445 = arith.mulf %440, %444 : vector<32x32xf32>
    %cst_167 = arith.constant 1.000000e+00 : f32
    %446 = vector.broadcast %cst_167 : f32 to vector<32x32xf32>
    %447 = arith.addf %446, %289 : vector<32x32xf32>
    %448 = arith.mulf %445, %447 : vector<32x32xf32>
    %449 = arith.addf %448, %288 : vector<32x32xf32>
    %450 = arith.truncf %449 : vector<32x32xf32> to vector<32x32xbf16>
    %cst_168 = arith.constant dense<0.000000e+00> : vector<32x128xf32>
    %451 = tpu.matmul %450, %268, %cst_168 {dimension_numbers = #tpu.dot_dimension_numbers<[1], [0], [0], [1], [0, 0, 1, 1], [], []>} : vector<32x32xbf16>, vector<32x128xbf16>, vector<32x128xf32> -> vector<32x128xf32>
    %452 = vector.broadcast %278 : vector<1x128xf32> to vector<32x128xf32>
    %453 = arith.addf %451, %452 : vector<32x128xf32>
    %454 = arith.mulf %453, %453 : vector<32x128xf32>
    %455 = arith.mulf %453, %454 : vector<32x128xf32>
    %cst_169 = arith.constant 4.471500e-02 : f32
    %456 = vector.broadcast %cst_169 : f32 to vector<32x128xf32>
    %457 = arith.mulf %456, %455 : vector<32x128xf32>
    %458 = arith.addf %453, %457 : vector<32x128xf32>
    %cst_170 = arith.constant 0.797884583 : f32
    %459 = vector.broadcast %cst_170 : f32 to vector<32x128xf32>
    %460 = arith.mulf %459, %458 : vector<32x128xf32>
    %461 = math.tanh %460 : vector<32x128xf32>
    %cst_171 = arith.constant 1.000000e+00 : f32
    %462 = vector.broadcast %cst_171 : f32 to vector<32x128xf32>
    %463 = arith.addf %462, %461 : vector<32x128xf32>
    %cst_172 = arith.constant 5.000000e-01 : f32
    %464 = vector.broadcast %cst_172 : f32 to vector<32x128xf32>
    %465 = arith.mulf %464, %463 : vector<32x128xf32>
    %466 = arith.mulf %453, %465 : vector<32x128xf32>
    %467 = arith.truncf %466 : vector<32x128xf32> to vector<32x128xbf16>
    %cst_173 = arith.constant dense<0.000000e+00> : vector<32x32xf32>
    %468 = tpu.matmul %467, %270, %cst_173 {dimension_numbers = #tpu.dot_dimension_numbers<[1], [0], [0], [1], [0, 0, 1, 1], [], []>} : vector<32x128xbf16>, vector<128x32xbf16>, vector<32x32xf32> -> vector<32x32xf32>
    %469 = vector.broadcast %280 : vector<1x32xf32> to vector<32x32xf32>
    %470 = arith.addf %468, %469 : vector<32x32xf32>
    %471 = arith.mulf %290, %470 : vector<32x32xf32>
    %472 = arith.addf %427, %471 : vector<32x32xf32>
    %473 = arith.truncf %44 : vector<32x32xf32> to vector<32x32xbf16>
    %cst_174 = arith.constant dense<0.000000e+00> : vector<32x64xf32>
    %474 = tpu.matmul %473, %3, %cst_174 {dimension_numbers = #tpu.dot_dimension_numbers<[1], [0], [0], [1], [0, 0, 1, 1], [], []>} : vector<32x32xbf16>, vector<32x64xbf16>, vector<32x64xf32> -> vector<32x64xf32>
    %475 = vector.broadcast %8 : vector<1x64xf32> to vector<32x64xf32>
    %476 = arith.addf %474, %475 : vector<32x64xf32>
    %477 = vector.extract_strided_slice %476 {offsets = [0, 0], sizes = [32, 32], strides = [1, 1]} : vector<32x64xf32> to vector<32x32xf32>
    %478 = vector.extract_strided_slice %476 {offsets = [0, 32], sizes = [32, 32], strides = [1, 1]} : vector<32x64xf32> to vector<32x32xf32>
    %cst_175 = arith.constant dense<0.000000e+00> : vector<32xf32>
    %479 = vector.multi_reduction <add>, %472, %cst_175 [1] : vector<32x32xf32> to vector<32xf32>
    %480 = vector.shape_cast %479 : vector<32xf32> to vector<32x1xf32>
    %cst_176 = arith.constant 3.200000e+01 : f32
    %481 = vector.broadcast %cst_176 : f32 to vector<32x1xf32>
    %482 = arith.divf %480, %481 : vector<32x1xf32>
    %483 = vector.broadcast %482 : vector<32x1xf32> to vector<32x32xf32>
    %484 = arith.subf %472, %483 : vector<32x32xf32>
    %485 = arith.mulf %484, %484 : vector<32x32xf32>
    %cst_177 = arith.constant dense<0.000000e+00> : vector<32xf32>
    %486 = vector.multi_reduction <add>, %485, %cst_177 [1] : vector<32x32xf32> to vector<32xf32>
    %487 = vector.shape_cast %486 : vector<32xf32> to vector<32x1xf32>
    %cst_178 = arith.constant 3.200000e+01 : f32
    %488 = vector.broadcast %cst_178 : f32 to vector<32x1xf32>
    %489 = arith.divf %487, %488 : vector<32x1xf32>
    %490 = vector.broadcast %482 : vector<32x1xf32> to vector<32x32xf32>
    %491 = arith.subf %472, %490 : vector<32x32xf32>
    %cst_179 = arith.constant 9.99999997E-7 : f32
    %492 = vector.broadcast %cst_179 : f32 to vector<32x1xf32>
    %493 = arith.addf %489, %492 : vector<32x1xf32>
    %494 = math.rsqrt %493 : vector<32x1xf32>
    %495 = vector.broadcast %494 : vector<32x1xf32> to vector<32x32xf32>
    %496 = arith.mulf %491, %495 : vector<32x32xf32>
    %cst_180 = arith.constant 1.000000e+00 : f32
    %497 = vector.broadcast %cst_180 : f32 to vector<32x32xf32>
    %498 = arith.addf %497, %478 : vector<32x32xf32>
    %499 = arith.mulf %496, %498 : vector<32x32xf32>
    %500 = arith.addf %499, %477 : vector<32x32xf32>
    %501 = arith.truncf %500 : vector<32x32xf32> to vector<32x32xbf16>
    %cst_181 = arith.constant dense<0.000000e+00> : vector<32x16xf32>
    %502 = tpu.matmul %501, %4, %cst_181 {dimension_numbers = #tpu.dot_dimension_numbers<[1], [0], [0], [1], [0, 0, 1, 1], [], []>} : vector<32x32xbf16>, vector<32x16xbf16>, vector<32x16xf32> -> vector<32x16xf32>
    %503 = vector.broadcast %9 : vector<1x16xf32> to vector<32x16xf32>
    %504 = arith.addf %502, %503 : vector<32x16xf32>
    %505 = math.tanh %504 : vector<32x16xf32>
    %506 = arith.truncf %505 : vector<32x16xf32> to vector<32x16xbf16>
    %cst_182 = arith.constant dense<0.000000e+00> : vector<32x12xf32>
    %507 = tpu.matmul %506, %5, %cst_182 {dimension_numbers = #tpu.dot_dimension_numbers<[1], [0], [0], [1], [0, 0, 1, 1], [], []>} : vector<32x16xbf16>, vector<16x12xbf16>, vector<32x12xf32> -> vector<32x12xf32>
    %508 = vector.broadcast %10 : vector<1x12xf32> to vector<32x12xf32>
    %509 = arith.addf %507, %508 : vector<32x12xf32>
    %c0_183 = arith.constant 0 : index
    %c0_184 = arith.constant 0 : index
    %510 = vector.load %arg6[%c0_183, %c0_184] : memref<32x12xf32, #tpu.memory_space<vmem>>, vector<32x12xf32>
    tpu.vector_store %arg6[%c0_183, %c0_184], %509 {strides = array<i32>} : memref<32x12xf32, #tpu.memory_space<vmem>>, vector<32x12xf32>,
    return
  }
}

</mosaic_0001>

<bundles_post_ra>
// kernel: dit_forward.1
= control target key start
LH: loop header
LB: loop body
LE: loop exit
PB: predicated region body
PF: predicated region fallthrough
CT: control target
= control target key end

     0   :  { %v4776_v0 = vmov 0.0   ;;  %vm4777_vm0 = vmmov 0   ;;  %vm69_vm1 = vcmask 130048   ;;  %s4778_s29 = smov 112   ;;  %vm188_vm2 = vcmask 15360   ;;  %s4780_s21 = smov 96   ;;  %s5832_s2 = inlined_call_operand.vmem [shape: bf16[128,128], index: 2, kind: input, shape index: {}]   ;;  %s5833_s0 = inlined_call_operand.vmem [shape: f32[2,48], index: 0, kind: input, shape index: {}]   ;;  %s5834_s3 = inlined_call_operand.vmem [shape: f32[104,128], index: 3, kind: input, shape index: {}]   ;;  %s5835_s1 = inlined_call_operand.vmem [shape: f32[32,16], index: 1, kind: input, shape index: {}]   ;;  %s5836_s4 = inlined_call_operand.vmem [shape: bf16[2,256,192], index: 4, kind: input, shape index: {}]   ;;  %s5837_s5 = inlined_call_operand.vmem [shape: f32[2,8,192], index: 5, kind: input, shape index: {}]   ;;  %s5838_s6 = inlined_call_operand.vmem [shape: f32[32,12], index: 6, kind: output, shape index: {}]  }
   0x1   :  { %4170 = vmatprep.subr.bf16.mxu0 %v4776_v0  ;;  %v4529_v1 = vld [vmem:[%s5832_s2] sm:$0xff]   ;;  %4172 = vmatprep.mubr.msk.bf16.mxu0 %vm4777_vm0, %v4776_v0  ;;  %v4530_v4 = vld [vmem:[%s5832_s2 + $0x8] sm:$0xff]   ;;  %v4531_v5 = vld [vmem:[%s5832_s2 + $0x10] sm:$0xff]   ;;  %vm427_vm3 = vcmask 261120   ;;  %vm201_vm4 = vcmask 1041408   ;;  %vm651_vm5 = vcmask 64512  }
   0x2   :  { %v57_v2 = vld [vmem:[%s5833_s0] sm:$0x3]  ;;  %4176 = vmatprep.subr.bf16.mxu1 %v4776_v0  ;;  %4178 = vmatprep.mubr.msk.bf16.mxu1 %vm4777_vm0, %v4776_v0  ;;  %v291_v21 = vld [vmem:[%s5835_s1 + $0x8] sm:$0xff]  ;;  %v292_v25 = vld [vmem:[%s5835_s1 + $0x10] sm:$0xff]  ;;  %s4781_s8 = smov 64   ;;  %s4782_s9 = smov 88  }
   0x3   :  { %4171 = vmatpush3.bf16.msra.mxu0 %v4529_v1  ;;  %v58_v3 = vpack.c.bf16 %v57_v2, %v57_v2  ;;  %4177 = vmatpush3.bf16.msra.mxu1 %v4530_v4  ;;  %v3865_v6 = vld [vmem:[%s5834_s3] ss:$0 sm:$0xff]  ;;  %v293_v26 = vld [vmem:[%s5835_s1 + $0x18] sm:$0xff]  ;;  %v49_v28 = vld [vmem:[%s5834_s3 + $0x28] sm:$0xff]  ;;  %v4779_v1 = vmov 0   ;;  %s4783_s10 = smov 120  }
   0x4   :  { %4190 = vmatprep.subr.bf16.mxu1 %v4531_v5  ;;  %177 = vrot.lane.b32.xlu0 %v57_v2, %s4778_s29  ;;  %v290_v20 = vld [vmem:[%s5835_s1] sm:$0xff]  ;;  %v295_v27 = vpack.c.bf16 %v293_v26, %v292_v25  ;;  %v47_v38 = vld [vmem:[%s5834_s3 + $0x18] sm:$0xff]  ;;  %v45_v39 = vld [vmem:[%s5834_s3 + $0x8] sm:$0xff]  ;;  %s4784_s11 = smov 80   ;;  %s4785_s12 = smov 56   ;;  %vm1008_vm6 = vcmask 1043456  }
   0x5   :  { %v294_v23 = vpack.c.bf16 %v291_v21, %v290_v20  ;;  %v3868_v29 = vld [vmem:[%s5834_s3 + $0x1] ss:$0 sm:$0xff]  ;;  %v46_v43 = vld [vmem:[%s5834_s3 + $0x10] sm:$0xff]  ;;  %v51_v59 = vld [vmem:[%s5834_s3 + $0x38] sm:$0xff]  ;;  %s4786_s13 = smov 72   ;;  %s4787_s14 = smov 104  }
   0x6   :  { %4173 = vmatmul.mubr.msk.bf16.vlgmr.msra.gmra.mrb[0].mxu0 %vm69_vm1, %v58_v3  ;;  %v48_v45 = vld [vmem:[%s5834_s3 + $0x20] sm:$0xff]  ;;  %v50_v58 = vld [vmem:[%s5834_s3 + $0x30] sm:$0xff]  ;;  %s4788_s15 = smov 48   ;;  %s4789_s22 = smov 40   ;;  %vm3856_vm7 = vcmask 97280  }
   0x7   :  { %4184 = vmatprep.mubr.msk.f32.mxu0 %vm188_vm2, %v49_v28  ;;  %v52_v60 = vld [vmem:[%s5834_s3 + $0x40] sm:$0xff]  ;;  %v4537_v63 = vld [vmem:[%s5836_s4 + $0x14] ss:$8 sps:$4 sm:$0xff]   ;;  %v4535_v0 = vld [vmem:[%s5836_s4 + $0x10] ss:$8 sps:$4 sm:$0xff]   ;;  %v397_v28 = vlaneseq  ;;  %s4790_s20 = smov 32  }
   0x8   :  { %v4532_v61 = vld [vmem:[%s5836_s4] ss:$8 sps:$4 sm:$0xff]   ;;  %v4534_v62 = vld [vmem:[%s5836_s4 + $0x4] ss:$8 sps:$4 sm:$0xff]  }
  0x76   :  { %v178_v31 = vpop.permute.xlu0 %177 }
  0xd9   :  { %v107_v7 = vpop.f32.mrb[0].mxu0 }
  0xda   :  { %v108_v8 = vadd.f32 %v3865_v6, %v107_v7  ;;  %v4174_v9 = vpop.f32.mrb[1].mxu0 }
  0xdb   :  { %v110_v10 = vpop.f32.mrb[2].mxu0 }
  0xdc   :  { %v113_v11 = vmul.f32 %v108_v8, %v108_v8  ;;  %v4175_v12 = vpop.f32.mrb[3].mxu0 }
  0xde   :  { %v114_v13 = vmul.f32 %v113_v11, %v108_v8 }
  0xe0   :  { %v115_v14 = vmul.f32 0.044715, %v114_v13 }
  0xe2   :  { %v116_v15 = vadd.f32 %v115_v14, %v108_v8 }
  0xe4   :  { %v117_v16 = vmul.f32 0.7978846, %v116_v15 }
  0xe6   :  { %4573 = vtanh.f32 %v117_v16 }
  0xf0   :  { %v4574_v17 = vpop.eup %4573 }
  0xf1   :  { %v119_v18 = vadd.f32 1.0, %v4574_v17 }
  0xf3   :  { %v120_v19 = vmul.f32 0.5, %v119_v18 }
  0xf5   :  { %v121_v22 = vmul.f32 %v120_v19, %v108_v8 }
  0xf7   :  { %v122_v24 = vpack.c.bf16 %v121_v22, %v121_v22 }
  0xf9   :  { %4179 = vmatmul.mubr.msk.bf16.vlgmr.msra.gmra.mrb[0].mxu1 %vm69_vm1, %v122_v24 }
  0xfa   :  { %4191 = vmatpush3.bf16.msra.mxu1 %v4531_v5  ;;  %4192 = vmatprep.mubr.msk.bf16.mxu1 %vm69_vm1, %v294_v23 }
 0x101   :  { %4193 = vmatmul.mubr.msk.bf16.vlgmr.msra.gmra.mrb[4].mxu1 %vm69_vm1, %v295_v27 }
 0x1cc   :  { %v170_v30 = vpop.f32.mrb[0].mxu1 }
 0x1cd   :  { %v171_v32 = vadd.f32 %v3868_v29, %v170_v30  ;;  %v4180_v33 = vpop.f32.mrb[1].mxu1  ;;  %v4951_v29 = vshrl.u32 %v397_v28, 7 }
 0x1ce   :  { %v173_v34 = vpop.f32.mrb[2].mxu1 }
 0x1cf   :  { %v180_v35 = vadd.f32 %v178_v31, %v171_v32  ;;  %v4181_v36 = vpop.f32.mrb[3].mxu1  ;;  %v399_v30 = vsub.s32 0, %v4951_v29  ;;  %v389_v31 = vld [vmem:[%s5837_s5] ss:$8 sm:$0x3] }
 0x1d0   :  { %v4538_v34 = vld [vmem:[%s5836_s4 + $0x20] ss:$8 sps:$4 sm:$0xff]  }
 0x1d1   :  { %v3871_v37 = vmul.f32 -1.442695, %v180_v35  ;;  %v400_v32 = vrot.slane %v389_v31, %v399_v30  ;;  %4196 = vmatprep.subr.bf16.mxu1 %v4538_v34 }
 0x1d2   :  { %4197 = vmatpush3.bf16.msra.mxu1 %v4538_v34 }
 0x1d3   :  { %4575 = vpow2.f32 %v3871_v37 }
 0x1d4   :  { %v4194_v40 = vpop.f32.mrb[4].mxu1 }
 0x1d5   :  { %v4871_v41 = vadd.f32 %v4194_v40, %v47_v38  ;;  %v342_v42 = vpop.f32.mrb[5].mxu1 }
 0x1d6   :  { %v4876_v44 = vadd.f32 %v342_v42, %v45_v39  ;;  %v4195_v46 = vpop.f32.mrb[6].mxu1  ;;  %v4539_v42 = vld [vmem:[%s5836_s4 + $0x30] ss:$8 sps:$4 sm:$0xff]  }
 0x1d7   :  { %v493_v47 = vsel %vm427_vm3, %v4871_v41, 0.0  ;;  %v345_v48 = vpop.f32.mrb[7].mxu1  ;;  %v4887_v51 = vadd.f32 %v4195_v46, %v48_v45  ;;  %4198 = vmatprep.subr.bf16.mxu1 %v4539_v42 }
 0x1d8   :  { %494 = vadd.xlane.f32.xlu1 %v493_v47  ;;  %v4883_v49 = vadd.f32 %v345_v48, %v46_v43  ;;  %v487_v50 = vsel %vm427_vm3, %v4876_v44, 0.0  ;;  %4199 = vmatpush3.bf16.msra.mxu1 %v4539_v42 }
 0x1d9   :  { %488 = vadd.xlane.f32.xlu0 %v487_v50  ;;  %v496_v54 = vsel %vm427_vm3, %v4887_v51, 0.0 }
 0x1da   :  { %v490_v52 = vsel %vm427_vm3, %v4883_v49, 0.0 }
 0x1dc   :  { %491 = vadd.xlane.f32.xlu1 %v490_v52 }
 0x1dd   :  { %v4576_v53 = vpop.eup %4575 }
 0x1de   :  { %v184_v55 = vadd.f32 1.0, %v4576_v53 }
 0x1e0   :  { %4577 = vrcp.f32 %v184_v55  ;;  %497 = vadd.xlane.f32.xlu1 %v496_v54 }
 0x1ea   :  { %v4578_v56 = vpop.eup %4577 }
 0x1eb   :  { %v187_v57 = vmul.f32 %v4578_v56, %v180_v35 }
 0x1ed   :  { %4182 = vmatprep.subr.msk.mxu0 %vm201_vm4, %v187_v57 }
 0x1ee   :  { %4183 = vmatpush3.msk.msra.mxu0 %vm201_vm4, %v187_v57 }
 0x1ef   :  { %4185 = vmatmul.mubr.msk.f32.vlgmr.msra.gmra.mrb[4].mxu0 %vm188_vm2, %v50_v58  ;;  %434 = vmatprep.subr.bf16.mxu0 %v4534_v62 }
 0x1f0   :  { %4187 = vmatprep.mubr.msk.f32.mxu0 %vm188_vm2, %v51_v59  ;;  %435 = vmatpush1.bf16.msra.mxu0 %v4532_v61 }
 0x1f1   :  { %436 = vmatprep.subr.bf16.mxu0 %v4537_v63 }
 0x1f3   :  { %4188 = vmatmul.mubr.msk.f32.gmra.mrb[6].mxu0 %vm188_vm2, %v52_v60 }
 0x1f4   :  { %437 = vmatpush1.bf16.msra.mxu0 %v4535_v0  ;;  %466 = vmatprep.mubr.bf16.mxu0 %v4779_v1 }
 0x265   :  { %v495_v2 = vpop.xlane.xlu1 %494 }
 0x266   :  { %v502_v3 = vmul.f32 0.03125, %v495_v2  ;;  %v489_v4 = vpop.xlane.xlu0 %488 }
 0x267   :  { %v500_v5 = vmul.f32 0.03125, %v489_v4 }
 0x268   :  { %v4919_v6 = vsub.f32 %v4871_v41, %v502_v3 }
 0x269   :  { %v492_v7 = vpop.xlane.xlu1 %491  ;;  %v4922_v8 = vsub.f32 %v4876_v44, %v500_v5 }
 0x26a   :  { %v501_v9 = vmul.f32 0.03125, %v492_v7  ;;  %v510_v10 = vmul.f32 %v4919_v6, %v4919_v6 }
 0x26b   :  { %v508_v11 = vmul.f32 %v4922_v8, %v4922_v8 }
 0x26c   :  { %v518_v12 = vsel %vm427_vm3, %v510_v10, 0.0  ;;  %v4930_v14 = vsub.f32 %v4883_v49, %v501_v9 }
 0x26d   :  { %519 = vadd.xlane.f32.xlu1 %v518_v12  ;;  %v498_v13 = vpop.xlane.xlu1 %497  ;;  %v512_v16 = vsel %vm427_vm3, %v508_v11, 0.0 }
 0x26e   :  { %v503_v15 = vmul.f32 0.03125, %v498_v13  ;;  %v509_v19 = vmul.f32 %v4930_v14, %v4930_v14 }
 0x270   :  { %v4934_v17 = vsub.f32 %v4887_v51, %v503_v15  ;;  %v515_v21 = vsel %vm427_vm3, %v509_v19, 0.0 }
 0x271   :  { %513 = vadd.xlane.f32.xlu1 %v512_v16 }
 0x272   :  { %v511_v18 = vmul.f32 %v4934_v17, %v4934_v17 }
 0x274   :  { %v521_v20 = vsel %vm427_vm3, %v511_v18, 0.0 }
 0x275   :  { %522 = vadd.xlane.f32.xlu1 %v521_v20 }
 0x279   :  { %516 = vadd.xlane.f32.xlu1 %v515_v21 }
 0x2c2   :  { %v4186_v22 = vpop.f32.mrb[4].mxu0 }
 0x2c3   :  { %v271_v23 = vpop.f32.mrb[5].mxu0 }
 0x2c4   :  { %v4942_v24 = vpack.c.bf16 %v4186_v22, %v271_v23 }
 0x2c6   :  { %3884 = vmatmul.mubr.msk.bf16.vlgmr.msra.gmra.mrb[8].mxu0 %vm427_vm3, %v4942_v24  ;;  %v4189_v25 = vpop.f32.mrb[6].mxu0 }
 0x2c7   :  { %v281_v26 = vpop.f32.mrb[7].mxu0  ;;  %476 = vmatprep.mubr.bf16.mxu0 %v4779_v1 }
 0x2c8   :  { %v4947_v27 = vpack.c.bf16 %v4189_v25, %v281_v26 }
 0x2ce   :  { %3885 = vmatmul.mubr.msk.bf16.gmra.mrb[12].mxu0 %vm427_vm3, %v4947_v27 }
 0x2fa   :  { %v520_v55 = vpop.xlane.xlu1 %519 }
 0x2fb   :  { %v526_v63 = vmul.f32 0.03125, %v520_v55 }
 0x2fd   :  { %v530_v2 = vadd.f32 1e-06, %v526_v63  ;;  %v5025_v63 = vld [vmem:[%s5834_s3 + $0x48] sm:$0xff] }
 0x2fe   :  { %v514_v56 = vpop.xlane.xlu1 %513 }
 0x2ff   :  { %v524_v59 = vmul.f32 0.03125, %v514_v56 }
 0x301   :  { %v528_v61 = vadd.f32 1e-06, %v524_v59 }
 0x302   :  { %v523_v57 = vpop.xlane.xlu1 %522 }
 0x303   :  { %4579 = vrsqrt.f32 %v528_v61  ;;  %v527_v0 = vmul.f32 0.03125, %v523_v57 }
 0x305   :  { %v531_v3 = vadd.f32 1e-06, %v527_v0 }
 0x306   :  { %v517_v58 = vpop.xlane.xlu1 %516 }
 0x307   :  { %v525_v60 = vmul.f32 0.03125, %v517_v58 }
 0x309   :  { %v529_v62 = vadd.f32 1e-06, %v525_v60 }
 0x30b   :  { %4581 = vrsqrt.f32 %v529_v62 }
 0x30c   :  { %4583 = vrsqrt.f32 %v530_v2 }
 0x30d   :  { %v4580_v4 = vpop.eup %4579  ;;  %4585 = vrsqrt.f32 %v531_v3  ;;  %v5030_v3 = vld [vmem:[%s5834_s3 + $0x60] sm:$0xff] }
 0x30e   :  { %v536_v7 = vmul.f32 %v4580_v4, %v4922_v8  ;;  %v5035_v4 = vld [vmem:[%s5834_s3 + $0x50] sm:$0xff] }
 0x315   :  { %v4582_v5 = vpop.eup %4581 }
 0x316   :  { %v537_v11 = vmul.f32 %v4582_v5, %v4930_v14  ;;  %v4584_v18 = vpop.eup %4583 }
 0x317   :  { %v4586_v20 = vpop.eup %4585  ;;  %v538_v22 = vmul.f32 %v4584_v18, %v4919_v6 }
 0x318   :  { %v539_v8 = vmul.f32 %v4586_v20, %v4934_v17 }
 0x399   :  { %v468_v33 = vpop.f32.mrb[8].mxu0 }
 0x39a   :  { %v4962_v35 = vadd.f32 %v468_v33, %v400_v32  ;;  %v4964_v36 = vpop.f32.mrb[9].mxu0 }
 0x39b   :  { %v472_v37 = vpop.f32.mrb[10].mxu0 }
 0x39c   :  { %v4966_v38 = vadd.f32 %v472_v37, %v400_v32  ;;  %v4968_v39 = vpop.f32.mrb[11].mxu0  ;;  %v540_v40 = vadd.f32 1.0, %v4962_v35 }
 0x39e   :  { %548 = vrot.lane.b32.xlu1 %v540_v40, %s4780_s21  ;;  %v541_v43 = vadd.f32 1.0, %v4966_v38 }
 0x3a0   :  { %550 = vrot.lane.b32.xlu0 %v541_v43, %s4780_s21 }
 0x3a1   :  { %v478_v45 = vpop.f32.mrb[12].mxu0 }
 0x3a2   :  { %v4977_v46 = vadd.f32 %v478_v45, %v400_v32  ;;  %v4979_v47 = vpop.f32.mrb[13].mxu0 }
 0x3a3   :  { %v482_v48 = vpop.f32.mrb[14].mxu0 }
 0x3a4   :  { %v4981_v50 = vadd.f32 %v482_v48, %v400_v32  ;;  %v4983_v52 = vpop.f32.mrb[15].mxu0  ;;  %v542_v53 = vadd.f32 1.0, %v4977_v46  ;;  %v390_v32 = vld [vmem:[%s5837_s5 + $0x1] ss:$0 sm:$0xff] }
 0x3a6   :  { %552 = vrot.lane.b32.xlu1 %v542_v53, %s4780_s21  ;;  %v543_v54 = vadd.f32 1.0, %v4981_v50 }
 0x3aa   :  { %554 = vrot.lane.b32.xlu1 %v543_v54, %s4780_s21 }
 0x410   :  { %v549_v9 = vpop.permute.xlu1 %548 }
 0x411   :  { %v560_v10 = vmul.f32 %v549_v9, %v536_v7  ;;  %v5041_v9 = vld [vmem:[%s5834_s3 + $0x58] sm:$0xff] }
 0x412   :  { %v551_v12 = vpop.permute.xlu0 %550 }
 0x413   :  { %v561_v13 = vmul.f32 %v551_v12, %v537_v11  ;;  %v564_v15 = vadd.f32 %v560_v10, %v4962_v35 }
 0x415   :  { %v565_v16 = vadd.f32 %v561_v13, %v4966_v38 }
 0x417   :  { %v568_v19 = vpack.c.bf16 %v565_v16, %v564_v15 }
 0x418   :  { %v553_v21 = vpop.permute.xlu1 %552 }
 0x419   :  { %4200 = vmatprep.mubr.msk.bf16.mxu1 %vm427_vm3, %v568_v19  ;;  %v562_v23 = vmul.f32 %v553_v21, %v538_v22 }
 0x41b   :  { %v566_v14 = vadd.f32 %v562_v23, %v4977_v46 }
 0x41c   :  { %v555_v25 = vpop.permute.xlu1 %554 }
 0x41d   :  { %v563_v26 = vmul.f32 %v555_v25, %v539_v8 }
 0x41f   :  { %v567_v28 = vadd.f32 %v563_v26, %v4981_v50 }
 0x421   :  { %v569_v31 = vpack.c.bf16 %v567_v28, %v566_v14 }
 0x423   :  { %4201 = vmatmul.mubr.msk.bf16.vlgmr.msra.gmra.mrb[8].mxu1 %vm427_vm3, %v569_v31 }
 0x4f6   :  { %v4202_v33 = vpop.f32.mrb[8].mxu1 }
 0x4f7   :  { %v631_v6 = vadd.f32 %v4202_v33, %v390_v32  ;;  %v622_v34 = vpop.f32.mrb[9].mxu1 }
 0x4f8   :  { %v623_v37 = vadd.f32 %v622_v34, %v390_v32  ;;  %v4203_v40 = vpop.f32.mrb[10].mxu1 }
 0x4f9   :  { %v634_v42 = vadd.f32 %v4203_v40, %v390_v32  ;;  %v625_v17 = vpop.f32.mrb[11].mxu1  ;;  %v639_v45 = vmul.f32 0.35355338, %v631_v6 }
 0x4fa   :  { %v626_v43 = vadd.f32 %v625_v17, %v390_v32  ;;  %v637_v54 = vmul.f32 0.35355338, %v623_v37 }
 0x4fb   :  { %v640_v48 = vmul.f32 0.35355338, %v634_v42  ;;  %v5002_v53 = vpack.c.bf16 %v634_v42, %v631_v6 }
 0x4fc   :  { %v638_v55 = vmul.f32 0.35355338, %v626_v43  ;;  %v5004_v56 = vpack.c.bf16 %v626_v43, %v623_v37 }
 0x4fd   :  { %v5006_v57 = vpack.c.bf16 %v640_v48, %v639_v45  ;;  %649 = vrot.lane.b32.xlu0 %v5002_v53, %s4780_s21 }
 0x4fe   :  { %v5010_v58 = vpack.c.bf16 %v638_v55, %v637_v54  ;;  %647 = vrot.lane.b32.xlu1 %v5004_v56, %s4780_s21 }
 0x500   :  { %4208 = vmatprep.mubr.msk.bf16.mxu0 %vm651_vm5, %v5010_v58 }
 0x56f   :  { %v650_v61 = vpop.permute.xlu0 %649 }
 0x570   :  { %v648_v59 = vpop.permute.xlu1 %647  ;;  %v662_v62 = vsel %vm651_vm5, %v650_v61, 0 }
 0x571   :  { %4490 = vmatprep.subr.msk.bf16.mxu0 %vm651_vm5, %v648_v59  ;;  %v659_v60 = vsel %vm651_vm5, %v648_v59, 0 }
 0x572   :  { %4205 = vmatpush3.bf16.xpose.msra.mxu0 %v659_v60 }
 0x573   :  { %4491 = vmatprep.subr.msk.bf16.mxu0 %vm651_vm5, %v650_v61 }
 0x57a   :  { %4207 = vmatpush3.bf16.xpose.msra.mxu0 %v662_v62 }
 0x581   :  { %4209 = vmatmul.mubr.msk.bf16.vlgmr.msra.gmra.mrb[16].mxu0 %vm651_vm5, %v5006_v57 }
 0x654   :  { %v4210_v0 = vpop.f32.mrb[16].mxu0 }
 0x655   :  { %v698_v2 = vpop.f32.mrb[17].mxu0  ;;  %v707_v15 = vadd.f32 %v4210_v0, %v5041_v9 }
 0x656   :  { %v699_v5 = vadd.f32 %v698_v2, %v5025_v63  ;;  %v4211_v7 = vpop.f32.mrb[18].mxu0 }
 0x657   :  { %v701_v10 = vpop.f32.mrb[19].mxu0  ;;  %v710_v11 = vadd.f32 %v4211_v7, %v5030_v3  ;;  %v719_v19 = vsel %vm427_vm3, %v707_v15, -inf }
 0x658   :  { %v702_v12 = vadd.f32 %v701_v10, %v5035_v4  ;;  %v713_v13 = vsel %vm427_vm3, %v699_v5, -inf }
 0x659   :  { %714 = vmax.xlane.f32.xlu1 %v713_v13  ;;  %v722_v18 = vsel %vm427_vm3, %v710_v11, -inf }
 0x65a   :  { %v716_v16 = vsel %vm427_vm3, %v702_v12, -inf }
 0x65b   :  { %717 = vmax.xlane.f32.xlu0 %v716_v16 }
 0x65d   :  { %723 = vmax.xlane.f32.xlu1 %v722_v18 }
 0x65f   :  { %720 = vmax.xlane.f32.xlu0 %v719_v19 }
 0x66e   :  { %761 = vrot.lane.b32.xlu1 %v5002_v53, %s4781_s8 }
 0x6e6   :  { %v715_v20 = vpop.xlane.xlu1 %714 }
 0x6e7   :  { %v725_v8 = vsub.f32 %v699_v5, %v715_v20 }
 0x6e8   :  { %v718_v21 = vpop.xlane.xlu0 %717 }
 0x6e9   :  { %v726_v22 = vsub.f32 %v702_v12, %v718_v21  ;;  %v729_v32 = vmul.f32 1.442695, %v725_v8 }
 0x6ea   :  { %v724_v23 = vpop.xlane.xlu1 %723 }
 0x6eb   :  { %v728_v25 = vsub.f32 %v710_v11, %v724_v23  ;;  %v731_v26 = vmul.f32 1.442695, %v726_v22 }
 0x6ec   :  { %v721_v14 = vpop.xlane.xlu0 %720 }
 0x6ed   :  { %v735_v28 = vmul.f32 1.442695, %v728_v25  ;;  %v727_v31 = vsub.f32 %v707_v15, %v721_v14 }
 0x6ee   :  { %v762_v48 = vpop.permute.xlu1 %761 }
 0x6ef   :  { %4587 = vpow2.f32 %v735_v28  ;;  %v733_v33 = vmul.f32 1.442695, %v727_v31 }
 0x6f0   :  { %4589 = vpow2.f32 %v731_v26 }
 0x6f1   :  { %4591 = vpow2.f32 %v733_v33 }
 0x6f2   :  { %4593 = vpow2.f32 %v729_v32 }
 0x6f9   :  { %v4588_v6 = vpop.eup %4587 }
 0x6fa   :  { %v4590_v34 = vpop.eup %4589  ;;  %v746_v37 = vsel %vm427_vm3, %v4588_v6, 0.0 }
 0x6fb   :  { %v4592_v40 = vpop.eup %4591  ;;  %747 = vadd.xlane.f32.xlu1 %v746_v37  ;;  %v740_v43 = vsel %vm427_vm3, %v4590_v34, 0.0 }
 0x6fc   :  { %v743_v42 = vsel %vm427_vm3, %v4592_v40, 0.0  ;;  %v4594_v17 = vpop.eup %4593 }
 0x6fd   :  { %744 = vadd.xlane.f32.xlu0 %v743_v42  ;;  %v737_v45 = vsel %vm427_vm3, %v4594_v17, 0.0 }
 0x6ff   :  { %741 = vadd.xlane.f32.xlu1 %v740_v43 }
 0x701   :  { %738 = vadd.xlane.f32.xlu0 %v737_v45 }
 0x710   :  { %828 = vrot.lane.b32.xlu1 %v5004_v56, %s4782_s9 }
 0x714   :  { %824 = vrot.lane.b32.xlu1 %v5010_v58, %s4783_s10 }
 0x717   :  { %759 = vrot.lane.b32.xlu0 %v5004_v56, %s4781_s8 }
 0x718   :  { %1123 = vrot.lane.b32.xlu1 %v5004_v56, %s4784_s11 }
 0x71b   :  { %830 = vrot.lane.b32.xlu0 %v5002_v53, %s4782_s9 }
 0x71c   :  { %1119 = vrot.lane.b32.xlu1 %v5010_v58, %s4778_s29 }
 0x71f   :  { %826 = vrot.lane.b32.xlu0 %v5006_v57, %s4783_s10 }
 0x723   :  { %1125 = vrot.lane.b32.xlu0 %v5002_v53, %s4784_s11 }
 0x727   :  { %1121 = vrot.lane.b32.xlu0 %v5006_v57, %s4778_s29 }
 0x788   :  { %v748_v54 = vpop.xlane.xlu1 %747 }
 0x78a   :  { %v745_v55 = vpop.xlane.xlu0 %744 }
 0x78b   :  { %4595 = vrcp.f32 %v745_v55 }
 0x78c   :  { %v742_v59 = vpop.xlane.xlu1 %741 }
 0x78d   :  { %4597 = vrcp.f32 %v742_v59 }
 0x78e   :  { %4599 = vrcp.f32 %v748_v54  ;;  %v739_v60 = vpop.xlane.xlu0 %738 }
 0x78f   :  { %4601 = vrcp.f32 %v739_v60 }
 0x790   :  { %v829_v5 = vpop.permute.xlu1 %828 }
 0x791   :  { %v839_v19 = vsel %vm651_vm5, %v829_v5, 0 }
 0x792   :  { %v760_v61 = vpop.permute.xlu0 %759 }
 0x793   :  { %4212 = vmatprep.subr.bf16.mxu1 %v760_v61 }
 0x794   :  { %4213 = vmatpush3.bf16.msra.mxu1 %v760_v61  ;;  %v825_v18 = vpop.permute.xlu1 %824 }
 0x795   :  { %4214 = vmatprep.subr.bf16.mxu1 %v762_v48  ;;  %v4596_v62 = vpop.eup %4595 }
 0x796   :  { %v755_v10 = vmul.f32 %v4596_v62, %v4592_v40  ;;  %v831_v20 = vpop.permute.xlu0 %830 }
 0x797   :  { %v4598_v0 = vpop.eup %4597  ;;  %v842_v21 = vsel %vm651_vm5, %v831_v20, 0 }
 0x798   :  { %v4600_v2 = vpop.eup %4599  ;;  %4215 = vmatpush3.bf16.msra.mxu1 %v762_v48  ;;  %v754_v12 = vmul.f32 %v4598_v0, %v4590_v34  ;;  %v1124_v22 = vpop.permute.xlu1 %1123 }
 0x799   :  { %v4602_v7 = vpop.eup %4601  ;;  %4492 = vmatprep.subr.msk.bf16.mxu1 %vm651_vm5, %v829_v5  ;;  %v756_v13 = vmul.f32 %v4600_v2, %v4588_v6  ;;  %v1134_v25 = vsel %vm651_vm5, %v1124_v22, 0 }
 0x79a   :  { %v753_v11 = vmul.f32 %v4602_v7, %v4594_v17  ;;  %v827_v23 = vpop.permute.xlu0 %826 }
 0x79b   :  { %v758_v16 = vpack.c.bf16 %v756_v13, %v755_v10 }
 0x79c   :  { %v757_v15 = vpack.c.bf16 %v754_v12, %v753_v11  ;;  %v1120_v8 = vpop.permute.xlu1 %1119 }
 0x79e   :  { %4216 = vmatprep.mubr.msk.bf16.mxu1 %vm427_vm3, %v757_v15  ;;  %v1126_v26 = vpop.permute.xlu0 %1125 }
 0x79f   :  { %4217 = vmatmul.mubr.msk.bf16.vlgmr.msra.gmra.mrb[12].mxu1 %vm427_vm3, %v758_v16  ;;  %v1137_v14 = vsel %vm651_vm5, %v1126_v26, 0 }
 0x7a0   :  { %4224 = vmatprep.mubr.msk.bf16.mxu1 %vm651_vm5, %v825_v18 }
 0x7a1   :  { %4221 = vmatpush3.bf16.xpose.msra.mxu1 %v839_v19 }
 0x7a2   :  { %4493 = vmatprep.subr.msk.bf16.mxu1 %vm651_vm5, %v831_v20  ;;  %v1122_v28 = vpop.permute.xlu0 %1121 }
 0x7a9   :  { %4223 = vmatpush3.bf16.xpose.msra.mxu1 %v842_v21 }
 0x7aa   :  { %4496 = vmatprep.subr.msk.bf16.mxu1 %vm651_vm5, %v1124_v22 }
 0x7b0   :  { %4225 = vmatmul.mubr.msk.bf16.vlgmr.msra.gmra.mrb[16].mxu1 %vm651_vm5, %v827_v23 }
 0x7b1   :  { %4249 = vmatpush3.bf16.xpose.msra.mxu1 %v1134_v25  ;;  %4252 = vmatprep.mubr.msk.bf16.mxu1 %vm651_vm5, %v1120_v8 }
 0x7b2   :  { %4497 = vmatprep.subr.msk.bf16.mxu1 %vm651_vm5, %v1126_v26 }
 0x7b9   :  { %4251 = vmatpush3.bf16.xpose.msra.mxu1 %v1137_v14 }
 0x7c0   :  { %4253 = vmatmul.mubr.msk.bf16.vlgmr.msra.gmra.mrb[20].mxu1 %vm651_vm5, %v1122_v28 }
 0x872   :  { %v5088_v31 = vpop.f32.mrb[12].mxu1 }
 0x873   :  { %v5090_v32 = vpop.f32.mrb[13].mxu1 }
 0x874   :  { %v5092_v33 = vpop.f32.mrb[14].mxu1 }
 0x875   :  { %v821_v6 = vpack.c.bf16 %v5092_v33, %v5088_v31  ;;  %v5096_v34 = vpop.f32.mrb[15].mxu1  ;;  %v367_v31 = vld [vmem:[%s5836_s4 + $0x50] sm:$0xf] }
 0x876   :  { %v820_v37 = vpack.c.bf16 %v5096_v34, %v5090_v32  ;;  %v1304_v33 = vsel %vm1008_vm6, %v367_v31, 0 }
 0x883   :  { %v4226_v40 = vpop.f32.mrb[16].mxu1 }
 0x884   :  { %v878_v42 = vpop.f32.mrb[17].mxu1  ;;  %v887_v59 = vadd.f32 %v4226_v40, %v5041_v9 }
 0x885   :  { %v879_v17 = vadd.f32 %v878_v42, %v5025_v63  ;;  %v4227_v43 = vpop.f32.mrb[18].mxu1 }
 0x886   :  { %v881_v45 = vpop.f32.mrb[19].mxu1  ;;  %v890_v48 = vadd.f32 %v4227_v43, %v5030_v3  ;;  %v899_v62 = vsel %vm427_vm3, %v887_v59, -inf }
 0x887   :  { %v882_v54 = vadd.f32 %v881_v45, %v5035_v4  ;;  %v893_v55 = vsel %vm427_vm3, %v879_v17, -inf }
 0x888   :  { %894 = vmax.xlane.f32.xlu1 %v893_v55  ;;  %v902_v61 = vsel %vm427_vm3, %v890_v48, -inf }
 0x889   :  { %v896_v60 = vsel %vm427_vm3, %v882_v54, -inf }
 0x88a   :  { %897 = vmax.xlane.f32.xlu0 %v896_v60 }
 0x88c   :  { %903 = vmax.xlane.f32.xlu1 %v902_v61 }
 0x88e   :  { %900 = vmax.xlane.f32.xlu0 %v899_v62 }
 0x893   :  { %v4254_v0 = vpop.f32.mrb[20].mxu1 }
 0x894   :  { %v1173_v2 = vpop.f32.mrb[21].mxu1  ;;  %v1182_v55 = vadd.f32 %v4254_v0, %v5041_v9 }
 0x895   :  { %v4255_v5 = vpop.f32.mrb[22].mxu1  ;;  %v1174_v43 = vadd.f32 %v1173_v2, %v5025_v63 }
 0x896   :  { %v1176_v7 = vpop.f32.mrb[23].mxu1  ;;  %v1194_v60 = vsel %vm427_vm3, %v1182_v55, -inf }
 0x897   :  { %v1177_v45 = vadd.f32 %v1176_v7, %v5035_v4 }
 0x915   :  { %v895_v10 = vpop.xlane.xlu1 %894 }
 0x916   :  { %v905_v15 = vsub.f32 %v879_v17, %v895_v10 }
 0x917   :  { %v898_v11 = vpop.xlane.xlu0 %897 }
 0x918   :  { %v906_v12 = vsub.f32 %v882_v54, %v898_v11  ;;  %v909_v22 = vmul.f32 1.442695, %v905_v15  ;;  %v1188_v54 = vsel %vm427_vm3, %v1174_v43, -inf }
 0x919   :  { %v904_v13 = vpop.xlane.xlu1 %903 }
 0x91a   :  { %v908_v16 = vsub.f32 %v890_v48, %v904_v13  ;;  %v911_v18 = vmul.f32 1.442695, %v906_v12  ;;  %v1185_v48 = vadd.f32 %v4255_v5, %v5030_v3 }
 0x91b   :  { %v901_v19 = vpop.xlane.xlu0 %900 }
 0x91c   :  { %v915_v20 = vmul.f32 1.442695, %v908_v16  ;;  %v907_v21 = vsub.f32 %v887_v59, %v901_v19  ;;  %v1191_v59 = vsel %vm427_vm3, %v1177_v45, -inf }
 0x91e   :  { %4603 = vpow2.f32 %v915_v20  ;;  %v913_v23 = vmul.f32 1.442695, %v907_v21 }
 0x91f   :  { %4605 = vpow2.f32 %v911_v18 }
 0x920   :  { %4607 = vpow2.f32 %v913_v23 }
 0x921   :  { %4609 = vpow2.f32 %v909_v22 }
 0x928   :  { %v4604_v8 = vpop.eup %4603 }
 0x929   :  { %v4606_v25 = vpop.eup %4605  ;;  %v926_v26 = vsel %vm427_vm3, %v4604_v8, 0.0 }
 0x92a   :  { %v4608_v14 = vpop.eup %4607  ;;  %927 = vadd.xlane.f32.xlu1 %v926_v26  ;;  %v920_v42 = vsel %vm427_vm3, %v4606_v25, 0.0 }
 0x92b   :  { %v923_v28 = vsel %vm427_vm3, %v4608_v14, 0.0  ;;  %v4610_v40 = vpop.eup %4609 }
 0x92c   :  { %924 = vadd.xlane.f32.xlu0 %v923_v28  ;;  %v917_v17 = vsel %vm427_vm3, %v4610_v40, 0.0 }
 0x92e   :  { %921 = vadd.xlane.f32.xlu1 %v920_v42 }
 0x930   :  { %918 = vadd.xlane.f32.xlu0 %v917_v17 }
 0x93f   :  { %941 = vrot.lane.b32.xlu1 %v5002_v53, %s4785_s12 }
 0x943   :  { %1363 = vrot.lane.b32.xlu1 %v5004_v56, %s4786_s13 }
 0x946   :  { %939 = vrot.lane.b32.xlu0 %v5004_v56, %s4785_s12 }
 0x947   :  { %1359 = vrot.lane.b32.xlu1 %v5010_v58, %s4787_s14  ;;  %v1197_v58 = vsel %vm427_vm3, %v1185_v48, -inf }
 0x94a   :  { %1365 = vrot.lane.b32.xlu0 %v5002_v53, %s4786_s13 }
 0x94e   :  { %1361 = vrot.lane.b32.xlu0 %v5006_v57, %s4787_s14 }
 0x96b   :  { %1189 = vmax.xlane.f32.xlu1 %v1188_v54 }
 0x96d   :  { %1192 = vmax.xlane.f32.xlu0 %v1191_v59 }
 0x96f   :  { %1198 = vmax.xlane.f32.xlu1 %v1197_v58 }
 0x971   :  { %1195 = vmax.xlane.f32.xlu0 %v1194_v60 }
 0x9b7   :  { %v928_v57 = vpop.xlane.xlu1 %927 }
 0x9b9   :  { %v925_v61 = vpop.xlane.xlu0 %924 }
 0x9ba   :  { %4611 = vrcp.f32 %v925_v61 }
 0x9bb   :  { %v922_v62 = vpop.xlane.xlu1 %921 }
 0x9bc   :  { %4613 = vrcp.f32 %v922_v62 }
 0x9bd   :  { %4615 = vrcp.f32 %v928_v57  ;;  %v919_v2 = vpop.xlane.xlu0 %918 }
 0x9be   :  { %4617 = vrcp.f32 %v919_v2 }
 0x9bf   :  { %v942_v5 = vpop.permute.xlu1 %941 }
 0x9c1   :  { %v940_v7 = vpop.permute.xlu0 %939 }
 0x9c2   :  { %4228 = vmatprep.subr.bf16.mxu0 %v940_v7 }
 0x9c3   :  { %4229 = vmatpush3.bf16.msra.mxu0 %v940_v7  ;;  %v1364_v0 = vpop.permute.xlu1 %1363 }
 0x9c4   :  { %4230 = vmatprep.subr.bf16.mxu0 %v942_v5  ;;  %4499 = vmatprep.subr.msk.bf16.mxu1 %vm651_vm5, %v1364_v0  ;;  %v1374_v10 = vsel %vm651_vm5, %v1364_v0, 0  ;;  %v4612_v11 = vpop.eup %4611 }
 0x9c5   :  { %v1366_v12 = vpop.permute.xlu0 %1365  ;;  %4271 = vmatpush3.bf16.xpose.msra.mxu1 %v1374_v10  ;;  %v935_v19 = vmul.f32 %v4612_v11, %v4608_v14  ;;  %v366_v10 = vld [vmem:[%s5836_s4 + $0x48] sm:$0xf] }
 0x9c6   :  { %v4614_v13 = vpop.eup %4613  ;;  %4500 = vmatprep.subr.msk.bf16.mxu1 %vm651_vm5, %v1366_v12  ;;  %v1377_v26 = vsel %vm651_vm5, %v1366_v12, 0  ;;  %v1010_v11 = vsel %vm1008_vm6, %v366_v10, 0  ;;  %v365_v12 = vld [vmem:[%s5836_s4 + $0x40] sm:$0xf] }
 0x9c7   :  { %v4616_v15 = vpop.eup %4615  ;;  %4231 = vmatpush3.bf16.msra.mxu0 %v942_v5  ;;  %v1360_v16 = vpop.permute.xlu1 %1359  ;;  %v934_v21 = vmul.f32 %v4614_v13, %v4606_v25 }
 0x9c8   :  { %v4618_v18 = vpop.eup %4617  ;;  %4274 = vmatprep.mubr.msk.bf16.mxu1 %vm651_vm5, %v1360_v16  ;;  %v936_v22 = vmul.f32 %v4616_v15, %v4604_v8  ;;  %4494 = vmatprep.subr.msk.bf16.mxu0 %vm1008_vm6, %v366_v10 }
 0x9c9   :  { %v933_v20 = vmul.f32 %v4618_v18, %v4610_v40  ;;  %v1362_v42 = vpop.permute.xlu0 %1361 }
 0x9ca   :  { %v938_v28 = vpack.c.bf16 %v936_v22, %v935_v19 }
 0x9cb   :  { %v937_v23 = vpack.c.bf16 %v934_v21, %v933_v20 }
 0x9cd   :  { %4232 = vmatprep.mubr.msk.bf16.mxu0 %vm427_vm3, %v937_v23  ;;  %4273 = vmatpush3.bf16.xpose.msra.mxu1 %v1377_v26 }
 0x9ce   :  { %4233 = vmatmul.mubr.msk.bf16.vlgmr.msra.gmra.mrb[20].mxu0 %vm427_vm3, %v938_v28  ;;  %v1068_v28 = vsel %vm1008_vm6, %v365_v12, 0 }
 0x9cf   :  { %4237 = vmatpush3.bf16.msra.mxu0 %v1010_v11 }
 0x9d0   :  { %4495 = vmatprep.subr.msk.bf16.mxu0 %vm1008_vm6, %v365_v12 }
 0x9d4   :  { %4275 = vmatmul.mubr.msk.bf16.vlgmr.msra.gmra.mrb[24].mxu1 %vm651_vm5, %v1362_v42 }
 0x9f8   :  { %v1190_v17 = vpop.xlane.xlu1 %1189 }
 0x9f9   :  { %v1200_v58 = vsub.f32 %v1174_v43, %v1190_v17 }
 0x9fa   :  { %v1193_v54 = vpop.xlane.xlu0 %1192 }
 0x9fb   :  { %v1201_v14 = vsub.f32 %v1177_v45, %v1193_v54  ;;  %v1204_v61 = vmul.f32 1.442695, %v1200_v58 }
 0x9fc   :  { %v1199_v59 = vpop.xlane.xlu1 %1198 }
 0x9fd   :  { %v1203_v40 = vsub.f32 %v1185_v48, %v1199_v59  ;;  %v1206_v25 = vmul.f32 1.442695, %v1201_v14 }
 0x9fe   :  { %v1196_v8 = vpop.xlane.xlu0 %1195 }
 0x9ff   :  { %v1210_v60 = vmul.f32 1.442695, %v1203_v40  ;;  %v1202_v57 = vsub.f32 %v1182_v55, %v1196_v8 }
 0xa01   :  { %4619 = vpow2.f32 %v1210_v60  ;;  %v1208_v62 = vmul.f32 1.442695, %v1202_v57 }
 0xa02   :  { %4621 = vpow2.f32 %v1206_v25 }
 0xa03   :  { %4623 = vpow2.f32 %v1208_v62 }
 0xa04   :  { %4625 = vpow2.f32 %v1204_v61 }
 0xa0b   :  { %v5140_v2 = vpop.eup %4619 }
 0xa0c   :  { %v4622_v5 = vpop.eup %4621  ;;  %v1221_v7 = vsel %vm427_vm3, %v5140_v2, 0.0 }
 0xa0d   :  { %v5144_v45 = vpop.eup %4623  ;;  %1222 = vadd.xlane.f32.xlu1 %v1221_v7  ;;  %v1215_v55 = vsel %vm427_vm3, %v4622_v5, 0.0 }
 0xa0e   :  { %v1218_v43 = vsel %vm427_vm3, %v5144_v45, 0.0  ;;  %v4626_v48 = vpop.eup %4625 }
 0xa0f   :  { %1219 = vadd.xlane.f32.xlu0 %v1218_v43  ;;  %v1212_v0 = vsel %vm427_vm3, %v4626_v48, 0.0 }
 0xa11   :  { %1216 = vadd.xlane.f32.xlu1 %v1215_v55 }
 0xa13   :  { %1213 = vadd.xlane.f32.xlu0 %v1212_v0 }
 0xa22   :  { %1236 = vrot.lane.b32.xlu1 %v5002_v53, %s4788_s15 }
 0xa29   :  { %1234 = vrot.lane.b32.xlu0 %v5004_v56, %s4788_s15 }
 0xa9a   :  { %v1223_v13 = vpop.xlane.xlu1 %1222 }
 0xa9c   :  { %v1220_v15 = vpop.xlane.xlu0 %1219 }
 0xa9e   :  { %v1217_v18 = vpop.xlane.xlu1 %1216 }
 0xaa0   :  { %v1214_v16 = vpop.xlane.xlu0 %1213 }
 0xaa1   :  { %v4234_v19 = vpop.f32.mrb[20].mxu0  ;;  %4627 = vrcp.f32 %v1214_v16 }
 0xaa2   :  { %v985_v20 = vpop.f32.mrb[21].mxu0  ;;  %4629 = vrcp.f32 %v1217_v18  ;;  %v1237_v7 = vpop.permute.xlu1 %1236 }
 0xaa3   :  { %v4235_v21 = vpop.f32.mrb[22].mxu0  ;;  %4631 = vrcp.f32 %v1220_v15 }
 0xaa4   :  { %v1001_v22 = vpack.c.bf16 %v4235_v21, %v4234_v19  ;;  %v988_v23 = vpop.f32.mrb[23].mxu0  ;;  %v1235_v54 = vpop.permute.xlu0 %1234  ;;  %4633 = vrcp.f32 %v1223_v13 }
 0xaa5   :  { %v1000_v26 = vpack.c.bf16 %v988_v23, %v985_v20 }
 0xaa7   :  { %4238 = vmatprep.mubr.msk.bf16.mxu0 %vm651_vm5, %v1000_v26  ;;  %v4276_v42 = vpop.f32.mrb[24].mxu1 }
 0xaa8   :  { %4239 = vmatmul.mubr.msk.bf16.vlgmr.msra.gmra.mrb[24].mxu0 %vm651_vm5, %v1001_v22  ;;  %v1413_v17 = vpop.f32.mrb[25].mxu1  ;;  %v1422_v57 = vadd.f32 %v4276_v42, %v5041_v9 }
 0xaa9   :  { %4243 = vmatpush3.bf16.msra.mxu0 %v1068_v28  ;;  %v1414_v14 = vadd.f32 %v1413_v17, %v5025_v63  ;;  %4244 = vmatprep.mubr.msk.bf16.mxu0 %vm651_vm5, %v820_v37  ;;  %v4277_v59 = vpop.f32.mrb[26].mxu1 }
 0xaaa   :  { %4256 = vmatprep.subr.bf16.mxu0 %v1235_v54  ;;  %v1416_v58 = vpop.f32.mrb[27].mxu1  ;;  %v1425_v40 = vadd.f32 %v4277_v59, %v5030_v3  ;;  %v1434_v37 = vsel %vm427_vm3, %v1422_v57, -inf }
 0xaab   :  { %v1417_v25 = vadd.f32 %v1416_v58, %v5035_v4  ;;  %v1428_v8 = vsel %vm427_vm3, %v1414_v14, -inf  ;;  %v4628_v60 = vpop.eup %4627 }
 0xaac   :  { %1429 = vmax.xlane.f32.xlu1 %v1428_v8  ;;  %v4630_v61 = vpop.eup %4629  ;;  %v1437_v32 = vsel %vm427_vm3, %v1425_v40, -inf  ;;  %v1228_v34 = vmul.f32 %v4628_v60, %v4626_v48 }
 0xaad   :  { %v1431_v63 = vsel %vm427_vm3, %v1417_v25, -inf  ;;  %v1229_v62 = vmul.f32 %v4630_v61, %v4622_v5  ;;  %v4632_v3 = vpop.eup %4631 }
 0xaae   :  { %1432 = vmax.xlane.f32.xlu0 %v1431_v63  ;;  %v4634_v9 = vpop.eup %4633  ;;  %v1230_v43 = vmul.f32 %v4632_v3, %v5144_v45 }
 0xaaf   :  { %v1232_v4 = vpack.c.bf16 %v1229_v62, %v1228_v34  ;;  %v1231_v48 = vmul.f32 %v4634_v9, %v5140_v2 }
 0xab0   :  { %1438 = vmax.xlane.f32.xlu1 %v1437_v32 }
 0xab1   :  { %v1233_v5 = vpack.c.bf16 %v1231_v48, %v1230_v43  ;;  %v368_v43 = vld [vmem:[%s5836_s4 + $0x58] sm:$0xf] }
 0xab2   :  { %1435 = vmax.xlane.f32.xlu0 %v1434_v37  ;;  %v1544_v48 = vsel %vm1008_vm6, %v368_v43, 0 }
 0xab4   :  { %4245 = vmatmul.mubr.msk.bf16.vlgmr.msra.gmra.mrb[24].mxu0 %vm651_vm5, %v821_v6 }
 0xab5   :  { %4257 = vmatpush3.bf16.msra.mxu0 %v1235_v54  ;;  %4260 = vmatprep.mubr.msk.bf16.mxu0 %vm427_vm3, %v1232_v4 }
 0xab6   :  { %4258 = vmatprep.subr.bf16.mxu0 %v1237_v7 }
 0xab9   :  { %4259 = vmatpush3.bf16.msra.mxu0 %v1237_v7 }
 0xaba   :  { %4498 = vmatprep.subr.msk.bf16.mxu0 %vm1008_vm6, %v367_v31 }
 0xabc   :  { %4261 = vmatmul.mubr.msk.bf16.vlgmr.msra.gmra.mrb[28].mxu0 %vm427_vm3, %v1233_v5  ;;  %v4542_v5 = vld [vmem:[%s5836_s4 + $0x104] ss:$8 sps:$4 sm:$0xff]  }
 0xabd   :  { %4265 = vmatpush3.bf16.msra.mxu0 %v1304_v33 }
 0xb39   :  { %v1430_v6 = vpop.xlane.xlu1 %1429 }
 0xb3a   :  { %v1440_v10 = vsub.f32 %v1414_v14, %v1430_v6 }
 0xb3b   :  { %v1433_v55 = vpop.xlane.xlu0 %1432 }
 0xb3c   :  { %v1441_v0 = vsub.f32 %v1417_v25, %v1433_v55  ;;  %v1444_v16 = vmul.f32 1.442695, %v1440_v10  ;;  %v4540_v10 = vld [vmem:[%s5836_s4 + $0x100] ss:$8 sps:$4 sm:$0xff]  }
 0xb3d   :  { %v1439_v45 = vpop.xlane.xlu1 %1438 }
 0xb3e   :  { %v1443_v11 = vsub.f32 %v1425_v40, %v1439_v45  ;;  %v1446_v2 = vmul.f32 1.442695, %v1441_v0 }
 0xb3f   :  { %v1436_v12 = vpop.xlane.xlu0 %1435 }
 0xb40   :  { %v1450_v13 = vmul.f32 1.442695, %v1443_v11  ;;  %v1442_v15 = vsub.f32 %v1422_v57, %v1436_v12  ;;  %v4545_v11 = vld [vmem:[%s5836_s4 + $0x114] ss:$8 sps:$4 sm:$0xff]   ;;  %v391_v12 = vld [vmem:[%s5837_s5 + $0x2] ss:$0 sm:$0xff] }
 0xb42   :  { %4635 = vpow2.f32 %v1450_v13  ;;  %v1448_v18 = vmul.f32 1.442695, %v1442_v15 }
 0xb43   :  { %4637 = vpow2.f32 %v1446_v2  ;;  %v4543_v2 = vld [vmem:[%s5836_s4 + $0x110] ss:$8 sps:$4 sm:$0xff]  }
 0xb44   :  { %4639 = vpow2.f32 %v1448_v18 }
 0xb45   :  { %4641 = vpow2.f32 %v1444_v16 }
 0xb4c   :  { %v4636_v19 = vpop.eup %4635 }
 0xb4d   :  { %v4638_v20 = vpop.eup %4637  ;;  %v1461_v21 = vsel %vm427_vm3, %v4636_v19, 0.0 }
 0xb4e   :  { %v4640_v22 = vpop.eup %4639  ;;  %1462 = vadd.xlane.f32.xlu1 %v1461_v21  ;;  %v1455_v28 = vsel %vm427_vm3, %v4638_v20, 0.0  ;;  %v403_v21 = vsub.s32 1, %v4951_v29 }
 0xb4f   :  { %v1458_v23 = vsel %vm427_vm3, %v4640_v22, 0.0  ;;  %v4642_v26 = vpop.eup %4641 }
 0xb50   :  { %1459 = vadd.xlane.f32.xlu0 %v1458_v23  ;;  %v1452_v42 = vsel %vm427_vm3, %v4642_v26, 0.0 }
 0xb52   :  { %1456 = vadd.xlane.f32.xlu1 %v1455_v28 }
 0xb54   :  { %1453 = vadd.xlane.f32.xlu0 %v1452_v42 }
 0xb63   :  { %1476 = vrot.lane.b32.xlu1 %v5002_v53, %s4789_s22 }
 0xb6a   :  { %1474 = vrot.lane.b32.xlu0 %v5004_v56, %s4789_s22 }
 0xb8f   :  { %v4262_v17 = vpop.f32.mrb[28].mxu0 }
 0xb90   :  { %v1280_v54 = vpop.f32.mrb[29].mxu0 }
 0xb91   :  { %v4263_v14 = vpop.f32.mrb[30].mxu0 }
 0xb92   :  { %v1296_v59 = vpack.c.bf16 %v4263_v14, %v4262_v17  ;;  %v1283_v58 = vpop.f32.mrb[31].mxu0 }
 0xb93   :  { %v1295_v40 = vpack.c.bf16 %v1283_v58, %v1280_v54 }
 0xb95   :  { %4266 = vmatprep.mubr.msk.bf16.mxu0 %vm651_vm5, %v1295_v40 }
 0xb96   :  { %4267 = vmatmul.mubr.msk.bf16.vlgmr.msra.gmra.mrb[24].mxu0 %vm651_vm5, %v1296_v59 }
 0xbdb   :  { %v1463_v25 = vpop.xlane.xlu1 %1462 }
 0xbdd   :  { %v1460_v8 = vpop.xlane.xlu0 %1459 }
 0xbde   :  { %4643 = vrcp.f32 %v1460_v8 }
 0xbdf   :  { %v1457_v60 = vpop.xlane.xlu1 %1456 }
 0xbe0   :  { %4645 = vrcp.f32 %v1457_v60 }
 0xbe1   :  { %4647 = vrcp.f32 %v1463_v25  ;;  %v1454_v53 = vpop.xlane.xlu0 %1453 }
 0xbe2   :  { %4649 = vrcp.f32 %v1454_v53 }
 0xbe3   :  { %v1477_v56 = vpop.permute.xlu1 %1476 }
 0xbe5   :  { %v1475_v57 = vpop.permute.xlu0 %1474 }
 0xbe6   :  { %4278 = vmatprep.subr.bf16.mxu0 %v1475_v57 }
 0xbe7   :  { %4279 = vmatpush3.bf16.msra.mxu0 %v1475_v57 }
 0xbe8   :  { %4280 = vmatprep.subr.bf16.mxu0 %v1477_v56  ;;  %v4644_v63 = vpop.eup %4643 }
 0xbe9   :  { %v1470_v37 = vmul.f32 %v4644_v63, %v4640_v22 }
 0xbea   :  { %v4646_v61 = vpop.eup %4645 }
 0xbeb   :  { %v4648_v32 = vpop.eup %4647  ;;  %4281 = vmatpush3.bf16.msra.mxu0 %v1477_v56  ;;  %v1469_v3 = vmul.f32 %v4646_v61, %v4638_v20 }
 0xbec   :  { %v4650_v34 = vpop.eup %4649  ;;  %v1471_v4 = vmul.f32 %v4648_v32, %v4636_v19  ;;  %4501 = vmatprep.subr.msk.bf16.mxu0 %vm1008_vm6, %v368_v43  ;;  %v3958_v19 = vld [vmem:[%s5837_s5 + $0x10] ss:$8 sm:$0x3] }
 0xbed   :  { %v1468_v62 = vmul.f32 %v4650_v34, %v4642_v26  ;;  %v2014_v26 = vrot.slane %v3958_v19, %v403_v21 }
 0xbee   :  { %v1473_v7 = vpack.c.bf16 %v1471_v4, %v1470_v37 }
 0xbef   :  { %v1472_v9 = vpack.c.bf16 %v1469_v3, %v1468_v62 }
 0xbf1   :  { %4282 = vmatprep.mubr.msk.bf16.mxu0 %vm427_vm3, %v1472_v9 }
 0xbf2   :  { %4283 = vmatmul.mubr.msk.bf16.vlgmr.msra.gmra.mrb[32].mxu0 %vm427_vm3, %v1473_v7 }
 0xbf3   :  { %4287 = vmatpush3.bf16.msra.mxu0 %v1544_v48 }
 0xbf4   :  { %2037 = vmatprep.subr.bf16.mxu0 %v4542_v5 }
 0xcc5   :  { %v4284_v31 = vpop.f32.mrb[32].mxu0 }
 0xcc6   :  { %v1520_v33 = vpop.f32.mrb[33].mxu0 }
 0xcc7   :  { %v4285_v6 = vpop.f32.mrb[34].mxu0 }
 0xcc8   :  { %v1536_v55 = vpack.c.bf16 %v4285_v6, %v4284_v31  ;;  %v1523_v0 = vpop.f32.mrb[35].mxu0 }
 0xcc9   :  { %v1535_v45 = vpack.c.bf16 %v1523_v0, %v1520_v33 }
 0xccb   :  { %4288 = vmatprep.mubr.msk.bf16.mxu0 %vm651_vm5, %v1535_v45 }
 0xccc   :  { %4289 = vmatmul.mubr.msk.bf16.vlgmr.msra.gmra.mrb[24].mxu0 %vm651_vm5, %v1536_v55 }
 0xccd   :  { %2038 = vmatpush1.bf16.msra.mxu0 %v4540_v10  ;;  %2069 = vmatprep.mubr.bf16.mxu0 %v4779_v1 }
 0xcce   :  { %2039 = vmatprep.subr.bf16.mxu0 %v4545_v11 }
 0xcd1   :  { %2040 = vmatpush1.bf16.msra.mxu0 %v4543_v2 }
 0xcd4   :  { %3967 = vmatmul.mubr.msk.bf16.vlgmr.msra.gmra.mrb[36].mxu0 %vm427_vm3, %v4942_v24 }
 0xcd5   :  { %2079 = vmatprep.mubr.bf16.mxu0 %v4779_v1  ;;  %v5238_v1 = vrot.slane %v3958_v19, %v399_v30 }
 0xcdc   :  { %3968 = vmatmul.mubr.msk.bf16.gmra.mrb[40].mxu0 %vm427_vm3, %v4947_v27 }
 0xd9f   :  { %v4290_v13 = vpop.f32.mrb[24].mxu0 }
 0xda0   :  { %v1580_v15 = vpop.f32.mrb[25].mxu0  ;;  %v1601_v23 = vadd.f32 %v4290_v13, %v391_v12 }
 0xda1   :  { %v1599_v16 = vadd.f32 %v1580_v15, %v391_v12  ;;  %v4291_v18 = vpop.f32.mrb[26].mxu0 }
 0xda2   :  { %v1583_v20 = vpop.f32.mrb[27].mxu0  ;;  %v1602_v28 = vadd.f32 %v4291_v18, %v391_v12 }
 0xda3   :  { %v1600_v22 = vadd.f32 %v1583_v20, %v391_v12  ;;  %1607 = vrot.lane.b32.xlu1 %v1599_v16, %s4781_s8 }
 0xda5   :  { %1609 = vrot.lane.b32.xlu0 %v1600_v22, %s4781_s8 }
 0xda7   :  { %1611 = vrot.lane.b32.xlu1 %v1601_v23, %s4781_s8  ;;  %v2071_v42 = vpop.f32.mrb[36].mxu0 }
 0xda8   :  { %v5245_v17 = vadd.f32 %v2071_v42, %v5238_v1  ;;  %v2073_v54 = vpop.f32.mrb[37].mxu0 }
 0xda9   :  { %v5247_v14 = vadd.f32 %v2073_v54, %v2014_v26  ;;  %v5249_v59 = vpop.f32.mrb[38].mxu0  ;;  %1613 = vrot.lane.b32.xlu0 %v1602_v28, %s4781_s8 }
 0xdaa   :  { %v2077_v30 = vpop.f32.mrb[39].mxu0 }
 0xdab   :  { %v5252_v58 = vadd.f32 %v2077_v30, %v2014_v26 }
 0xdaf   :  { %v2081_v40 = vpop.f32.mrb[40].mxu0 }
 0xdb0   :  { %v5255_v25 = vadd.f32 %v2081_v40, %v5238_v1  ;;  %v2083_v8 = vpop.f32.mrb[41].mxu0  ;;  %v4546_v40 = vld [vmem:[%s5836_s4 + $0x60] ss:$8 sps:$4 sm:$0xff]  }
 0xdb1   :  { %v5257_v60 = vadd.f32 %v2083_v8, %v2014_v26  ;;  %v2085_v53 = vpop.f32.mrb[42].mxu0  ;;  %4292 = vmatprep.subr.bf16.mxu1 %v4546_v40  ;;  %v4547_v8 = vld [vmem:[%s5836_s4 + $0x70] ss:$8 sps:$4 sm:$0xff]  }
 0xdb2   :  { %v5260_v57 = vadd.f32 %v2085_v53, %v5238_v1  ;;  %v2087_v56 = vpop.f32.mrb[43].mxu0  ;;  %4293 = vmatpush3.bf16.msra.mxu1 %v4546_v40  ;;  %v4551_v40 = vld [vmem:[%s5836_s4 + $0xb0] ss:$8 sps:$4 sm:$0xff]  }
 0xdb3   :  { %v5262_v63 = vadd.f32 %v2087_v56, %v2014_v26  ;;  %4294 = vmatprep.subr.bf16.mxu1 %v4547_v8 }
 0xdb6   :  { %4295 = vmatpush3.bf16.msra.mxu1 %v4547_v8  ;;  %v4552_v8 = vld [vmem:[%s5836_s4 + $0xc0] ss:$8 sps:$4 sm:$0xff]  }
 0xe15   :  { %v1608_v61 = vpop.permute.xlu1 %1607 }
 0xe16   :  { %v1619_v32 = vmul.f32 %v1608_v61, %v4962_v35 }
 0xe17   :  { %v1610_v34 = vpop.permute.xlu0 %1609 }
 0xe18   :  { %v1620_v37 = vmul.f32 %v1610_v34, %v4966_v38  ;;  %1627 = vrot.lane.b32.xlu1 %v1619_v32, %s4781_s8 }
 0xe19   :  { %v1612_v62 = vpop.permute.xlu1 %1611 }
 0xe1a   :  { %v1621_v3 = vmul.f32 %v1612_v62, %v4977_v46  ;;  %1629 = vrot.lane.b32.xlu0 %v1620_v37, %s4781_s8 }
 0xe1b   :  { %v1614_v4 = vpop.permute.xlu0 %1613 }
 0xe1c   :  { %v1622_v9 = vmul.f32 %v1614_v4, %v4981_v50  ;;  %1631 = vrot.lane.b32.xlu1 %v1621_v3, %s4781_s8 }
 0xe1e   :  { %1633 = vrot.lane.b32.xlu0 %v1622_v9, %s4781_s8 }
 0xe8a   :  { %v1628_v7 = vpop.permute.xlu1 %1627 }
 0xe8b   :  { %v5273_v43 = vadd.f32 %v1628_v7, %v4876_v44  ;;  %v4771_v7 = vld [vmem:[%s5837_s5] ss:$8 sm:$0x3] }
 0xe8c   :  { %v1630_v48 = vpop.permute.xlu0 %1629 }
 0xe8d   :  { %v5276_v5 = vadd.f32 %v1630_v48, %v4883_v49  ;;  %v1643_v31 = vsel %vm427_vm3, %v5273_v43, 0.0  ;;  %v404_v48 = vrot.slane %v4771_v7, %v403_v21 }
 0xe8e   :  { %1644 = vadd.xlane.f32.xlu1 %v1643_v31  ;;  %v1632_v33 = vpop.permute.xlu1 %1631 }
 0xe8f   :  { %v5281_v6 = vadd.f32 %v1632_v33, %v4871_v41  ;;  %v1646_v55 = vsel %vm427_vm3, %v5276_v5, 0.0  ;;  %v5320_v31 = vadd.f32 %v4979_v47, %v404_v48  ;;  %v5323_v33 = vadd.f32 %v4983_v52, %v404_v48 }
 0xe90   :  { %1647 = vadd.xlane.f32.xlu0 %v1646_v55  ;;  %v1634_v0 = vpop.permute.xlu0 %1633 }
 0xe91   :  { %v5286_v44 = vadd.f32 %v1634_v0, %v4887_v51  ;;  %v1649_v49 = vsel %vm427_vm3, %v5281_v6, 0.0  ;;  %v1697_v29 = vadd.f32 1.0, %v5320_v31  ;;  %v1698_v21 = vadd.f32 1.0, %v5323_v33 }
 0xe93   :  { %v1652_v45 = vsel %vm427_vm3, %v5286_v44, 0.0 }
 0xe94   :  { %1650 = vadd.xlane.f32.xlu0 %v1649_v49  ;;  %1653 = vadd.xlane.f32.xlu1 %v1652_v45  ;;  %v5326_v49 = vadd.f32 %v4968_v39, %v404_v48 }
 0xe96   :  { %v1696_v52 = vadd.f32 1.0, %v5326_v49 }
 0xea5   :  { %1709 = vrot.lane.b32.xlu1 %v4966_v38, %s4790_s20 }
 0xf1b   :  { %v1645_v41 = vpop.xlane.xlu1 %1644 }
 0xf1c   :  { %v1655_v11 = vmul.f32 0.03125, %v1645_v41  ;;  %v5329_v41 = vadd.f32 %v4964_v36, %v404_v48 }
 0xf1d   :  { %v1648_v10 = vpop.xlane.xlu0 %1647 }
 0xf1e   :  { %v1656_v2 = vmul.f32 0.03125, %v1648_v10  ;;  %v1659_v16 = vsub.f32 %v5273_v43, %v1655_v11  ;;  %v1695_v39 = vadd.f32 1.0, %v5329_v41 }
 0xf20   :  { %v1660_v18 = vsub.f32 %v5276_v5, %v1656_v2  ;;  %v1663_v42 = vmul.f32 %v1659_v16, %v1659_v16 }
 0xf21   :  { %v1654_v12 = vpop.xlane.xlu1 %1653  ;;  %v1651_v13 = vpop.xlane.xlu0 %1650 }
 0xf22   :  { %v1658_v51 = vmul.f32 0.03125, %v1654_v12  ;;  %v1657_v15 = vmul.f32 0.03125, %v1651_v13  ;;  %v1664_v28 = vmul.f32 %v1660_v18, %v1660_v18  ;;  %v1667_v30 = vsel %vm427_vm3, %v1663_v42, 0.0 }
 0xf24   :  { %v1662_v19 = vsub.f32 %v5286_v44, %v1658_v51  ;;  %v1661_v20 = vsub.f32 %v5281_v6, %v1657_v15  ;;  %v1670_v54 = vsel %vm427_vm3, %v1664_v28, 0.0 }
 0xf25   :  { %v1710_v53 = vpop.permute.xlu1 %1709 }
 0xf26   :  { %v1666_v22 = vmul.f32 %v1662_v19, %v1662_v19  ;;  %v1665_v23 = vmul.f32 %v1661_v20, %v1661_v20 }
 0xf28   :  { %v1676_v38 = vsel %vm427_vm3, %v1666_v22, 0.0  ;;  %v1673_v26 = vsel %vm427_vm3, %v1665_v23, 0.0 }
 0xf29   :  { %1677 = vadd.xlane.f32.xlu1 %v1676_v38  ;;  %1674 = vadd.xlane.f32.xlu0 %v1673_v26 }
 0xf2d   :  { %1671 = vadd.xlane.f32.xlu1 %v1670_v54  ;;  %1668 = vadd.xlane.f32.xlu0 %v1667_v30  ;;  %v4550_v30 = vld [vmem:[%s5836_s4 + $0xa0] ss:$8 sps:$4 sm:$0xff]  }
 0xf3e   :  { %1711 = vrot.lane.b32.xlu1 %v4977_v46, %s4790_s20 }
 0xf43   :  { %1707 = vrot.lane.b32.xlu0 %v4962_v35, %s4790_s20 }
 0xf47   :  { %1713 = vrot.lane.b32.xlu0 %v4981_v50, %s4790_s20 }
 0xfb6   :  { %v1678_v46 = vpop.xlane.xlu1 %1677  ;;  %v1675_v56 = vpop.xlane.xlu0 %1674 }
 0xfb7   :  { %v1682_v61 = vmul.f32 0.03125, %v1678_v46  ;;  %v1681_v35 = vmul.f32 0.03125, %v1675_v56  ;;  %v4554_v46 = vld [vmem:[%s5836_s4 + $0xe0] ss:$8 sps:$4 sm:$0xff]   ;;  %v4555_v56 = vld [vmem:[%s5836_s4 + $0xf0] ss:$8 sps:$4 sm:$0xff]  }
 0xfb9   :  { %v1686_v32 = vadd.f32 1e-06, %v1682_v61  ;;  %v1685_v34 = vadd.f32 1e-06, %v1681_v35  ;;  %v392_v61 = vld [vmem:[%s5837_s5 + $0x3] ss:$0 sm:$0xff] }
 0xfba   :  { %v1672_v50 = vpop.xlane.xlu1 %1671  ;;  %v1669_v37 = vpop.xlane.xlu0 %1668 }
 0xfbb   :  { %4651 = vrsqrt.f32 %v1686_v32  ;;  %v1680_v62 = vmul.f32 0.03125, %v1672_v50  ;;  %v1679_v3 = vmul.f32 0.03125, %v1669_v37 }
 0xfbc   :  { %4653 = vrsqrt.f32 %v1685_v34 }
 0xfbd   :  { %v1684_v4 = vadd.f32 1e-06, %v1680_v62  ;;  %v1683_v9 = vadd.f32 1e-06, %v1679_v3 }
 0xfbe   :  { %v1708_v11 = vpop.permute.xlu0 %1707  ;;  %v1712_v22 = vpop.permute.xlu1 %1711 }
 0xfbf   :  { %4655 = vrsqrt.f32 %v1684_v4 }
 0xfc0   :  { %4657 = vrsqrt.f32 %v1683_v9 }
 0xfc2   :  { %v1714_v23 = vpop.permute.xlu0 %1713 }
 0xfc5   :  { %v4652_v55 = vpop.eup %4651 }
 0xfc6   :  { %v4654_v0 = vpop.eup %4653  ;;  %v1694_v45 = vmul.f32 %v4652_v55, %v1662_v19 }
 0xfc7   :  { %v1693_v10 = vmul.f32 %v4654_v0, %v1661_v20 }
 0xfc8   :  { %v1702_v51 = vmul.f32 %v1698_v21, %v1694_v45 }
 0xfc9   :  { %v4656_v47 = vpop.eup %4655  ;;  %v1701_v12 = vmul.f32 %v1697_v29, %v1693_v10 }
 0xfca   :  { %v4658_v2 = vpop.eup %4657  ;;  %v1692_v13 = vmul.f32 %v4656_v47, %v1660_v18  ;;  %v1722_v26 = vadd.f32 %v1714_v23, %v1702_v51  ;;  %v4548_v18 = vld [vmem:[%s5836_s4 + $0x80] ss:$8 sps:$4 sm:$0xff]  }
 0xfcb   :  { %v1691_v15 = vmul.f32 %v4658_v2, %v1659_v16  ;;  %v1721_v20 = vadd.f32 %v1712_v22, %v1701_v12  ;;  %4300 = vmatprep.subr.bf16.mxu1 %v4548_v18  ;;  %v4549_v16 = vld [vmem:[%s5836_s4 + $0x90] ss:$8 sps:$4 sm:$0xff]  }
 0xfcc   :  { %v1700_v19 = vmul.f32 %v1696_v52, %v1692_v13 }
 0xfcd   :  { %v1699_v36 = vmul.f32 %v1695_v39, %v1691_v15  ;;  %v1724_v54 = vpack.c.bf16 %v1722_v26, %v1721_v20 }
 0xfce   :  { %v1720_v38 = vadd.f32 %v1710_v53, %v1700_v19  ;;  %v4553_v53 = vld [vmem:[%s5836_s4 + $0xd0] ss:$8 sps:$4 sm:$0xff]  }
 0xfcf   :  { %v1719_v28 = vadd.f32 %v1708_v11, %v1699_v36 }
 0xfd1   :  { %v1723_v42 = vpack.c.bf16 %v1720_v38, %v1719_v28 }
 0xfd3   :  { %4296 = vmatprep.mubr.msk.bf16.mxu1 %vm427_vm3, %v1723_v42 }
 0xfd4   :  { %4297 = vmatmul.mubr.msk.bf16.vlgmr.msra.gmra.mrb[28].mxu1 %vm427_vm3, %v1724_v54 }
 0xfd5   :  { %4301 = vmatpush3.bf16.msra.mxu1 %v4548_v18 }
 0xfd6   :  { %4302 = vmatprep.subr.bf16.mxu1 %v4549_v16 }
 0xfd9   :  { %4303 = vmatpush3.bf16.msra.mxu1 %v4549_v16 }
 0xfda   :  { %4304 = vmatprep.subr.bf16.mxu1 %v4550_v30 }
 0xfdd   :  { %4305 = vmatpush3.bf16.msra.mxu1 %v4550_v30 }
 0xfde   :  { %4306 = vmatprep.subr.bf16.mxu1 %v4551_v40 }
 0xfe1   :  { %4307 = vmatpush3.bf16.msra.mxu1 %v4551_v40 }
 0xfe2   :  { %4308 = vmatprep.subr.bf16.mxu1 %v4552_v8 }
 0xfe5   :  { %4309 = vmatpush3.bf16.msra.mxu1 %v4552_v8 }
 0xfe6   :  { %4310 = vmatprep.subr.bf16.mxu1 %v4553_v53 }
 0xfe9   :  { %4311 = vmatpush3.bf16.msra.mxu1 %v4553_v53 }
 0xfea   :  { %4312 = vmatprep.subr.bf16.mxu1 %v4554_v46 }
 0xfed   :  { %4313 = vmatpush3.bf16.msra.mxu1 %v4554_v46 }
 0xfee   :  { %4314 = vmatprep.subr.bf16.mxu1 %v4555_v56 }
 0xff1   :  { %4315 = vmatpush3.bf16.msra.mxu1 %v4555_v56 }
0x10a7   :  { %v4298_v35 = vpop.f32.mrb[28].mxu1 }
0x10a8   :  { %v1786_v32 = vadd.f32 %v4298_v35, %v392_v61  ;;  %v1777_v34 = vpop.f32.mrb[29].mxu1 }
0x10a9   :  { %v1778_v50 = vadd.f32 %v1777_v34, %v392_v61  ;;  %v4299_v37 = vpop.f32.mrb[30].mxu1  ;;  %v393_v34 = vld [vmem:[%s5837_s5 + $0x4] ss:$0 sm:$0xff] }
0x10aa   :  { %v1794_v62 = vmul.f32 %v1786_v32, %v1786_v32  ;;  %v1789_v3 = vadd.f32 %v4299_v37, %v392_v61  ;;  %v1780_v4 = vpop.f32.mrb[31].mxu1 }
0x10ab   :  { %v1792_v9 = vmul.f32 %v1778_v50, %v1778_v50  ;;  %v1781_v7 = vadd.f32 %v1780_v4, %v392_v61 }
0x10ac   :  { %v1798_v48 = vmul.f32 %v1794_v62, %v1786_v32  ;;  %v1795_v55 = vmul.f32 %v1789_v3, %v1789_v3 }
0x10ad   :  { %v1796_v0 = vmul.f32 %v1792_v9, %v1778_v50  ;;  %v1793_v45 = vmul.f32 %v1781_v7, %v1781_v7 }
0x10ae   :  { %v1802_v10 = vmul.f32 0.044715, %v1798_v48  ;;  %v1799_v11 = vmul.f32 %v1795_v55, %v1789_v3 }
0x10af   :  { %v1800_v29 = vmul.f32 0.044715, %v1796_v0  ;;  %v1797_v21 = vmul.f32 %v1793_v45, %v1781_v7 }
0x10b0   :  { %v1806_v47 = vadd.f32 %v1802_v10, %v1786_v32  ;;  %v1803_v2 = vmul.f32 0.044715, %v1799_v11 }
0x10b1   :  { %v1804_v52 = vadd.f32 %v1800_v29, %v1778_v50  ;;  %v1801_v12 = vmul.f32 0.044715, %v1797_v21 }
0x10b2   :  { %v1810_v13 = vmul.f32 0.7978846, %v1806_v47  ;;  %v1807_v51 = vadd.f32 %v1803_v2, %v1789_v3 }
0x10b3   :  { %v1808_v39 = vmul.f32 0.7978846, %v1804_v52  ;;  %v1805_v15 = vadd.f32 %v1801_v12, %v1781_v7 }
0x10b4   :  { %4659 = vtanh.f32 %v1810_v13  ;;  %v1811_v19 = vmul.f32 0.7978846, %v1807_v51 }
0x10b5   :  { %4661 = vtanh.f32 %v1808_v39  ;;  %v1809_v22 = vmul.f32 0.7978846, %v1805_v15 }
0x10b6   :  { %4663 = vtanh.f32 %v1811_v19 }
0x10b7   :  { %4665 = vtanh.f32 %v1809_v22 }
0x10be   :  { %v4660_v36 = vpop.eup %4659 }
0x10bf   :  { %v4662_v23 = vpop.eup %4661  ;;  %v1818_v20 = vadd.f32 1.0, %v4660_v36 }
0x10c0   :  { %v4664_v38 = vpop.eup %4663  ;;  %v1816_v26 = vadd.f32 1.0, %v4662_v23 }
0x10c1   :  { %v4666_v28 = vpop.eup %4665  ;;  %v1822_v42 = vmul.f32 0.5, %v1818_v20  ;;  %v1819_v54 = vadd.f32 1.0, %v4664_v38 }
0x10c2   :  { %v1817_v18 = vadd.f32 1.0, %v4666_v28  ;;  %v1820_v16 = vmul.f32 0.5, %v1816_v26 }
0x10c3   :  { %v1823_v30 = vmul.f32 0.5, %v1819_v54  ;;  %v1826_v8 = vmul.f32 %v1822_v42, %v1786_v32 }
0x10c4   :  { %v1821_v40 = vmul.f32 0.5, %v1817_v18  ;;  %v1824_v46 = vmul.f32 %v1820_v16, %v1778_v50 }
0x10c5   :  { %v1827_v53 = vmul.f32 %v1823_v30, %v1789_v3 }
0x10c6   :  { %v1825_v56 = vmul.f32 %v1821_v40, %v1781_v7 }
0x10c7   :  { %v1829_v61 = vpack.c.bf16 %v1827_v53, %v1826_v8 }
0x10c8   :  { %v1828_v35 = vpack.c.bf16 %v1825_v56, %v1824_v46  ;;  %v2144_v46 = vadd.f32 1.0, %v5255_v25  ;;  %v2142_v56 = vadd.f32 1.0, %v5245_v17 }
0x10ca   :  { %4316 = vmatprep.mubr.bf16.mxu1 %v1828_v35  ;;  %v4556_v35 = vld [vmem:[%s5836_s4 + $0x120] ss:$8 sps:$4 sm:$0xff]  }
0x10cb   :  { %4317 = vmatmul.mubr.bf16.vlgmr.msra.gmra.mrb[32].mxu1 %v1829_v61  ;;  %v2145_v61 = vadd.f32 1.0, %v5260_v57  ;;  %4320 = vmatprep.subr.bf16.mxu0 %v4556_v35 }
0x10cc   :  { %4321 = vmatpush3.bf16.msra.mxu0 %v4556_v35 }
0x119e   :  { %v4318_v37 = vpop.f32.mrb[32].mxu1 }
0x119f   :  { %v1912_v62 = vpop.f32.mrb[33].mxu1  ;;  %v1921_v32 = vadd.f32 %v4318_v37, %v393_v34 }
0x11a0   :  { %v1913_v4 = vadd.f32 %v1912_v62, %v393_v34  ;;  %v4319_v9 = vpop.f32.mrb[34].mxu1 }
0x11a1   :  { %v1915_v48 = vpop.f32.mrb[35].mxu1  ;;  %v1924_v50 = vadd.f32 %v4319_v9, %v393_v34 }
0x11a2   :  { %v1916_v55 = vadd.f32 %v1915_v48, %v393_v34  ;;  %1931 = vrot.lane.b32.xlu1 %v1913_v4, %s4790_s20  ;;  %v4557_v34 = vld [vmem:[%s5836_s4 + $0x130] ss:$8 sps:$4 sm:$0xff]  }
0x11a3   :  { %4322 = vmatprep.subr.bf16.mxu0 %v4557_v34 }
0x11a4   :  { %1933 = vrot.lane.b32.xlu0 %v1916_v55, %s4790_s20  ;;  %4323 = vmatpush3.bf16.msra.mxu0 %v4557_v34 }
0x11a6   :  { %1935 = vrot.lane.b32.xlu1 %v1921_v32, %s4790_s20 }
0x11a8   :  { %1937 = vrot.lane.b32.xlu0 %v1924_v50, %s4790_s20 }
0x1214   :  { %v1932_v3 = vpop.permute.xlu1 %1931 }
0x1215   :  { %v1943_v7 = vmul.f32 %v1932_v3, %v5329_v41 }
0x1216   :  { %v1934_v0 = vpop.permute.xlu0 %1933 }
0x1217   :  { %v1944_v45 = vmul.f32 %v1934_v0, %v5326_v49  ;;  %1951 = vrot.lane.b32.xlu1 %v1943_v7, %s4780_s21 }
0x1218   :  { %v1936_v10 = vpop.permute.xlu1 %1935 }
0x1219   :  { %v1945_v11 = vmul.f32 %v1936_v10, %v5320_v31  ;;  %1953 = vrot.lane.b32.xlu0 %v1944_v45, %s4780_s21 }
0x121a   :  { %v1938_v29 = vpop.permute.xlu0 %1937 }
0x121b   :  { %v1946_v21 = vmul.f32 %v1938_v29, %v5323_v33  ;;  %1955 = vrot.lane.b32.xlu1 %v1945_v11, %s4780_s21 }
0x121d   :  { %1957 = vrot.lane.b32.xlu0 %v1946_v21, %s4780_s21 }
0x1289   :  { %v1952_v47 = vpop.permute.xlu1 %1951 }
0x128a   :  { %v5380_v41 = vadd.f32 %v1952_v47, %v5273_v43 }
0x128b   :  { %v1954_v2 = vpop.permute.xlu0 %1953 }
0x128c   :  { %v5383_v49 = vadd.f32 %v1954_v2, %v5276_v5  ;;  %v2090_v31 = vsel %vm427_vm3, %v5380_v41, 0.0 }
0x128d   :  { %2091 = vadd.xlane.f32.xlu1 %v2090_v31  ;;  %v1956_v52 = vpop.permute.xlu1 %1955 }
0x128e   :  { %v5388_v12 = vadd.f32 %v1956_v52, %v5281_v6  ;;  %v2093_v33 = vsel %vm427_vm3, %v5383_v49, 0.0  ;;  %v5401_v6 = vadd.f32 %v5249_v59, %v5238_v1 }
0x128f   :  { %2094 = vadd.xlane.f32.xlu0 %v2093_v33  ;;  %v1958_v13 = vpop.permute.xlu0 %1957 }
0x1290   :  { %v5393_v43 = vadd.f32 %v1958_v13, %v5286_v44  ;;  %v2096_v51 = vsel %vm427_vm3, %v5388_v12, 0.0  ;;  %v2143_v39 = vadd.f32 1.0, %v5401_v6 }
0x1292   :  { %v2099_v5 = vsel %vm427_vm3, %v5393_v43, 0.0 }
0x1293   :  { %2100 = vadd.xlane.f32.xlu1 %v2099_v5  ;;  %2097 = vadd.xlane.f32.xlu0 %v2096_v51 }
0x12a4   :  { %2152 = vrot.lane.b32.xlu1 %v2143_v39, %s4780_s21 }
0x131a   :  { %v2092_v15 = vpop.xlane.xlu1 %2091 }
0x131b   :  { %v2102_v44 = vmul.f32 0.03125, %v2092_v15 }
0x131c   :  { %v2095_v19 = vpop.xlane.xlu0 %2094 }
0x131d   :  { %v2103_v22 = vmul.f32 0.03125, %v2095_v19  ;;  %v2106_v26 = vsub.f32 %v5380_v41, %v2102_v44 }
0x131f   :  { %v2107_v28 = vsub.f32 %v5383_v49, %v2103_v22  ;;  %v2110_v30 = vmul.f32 %v2106_v26, %v2106_v26 }
0x1320   :  { %v2098_v36 = vpop.xlane.xlu0 %2097  ;;  %v2101_v23 = vpop.xlane.xlu1 %2100 }
0x1321   :  { %v2104_v20 = vmul.f32 0.03125, %v2098_v36  ;;  %v2105_v38 = vmul.f32 0.03125, %v2101_v23  ;;  %v2111_v40 = vmul.f32 %v2107_v28, %v2107_v28  ;;  %v2114_v8 = vsel %vm427_vm3, %v2110_v30, 0.0 }
0x1323   :  { %v2108_v42 = vsub.f32 %v5388_v12, %v2104_v20  ;;  %v2109_v1 = vsub.f32 %v5393_v43, %v2105_v38  ;;  %v2117_v53 = vsel %vm427_vm3, %v2111_v40, 0.0 }
0x1324   :  { %v2153_v37 = vpop.permute.xlu1 %2152 }
0x1325   :  { %v2112_v59 = vmul.f32 %v2108_v42, %v2108_v42  ;;  %v2113_v54 = vmul.f32 %v2109_v1, %v2109_v1 }
0x1327   :  { %v2120_v18 = vsel %vm427_vm3, %v2112_v59, 0.0  ;;  %v2123_v16 = vsel %vm427_vm3, %v2113_v54, 0.0 }
0x1328   :  { %2121 = vadd.xlane.f32.xlu0 %v2120_v18  ;;  %2124 = vadd.xlane.f32.xlu1 %v2123_v16 }
0x132c   :  { %2115 = vadd.xlane.f32.xlu0 %v2114_v8  ;;  %2118 = vadd.xlane.f32.xlu1 %v2117_v53 }
0x133d   :  { %2154 = vrot.lane.b32.xlu1 %v2144_v46, %s4780_s21 }
0x1342   :  { %2150 = vrot.lane.b32.xlu0 %v2142_v56, %s4780_s21 }
0x1346   :  { %2156 = vrot.lane.b32.xlu0 %v2145_v61, %s4780_s21 }
0x13b5   :  { %v2122_v62 = vpop.xlane.xlu0 %2121  ;;  %v2125_v4 = vpop.xlane.xlu1 %2124 }
0x13b6   :  { %v2128_v9 = vmul.f32 0.03125, %v2122_v62  ;;  %v2129_v48 = vmul.f32 0.03125, %v2125_v4 }
0x13b8   :  { %v2132_v55 = vadd.f32 1e-06, %v2128_v9  ;;  %v2133_v32 = vadd.f32 1e-06, %v2129_v48 }
0x13b9   :  { %v2116_v50 = vpop.xlane.xlu0 %2115  ;;  %v2119_v3 = vpop.xlane.xlu1 %2118 }
0x13ba   :  { %4667 = vrsqrt.f32 %v2132_v55  ;;  %v2126_v7 = vmul.f32 0.03125, %v2116_v50  ;;  %v2127_v0 = vmul.f32 0.03125, %v2119_v3  ;;  %v5457_v50 = vld [vmem:[%s5834_s3 + $0x48] sm:$0xff] }
0x13bb   :  { %4669 = vrsqrt.f32 %v2133_v32 }
0x13bc   :  { %v2130_v45 = vadd.f32 1e-06, %v2126_v7  ;;  %v2131_v10 = vadd.f32 1e-06, %v2127_v0 }
0x13bd   :  { %v2151_v11 = vpop.permute.xlu0 %2150  ;;  %v2155_v52 = vpop.permute.xlu1 %2154 }
0x13be   :  { %4671 = vrsqrt.f32 %v2130_v45  ;;  %v5463_v45 = vld [vmem:[%s5834_s3 + $0x60] sm:$0xff] }
0x13bf   :  { %4673 = vrsqrt.f32 %v2131_v10 }
0x13c1   :  { %v2157_v33 = vpop.permute.xlu0 %2156 }
0x13c4   :  { %v4668_v29 = vpop.eup %4667 }
0x13c5   :  { %v4670_v21 = vpop.eup %4669  ;;  %v2140_v47 = vmul.f32 %v4668_v29, %v2108_v42 }
0x13c6   :  { %v2141_v2 = vmul.f32 %v4670_v21, %v2109_v1 }
0x13c7   :  { %v2164_v51 = vmul.f32 %v2155_v52, %v2140_v47  ;;  %v5476_v47 = vld [vmem:[%s5834_s3 + $0x58] sm:$0xff] }
0x13c8   :  { %v4672_v31 = vpop.eup %4671  ;;  %v2165_v39 = vmul.f32 %v2157_v33, %v2141_v2 }
0x13c9   :  { %v4674_v13 = vpop.eup %4673  ;;  %v2138_v5 = vmul.f32 %v4672_v31, %v2106_v26  ;;  %v2168_v36 = vadd.f32 %v2164_v51, %v5255_v25  ;;  %v3959_v26 = vld [vmem:[%s5837_s5 + $0x11] ss:$0 sm:$0xff] }
0x13ca   :  { %v2139_v15 = vmul.f32 %v4674_v13, %v2107_v28  ;;  %v2169_v23 = vadd.f32 %v2165_v39, %v5260_v57 }
0x13cb   :  { %v2162_v19 = vmul.f32 %v2151_v11, %v2138_v5  ;;  %v5469_v11 = vld [vmem:[%s5834_s3 + $0x50] sm:$0xff] }
0x13cc   :  { %v2163_v44 = vmul.f32 %v2153_v37, %v2139_v15  ;;  %v2171_v42 = vpack.c.bf16 %v2169_v23, %v2168_v36 }
0x13cd   :  { %v2166_v22 = vadd.f32 %v2162_v19, %v5245_v17 }
0x13ce   :  { %v2167_v20 = vadd.f32 %v2163_v44, %v5401_v6 }
0x13d0   :  { %v2170_v38 = vpack.c.bf16 %v2167_v20, %v2166_v22 }
0x13d2   :  { %4324 = vmatprep.mubr.msk.bf16.mxu0 %vm427_vm3, %v2170_v38 }
0x13d3   :  { %4325 = vmatmul.mubr.msk.bf16.vlgmr.msra.gmra.mrb[44].mxu0 %vm427_vm3, %v2171_v42 }
0x14a6   :  { %v4326_v28 = vpop.f32.mrb[44].mxu0 }
0x14a7   :  { %v2233_v1 = vadd.f32 %v4326_v28, %v3959_v26  ;;  %v2224_v59 = vpop.f32.mrb[45].mxu0 }
0x14a8   :  { %v2225_v54 = vadd.f32 %v3959_v26, %v2224_v59  ;;  %v4327_v18 = vpop.f32.mrb[46].mxu0 }
0x14a9   :  { %v2236_v16 = vadd.f32 %v4327_v18, %v3959_v26  ;;  %v2227_v30 = vpop.f32.mrb[47].mxu0  ;;  %v2241_v8 = vmul.f32 0.35355338, %v2233_v1 }
0x14aa   :  { %v2228_v40 = vadd.f32 %v3959_v26, %v2227_v30  ;;  %v2239_v56 = vmul.f32 0.35355338, %v2225_v54 }
0x14ab   :  { %v2242_v53 = vmul.f32 0.35355338, %v2236_v16  ;;  %v5434_v46 = vpack.c.bf16 %v2236_v16, %v2233_v1 }
0x14ac   :  { %v2240_v61 = vmul.f32 0.35355338, %v2228_v40  ;;  %v5436_v35 = vpack.c.bf16 %v2228_v40, %v2225_v54 }
0x14ad   :  { %v5438_v34 = vpack.c.bf16 %v2242_v53, %v2241_v8  ;;  %2251 = vrot.lane.b32.xlu0 %v5434_v46, %s4780_s21 }
0x14ae   :  { %v5442_v37 = vpack.c.bf16 %v2240_v61, %v2239_v56  ;;  %2249 = vrot.lane.b32.xlu1 %v5436_v35, %s4780_s21 }
0x14b0   :  { %4332 = vmatprep.mubr.msk.bf16.mxu0 %vm651_vm5, %v5442_v37 }
0x151f   :  { %v2252_v9 = vpop.permute.xlu0 %2251 }
0x1520   :  { %v2250_v62 = vpop.permute.xlu1 %2249  ;;  %v2263_v48 = vsel %vm651_vm5, %v2252_v9, 0 }
0x1521   :  { %v2260_v4 = vsel %vm651_vm5, %v2250_v62, 0  ;;  %4502 = vmatprep.subr.msk.bf16.mxu0 %vm651_vm5, %v2250_v62 }
0x1522   :  { %4329 = vmatpush3.bf16.xpose.msra.mxu0 %v2260_v4 }
0x1523   :  { %4503 = vmatprep.subr.msk.bf16.mxu0 %vm651_vm5, %v2252_v9 }
0x152a   :  { %4331 = vmatpush3.bf16.xpose.msra.mxu0 %v2263_v48 }
0x1531   :  { %4333 = vmatmul.mubr.msk.bf16.vlgmr.msra.gmra.mrb[48].mxu0 %vm651_vm5, %v5438_v34 }
0x1604   :  { %v4334_v55 = vpop.f32.mrb[48].mxu0 }
0x1605   :  { %v2299_v32 = vpop.f32.mrb[49].mxu0  ;;  %v2308_v2 = vadd.f32 %v5476_v47, %v4334_v55 }
0x1606   :  { %v2300_v3 = vadd.f32 %v5457_v50, %v2299_v32  ;;  %v4335_v7 = vpop.f32.mrb[50].mxu0 }
0x1607   :  { %v2302_v0 = vpop.f32.mrb[51].mxu0  ;;  %v2311_v10 = vadd.f32 %v5463_v45, %v4335_v7  ;;  %v2320_v33 = vsel %vm427_vm3, %v2308_v2, -inf }
0x1608   :  { %v2303_v29 = vadd.f32 %v5469_v11, %v2302_v0  ;;  %v2314_v21 = vsel %vm427_vm3, %v2300_v3, -inf }
0x1609   :  { %2315 = vmax.xlane.f32.xlu1 %v2314_v21  ;;  %v2323_v52 = vsel %vm427_vm3, %v2311_v10, -inf }
0x160a   :  { %v2317_v31 = vsel %vm427_vm3, %v2303_v29, -inf }
0x160b   :  { %2318 = vmax.xlane.f32.xlu0 %v2317_v31 }
0x160d   :  { %2324 = vmax.xlane.f32.xlu1 %v2323_v52 }
0x160f   :  { %2321 = vmax.xlane.f32.xlu0 %v2320_v33 }
0x161e   :  { %2362 = vrot.lane.b32.xlu1 %v5434_v46, %s4781_s8 }
0x1696   :  { %v2316_v13 = vpop.xlane.xlu1 %2315 }
0x1697   :  { %v2326_v15 = vsub.f32 %v2300_v3, %v2316_v13 }
0x1698   :  { %v2319_v5 = vpop.xlane.xlu0 %2318 }
0x1699   :  { %v2327_v51 = vsub.f32 %v2303_v29, %v2319_v5  ;;  %v2330_v20 = vmul.f32 1.442695, %v2326_v15 }
0x169a   :  { %v2325_v39 = vpop.xlane.xlu1 %2324 }
0x169b   :  { %v2329_v19 = vsub.f32 %v2311_v10, %v2325_v39  ;;  %v2332_v44 = vmul.f32 1.442695, %v2327_v51 }
0x169c   :  { %v2322_v22 = vpop.xlane.xlu0 %2321 }
0x169d   :  { %v2336_v36 = vmul.f32 1.442695, %v2329_v19  ;;  %v2328_v23 = vsub.f32 %v2308_v2, %v2322_v22 }
0x169e   :  { %v2363_v30 = vpop.permute.xlu1 %2362 }
0x169f   :  { %4675 = vpow2.f32 %v2336_v36  ;;  %v2334_v38 = vmul.f32 1.442695, %v2328_v23 }
0x16a0   :  { %4677 = vpow2.f32 %v2332_v44 }
0x16a1   :  { %4679 = vpow2.f32 %v2334_v38 }
0x16a2   :  { %4681 = vpow2.f32 %v2330_v20 }
0x16a9   :  { %v4676_v42 = vpop.eup %4675 }
0x16aa   :  { %v4678_v26 = vpop.eup %4677  ;;  %v2347_v28 = vsel %vm427_vm3, %v4676_v42, 0.0 }
0x16ab   :  { %v4680_v1 = vpop.eup %4679  ;;  %2348 = vadd.xlane.f32.xlu1 %v2347_v28  ;;  %v2341_v18 = vsel %vm427_vm3, %v4678_v26, 0.0 }
0x16ac   :  { %v2344_v59 = vsel %vm427_vm3, %v4680_v1, 0.0  ;;  %v4682_v54 = vpop.eup %4681 }
0x16ad   :  { %2345 = vadd.xlane.f32.xlu0 %v2344_v59  ;;  %v2338_v16 = vsel %vm427_vm3, %v4682_v54, 0.0 }
0x16af   :  { %2342 = vadd.xlane.f32.xlu1 %v2341_v18 }
0x16b1   :  { %2339 = vadd.xlane.f32.xlu0 %v2338_v16 }
0x16c0   :  { %2429 = vrot.lane.b32.xlu1 %v5436_v35, %s4782_s9 }
0x16c4   :  { %2425 = vrot.lane.b32.xlu1 %v5442_v37, %s4783_s10 }
0x16c7   :  { %2360 = vrot.lane.b32.xlu0 %v5436_v35, %s4781_s8 }
0x16c8   :  { %2723 = vrot.lane.b32.xlu1 %v5436_v35, %s4784_s11 }
0x16cb   :  { %2431 = vrot.lane.b32.xlu0 %v5434_v46, %s4782_s9 }
0x16cc   :  { %2719 = vrot.lane.b32.xlu1 %v5442_v37, %s4778_s29 }
0x16cf   :  { %2427 = vrot.lane.b32.xlu0 %v5438_v34, %s4783_s10 }
0x16d3   :  { %2725 = vrot.lane.b32.xlu0 %v5434_v46, %s4784_s11 }
0x16d7   :  { %2721 = vrot.lane.b32.xlu0 %v5438_v34, %s4778_s29 }
0x1738   :  { %v2349_v40 = vpop.xlane.xlu1 %2348 }
0x173a   :  { %v2346_v8 = vpop.xlane.xlu0 %2345 }
0x173b   :  { %4683 = vrcp.f32 %v2346_v8 }
0x173c   :  { %v2343_v53 = vpop.xlane.xlu1 %2342 }
0x173d   :  { %4685 = vrcp.f32 %v2343_v53 }
0x173e   :  { %4687 = vrcp.f32 %v2349_v40  ;;  %v2340_v56 = vpop.xlane.xlu0 %2339 }
0x173f   :  { %4689 = vrcp.f32 %v2340_v56 }
0x1740   :  { %v2430_v48 = vpop.permute.xlu1 %2429 }
0x1741   :  { %v2440_v2 = vsel %vm651_vm5, %v2430_v48, 0 }
0x1742   :  { %v2361_v61 = vpop.permute.xlu0 %2360 }
0x1743   :  { %4336 = vmatprep.subr.bf16.mxu1 %v2361_v61 }
0x1744   :  { %4337 = vmatpush3.bf16.msra.mxu1 %v2361_v61  ;;  %v2426_v21 = vpop.permute.xlu1 %2425 }
0x1745   :  { %4338 = vmatprep.subr.bf16.mxu1 %v2363_v30  ;;  %v4684_v62 = vpop.eup %4683 }
0x1746   :  { %v2356_v32 = vmul.f32 %v4684_v62, %v4680_v1  ;;  %v2432_v31 = vpop.permute.xlu0 %2431 }
0x1747   :  { %v4686_v4 = vpop.eup %4685  ;;  %v2443_v52 = vsel %vm651_vm5, %v2432_v31, 0 }
0x1748   :  { %v4688_v9 = vpop.eup %4687  ;;  %4339 = vmatpush3.bf16.msra.mxu1 %v2363_v30  ;;  %v2355_v7 = vmul.f32 %v4686_v4, %v4678_v26  ;;  %v2724_v33 = vpop.permute.xlu1 %2723 }
0x1749   :  { %v4690_v55 = vpop.eup %4689  ;;  %4504 = vmatprep.subr.msk.bf16.mxu1 %vm651_vm5, %v2430_v48  ;;  %v2357_v0 = vmul.f32 %v4688_v9, %v4676_v42  ;;  %v2734_v5 = vsel %vm651_vm5, %v2724_v33, 0 }
0x174a   :  { %v2354_v3 = vmul.f32 %v4690_v55, %v4682_v54  ;;  %v2428_v13 = vpop.permute.xlu0 %2427 }
0x174b   :  { %v2359_v29 = vpack.c.bf16 %v2357_v0, %v2356_v32 }
0x174c   :  { %v2358_v10 = vpack.c.bf16 %v2355_v7, %v2354_v3  ;;  %v2720_v51 = vpop.permute.xlu1 %2719 }
0x174e   :  { %4340 = vmatprep.mubr.msk.bf16.mxu1 %vm427_vm3, %v2358_v10  ;;  %v2726_v39 = vpop.permute.xlu0 %2725 }
0x174f   :  { %4341 = vmatmul.mubr.msk.bf16.vlgmr.msra.gmra.mrb[36].mxu1 %vm427_vm3, %v2359_v29  ;;  %v2737_v15 = vsel %vm651_vm5, %v2726_v39, 0 }
0x1750   :  { %4348 = vmatprep.mubr.msk.bf16.mxu1 %vm651_vm5, %v2426_v21 }
0x1751   :  { %4345 = vmatpush3.bf16.xpose.msra.mxu1 %v2440_v2 }
0x1752   :  { %4505 = vmatprep.subr.msk.bf16.mxu1 %vm651_vm5, %v2432_v31  ;;  %v2722_v19 = vpop.permute.xlu0 %2721 }
0x1759   :  { %4347 = vmatpush3.bf16.xpose.msra.mxu1 %v2443_v52 }
0x175a   :  { %4508 = vmatprep.subr.msk.bf16.mxu1 %vm651_vm5, %v2724_v33 }
0x1760   :  { %4349 = vmatmul.mubr.msk.bf16.vlgmr.msra.gmra.mrb[40].mxu1 %vm651_vm5, %v2428_v13 }
0x1761   :  { %4373 = vmatpush3.bf16.xpose.msra.mxu1 %v2734_v5  ;;  %4376 = vmatprep.mubr.msk.bf16.mxu1 %vm651_vm5, %v2720_v51 }
0x1762   :  { %4509 = vmatprep.subr.msk.bf16.mxu1 %vm651_vm5, %v2726_v39 }
0x1769   :  { %4375 = vmatpush3.bf16.xpose.msra.mxu1 %v2737_v15 }
0x1770   :  { %4377 = vmatmul.mubr.msk.bf16.vlgmr.msra.gmra.mrb[44].mxu1 %vm651_vm5, %v2722_v19 }
0x1822   :  { %v5520_v44 = vpop.f32.mrb[36].mxu1 }
0x1823   :  { %v5522_v22 = vpop.f32.mrb[37].mxu1 }
0x1824   :  { %v5524_v36 = vpop.f32.mrb[38].mxu1 }
0x1825   :  { %v2422_v23 = vpack.c.bf16 %v5524_v36, %v5520_v44  ;;  %v5528_v20 = vpop.f32.mrb[39].mxu1  ;;  %v3936_v44 = vld [vmem:[%s5836_s4 + $0x150] sm:$0xf] }
0x1826   :  { %v2421_v38 = vpack.c.bf16 %v5528_v20, %v5522_v22  ;;  %v2904_v36 = vsel %vm1008_vm6, %v3936_v44, 0 }
0x1833   :  { %v4350_v42 = vpop.f32.mrb[40].mxu1 }
0x1834   :  { %v2479_v26 = vpop.f32.mrb[41].mxu1  ;;  %v2488_v30 = vadd.f32 %v5476_v47, %v4350_v42 }
0x1835   :  { %v2480_v28 = vadd.f32 %v5457_v50, %v2479_v26  ;;  %v4351_v1 = vpop.f32.mrb[42].mxu1 }
0x1836   :  { %v2482_v59 = vpop.f32.mrb[43].mxu1  ;;  %v2491_v54 = vadd.f32 %v5463_v45, %v4351_v1  ;;  %v2500_v53 = vsel %vm427_vm3, %v2488_v30, -inf }
0x1837   :  { %v2483_v18 = vadd.f32 %v5469_v11, %v2482_v59  ;;  %v2494_v16 = vsel %vm427_vm3, %v2480_v28, -inf }
0x1838   :  { %2495 = vmax.xlane.f32.xlu1 %v2494_v16  ;;  %v2503_v8 = vsel %vm427_vm3, %v2491_v54, -inf }
0x1839   :  { %v2497_v40 = vsel %vm427_vm3, %v2483_v18, -inf }
0x183a   :  { %2498 = vmax.xlane.f32.xlu0 %v2497_v40 }
0x183c   :  { %2504 = vmax.xlane.f32.xlu1 %v2503_v8 }
0x183e   :  { %2501 = vmax.xlane.f32.xlu0 %v2500_v53 }
0x1843   :  { %v4378_v56 = vpop.f32.mrb[44].mxu1 }
0x1844   :  { %v2773_v61 = vpop.f32.mrb[45].mxu1  ;;  %v2782_v59 = vadd.f32 %v5476_v47, %v4378_v56 }
0x1845   :  { %v4379_v62 = vpop.f32.mrb[46].mxu1  ;;  %v2774_v42 = vadd.f32 %v5457_v50, %v2773_v61 }
0x1846   :  { %v2776_v4 = vpop.f32.mrb[47].mxu1 }
0x1847   :  { %v2777_v26 = vadd.f32 %v5469_v11, %v2776_v4  ;;  %v2788_v1 = vsel %vm427_vm3, %v2774_v42, -inf }
0x18c5   :  { %v2496_v9 = vpop.xlane.xlu1 %2495 }
0x18c6   :  { %v2506_v3 = vsub.f32 %v2480_v28, %v2496_v9  ;;  %v2785_v28 = vadd.f32 %v5463_v45, %v4379_v62 }
0x18c7   :  { %v2499_v48 = vpop.xlane.xlu0 %2498 }
0x18c8   :  { %v2507_v55 = vsub.f32 %v2483_v18, %v2499_v48  ;;  %v2510_v2 = vmul.f32 1.442695, %v2506_v3  ;;  %v2794_v18 = vsel %vm427_vm3, %v2782_v59, -inf }
0x18c9   :  { %v2505_v32 = vpop.xlane.xlu1 %2504 }
0x18ca   :  { %v2509_v7 = vsub.f32 %v2491_v54, %v2505_v32  ;;  %v2512_v0 = vmul.f32 1.442695, %v2507_v55  ;;  %v2791_v54 = vsel %vm427_vm3, %v2777_v26, -inf }
0x18cb   :  { %v2502_v10 = vpop.xlane.xlu0 %2501 }
0x18cc   :  { %v2516_v29 = vmul.f32 1.442695, %v2509_v7  ;;  %v2508_v21 = vsub.f32 %v2488_v30, %v2502_v10 }
0x18ce   :  { %4691 = vpow2.f32 %v2516_v29  ;;  %v2514_v31 = vmul.f32 1.442695, %v2508_v21 }
0x18cf   :  { %4693 = vpow2.f32 %v2512_v0 }
0x18d0   :  { %4695 = vpow2.f32 %v2514_v31 }
0x18d1   :  { %4697 = vpow2.f32 %v2510_v2 }
0x18d8   :  { %v4692_v52 = vpop.eup %4691 }
0x18d9   :  { %v4694_v33 = vpop.eup %4693  ;;  %v2527_v13 = vsel %vm427_vm3, %v4692_v52, 0.0 }
0x18da   :  { %v4696_v5 = vpop.eup %4695  ;;  %2528 = vadd.xlane.f32.xlu1 %v2527_v13  ;;  %v2521_v15 = vsel %vm427_vm3, %v4694_v33, 0.0 }
0x18db   :  { %v2524_v51 = vsel %vm427_vm3, %v4696_v5, 0.0  ;;  %v4698_v39 = vpop.eup %4697 }
0x18dc   :  { %2525 = vadd.xlane.f32.xlu0 %v2524_v51  ;;  %v2518_v19 = vsel %vm427_vm3, %v4698_v39, 0.0 }
0x18de   :  { %2522 = vadd.xlane.f32.xlu1 %v2521_v15 }
0x18e0   :  { %2519 = vadd.xlane.f32.xlu0 %v2518_v19 }
0x18ef   :  { %2542 = vrot.lane.b32.xlu1 %v5434_v46, %s4785_s12 }
0x18f3   :  { %2963 = vrot.lane.b32.xlu1 %v5436_v35, %s4786_s13 }
0x18f6   :  { %2540 = vrot.lane.b32.xlu0 %v5436_v35, %s4785_s12 }
0x18f7   :  { %2959 = vrot.lane.b32.xlu1 %v5442_v37, %s4787_s14  ;;  %v2797_v37 = vsel %vm427_vm3, %v2785_v28, -inf }
0x18fa   :  { %2965 = vrot.lane.b32.xlu0 %v5434_v46, %s4786_s13 }
0x18fe   :  { %2961 = vrot.lane.b32.xlu0 %v5438_v34, %s4787_s14 }
0x191b   :  { %2789 = vmax.xlane.f32.xlu1 %v2788_v1 }
0x191d   :  { %2792 = vmax.xlane.f32.xlu0 %v2791_v54 }
0x191f   :  { %2798 = vmax.xlane.f32.xlu1 %v2797_v37 }
0x1921   :  { %2795 = vmax.xlane.f32.xlu0 %v2794_v18 }
0x1967   :  { %v2529_v34 = vpop.xlane.xlu1 %2528 }
0x1969   :  { %v2526_v16 = vpop.xlane.xlu0 %2525 }
0x196a   :  { %4699 = vrcp.f32 %v2526_v16 }
0x196b   :  { %v2523_v30 = vpop.xlane.xlu1 %2522 }
0x196c   :  { %4701 = vrcp.f32 %v2523_v30 }
0x196d   :  { %4703 = vrcp.f32 %v2529_v34  ;;  %v2520_v40 = vpop.xlane.xlu0 %2519 }
0x196e   :  { %4705 = vrcp.f32 %v2520_v40 }
0x196f   :  { %v2543_v8 = vpop.permute.xlu1 %2542 }
0x1971   :  { %v2541_v53 = vpop.permute.xlu0 %2540 }
0x1972   :  { %4352 = vmatprep.subr.bf16.mxu0 %v2541_v53 }
0x1973   :  { %4353 = vmatpush3.bf16.msra.mxu0 %v2541_v53  ;;  %v2964_v56 = vpop.permute.xlu1 %2963 }
0x1974   :  { %v2974_v61 = vsel %vm651_vm5, %v2964_v56, 0  ;;  %4354 = vmatprep.subr.bf16.mxu0 %v2543_v8  ;;  %4511 = vmatprep.subr.msk.bf16.mxu1 %vm651_vm5, %v2964_v56  ;;  %v4700_v62 = vpop.eup %4699  ;;  %v3934_v56 = vld [vmem:[%s5836_s4 + $0x140] sm:$0xf] }
0x1975   :  { %v2966_v4 = vpop.permute.xlu0 %2965  ;;  %4395 = vmatpush3.bf16.xpose.msra.mxu1 %v2974_v61  ;;  %v2536_v3 = vmul.f32 %v4700_v62, %v4696_v5 }
0x1976   :  { %v4702_v9 = vpop.eup %4701  ;;  %4512 = vmatprep.subr.msk.bf16.mxu1 %vm651_vm5, %v2966_v4  ;;  %v2977_v21 = vsel %vm651_vm5, %v2966_v4, 0 }
0x1977   :  { %v4704_v48 = vpop.eup %4703  ;;  %4355 = vmatpush3.bf16.msra.mxu0 %v2543_v8  ;;  %v2960_v55 = vpop.permute.xlu1 %2959  ;;  %v2535_v0 = vmul.f32 %v4702_v9, %v4694_v33  ;;  %v3935_v8 = vld [vmem:[%s5836_s4 + $0x148] sm:$0xf] }
0x1978   :  { %v4706_v32 = vpop.eup %4705  ;;  %4398 = vmatprep.mubr.msk.bf16.mxu1 %vm651_vm5, %v2960_v55  ;;  %v2537_v10 = vmul.f32 %v4704_v48, %v4692_v52  ;;  %4506 = vmatprep.subr.msk.bf16.mxu0 %vm1008_vm6, %v3935_v8  ;;  %v2610_v53 = vsel %vm1008_vm6, %v3935_v8, 0 }
0x1979   :  { %v2534_v7 = vmul.f32 %v4706_v32, %v4698_v39  ;;  %v2962_v31 = vpop.permute.xlu0 %2961 }
0x197a   :  { %v2539_v2 = vpack.c.bf16 %v2537_v10, %v2536_v3  ;;  %v2668_v10 = vsel %vm1008_vm6, %v3934_v56, 0 }
0x197b   :  { %v2538_v29 = vpack.c.bf16 %v2535_v0, %v2534_v7 }
0x197d   :  { %4356 = vmatprep.mubr.msk.bf16.mxu0 %vm427_vm3, %v2538_v29  ;;  %4397 = vmatpush3.bf16.xpose.msra.mxu1 %v2977_v21 }
0x197e   :  { %4357 = vmatmul.mubr.msk.bf16.vlgmr.msra.gmra.mrb[52].mxu0 %vm427_vm3, %v2539_v2 }
0x197f   :  { %4361 = vmatpush3.bf16.msra.mxu0 %v2610_v53 }
0x1980   :  { %4507 = vmatprep.subr.msk.bf16.mxu0 %vm1008_vm6, %v3934_v56 }
0x1984   :  { %4399 = vmatmul.mubr.msk.bf16.vlgmr.msra.gmra.mrb[48].mxu1 %vm651_vm5, %v2962_v31 }
0x19a8   :  { %v2790_v13 = vpop.xlane.xlu1 %2789 }
0x19a9   :  { %v2800_v19 = vsub.f32 %v2774_v42, %v2790_v13 }
0x19aa   :  { %v2793_v51 = vpop.xlane.xlu0 %2792 }
0x19ab   :  { %v2801_v5 = vsub.f32 %v2777_v26, %v2793_v51  ;;  %v2804_v37 = vmul.f32 1.442695, %v2800_v19 }
0x19ac   :  { %v2799_v15 = vpop.xlane.xlu1 %2798 }
0x19ad   :  { %v2803_v39 = vsub.f32 %v2785_v28, %v2799_v15  ;;  %v2806_v33 = vmul.f32 1.442695, %v2801_v5 }
0x19ae   :  { %v2796_v52 = vpop.xlane.xlu0 %2795 }
0x19af   :  { %v2810_v1 = vmul.f32 1.442695, %v2803_v39  ;;  %v2802_v54 = vsub.f32 %v2782_v59, %v2796_v52 }
0x19b1   :  { %4707 = vpow2.f32 %v2810_v1  ;;  %v2808_v18 = vmul.f32 1.442695, %v2802_v54 }
0x19b2   :  { %4709 = vpow2.f32 %v2806_v33 }
0x19b3   :  { %4711 = vpow2.f32 %v2808_v18 }
0x19b4   :  { %4713 = vpow2.f32 %v2804_v37 }
0x19bb   :  { %v5572_v34 = vpop.eup %4707 }
0x19bc   :  { %v4710_v16 = vpop.eup %4709  ;;  %v2821_v30 = vsel %vm427_vm3, %v5572_v34, 0.0 }
0x19bd   :  { %v5576_v26 = vpop.eup %4711  ;;  %2822 = vadd.xlane.f32.xlu1 %v2821_v30  ;;  %v2815_v59 = vsel %vm427_vm3, %v4710_v16, 0.0 }
0x19be   :  { %v2818_v42 = vsel %vm427_vm3, %v5576_v26, 0.0  ;;  %v4714_v28 = vpop.eup %4713 }
0x19bf   :  { %2819 = vadd.xlane.f32.xlu0 %v2818_v42  ;;  %v2812_v40 = vsel %vm427_vm3, %v4714_v28, 0.0 }
0x19c1   :  { %2816 = vadd.xlane.f32.xlu1 %v2815_v59 }
0x19c3   :  { %2813 = vadd.xlane.f32.xlu0 %v2812_v40 }
0x19d2   :  { %2836 = vrot.lane.b32.xlu1 %v5434_v46, %s4788_s15 }
0x19d9   :  { %2834 = vrot.lane.b32.xlu0 %v5436_v35, %s4788_s15 }
0x1a4a   :  { %v2823_v61 = vpop.xlane.xlu1 %2822 }
0x1a4c   :  { %v2820_v62 = vpop.xlane.xlu0 %2819 }
0x1a4e   :  { %v2817_v9 = vpop.xlane.xlu1 %2816 }
0x1a50   :  { %v2814_v4 = vpop.xlane.xlu0 %2813 }
0x1a51   :  { %v4358_v48 = vpop.f32.mrb[52].mxu0  ;;  %4715 = vrcp.f32 %v2814_v4 }
0x1a52   :  { %v2586_v55 = vpop.f32.mrb[53].mxu0  ;;  %4717 = vrcp.f32 %v2817_v9  ;;  %v2837_v54 = vpop.permute.xlu1 %2836 }
0x1a53   :  { %v4359_v32 = vpop.f32.mrb[54].mxu0  ;;  %4719 = vrcp.f32 %v2820_v62 }
0x1a54   :  { %v2602_v3 = vpack.c.bf16 %v4359_v32, %v4358_v48  ;;  %v2589_v7 = vpop.f32.mrb[55].mxu0  ;;  %v2835_v2 = vpop.permute.xlu0 %2834  ;;  %4721 = vrcp.f32 %v2823_v61 }
0x1a55   :  { %v2601_v0 = vpack.c.bf16 %v2589_v7, %v2586_v55 }
0x1a57   :  { %4362 = vmatprep.mubr.msk.bf16.mxu0 %vm651_vm5, %v2601_v0  ;;  %v4400_v29 = vpop.f32.mrb[48].mxu1 }
0x1a58   :  { %4363 = vmatmul.mubr.msk.bf16.vlgmr.msra.gmra.mrb[56].mxu0 %vm651_vm5, %v2602_v3  ;;  %v3013_v21 = vpop.f32.mrb[49].mxu1  ;;  %v3022_v33 = vadd.f32 %v5476_v47, %v4400_v29 }
0x1a59   :  { %4367 = vmatpush3.bf16.msra.mxu0 %v2668_v10  ;;  %v3014_v31 = vadd.f32 %v5457_v50, %v3013_v21  ;;  %4368 = vmatprep.mubr.msk.bf16.mxu0 %vm651_vm5, %v2421_v38  ;;  %v4401_v13 = vpop.f32.mrb[50].mxu1 }
0x1a5a   :  { %4380 = vmatprep.subr.bf16.mxu0 %v2835_v2  ;;  %v3016_v51 = vpop.f32.mrb[51].mxu1  ;;  %v3025_v5 = vadd.f32 %v5463_v45, %v4401_v13  ;;  %v3034_v38 = vsel %vm427_vm3, %v3022_v33, -inf }
0x1a5b   :  { %v3017_v15 = vadd.f32 %v5469_v11, %v3016_v51  ;;  %v3028_v19 = vsel %vm427_vm3, %v3014_v31, -inf  ;;  %v4716_v39 = vpop.eup %4715 }
0x1a5c   :  { %3029 = vmax.xlane.f32.xlu1 %v3028_v19  ;;  %v4718_v52 = vpop.eup %4717  ;;  %v3037_v22 = vsel %vm427_vm3, %v3025_v5, -inf  ;;  %v2828_v20 = vmul.f32 %v4716_v39, %v4714_v28 }
0x1a5d   :  { %v3031_v50 = vsel %vm427_vm3, %v3017_v15, -inf  ;;  %v2829_v1 = vmul.f32 %v4718_v52, %v4710_v16  ;;  %v4720_v45 = vpop.eup %4719 }
0x1a5e   :  { %3032 = vmax.xlane.f32.xlu0 %v3031_v50  ;;  %v4722_v47 = vpop.eup %4721  ;;  %v2830_v37 = vmul.f32 %v4720_v45, %v5576_v26 }
0x1a5f   :  { %v2832_v11 = vpack.c.bf16 %v2829_v1, %v2828_v20  ;;  %v2831_v18 = vmul.f32 %v4722_v47, %v5572_v34 }
0x1a60   :  { %3038 = vmax.xlane.f32.xlu1 %v3037_v22 }
0x1a61   :  { %v2833_v16 = vpack.c.bf16 %v2831_v18, %v2830_v37 }
0x1a62   :  { %3035 = vmax.xlane.f32.xlu0 %v3034_v38 }
0x1a64   :  { %4369 = vmatmul.mubr.msk.bf16.vlgmr.msra.gmra.mrb[56].mxu0 %vm651_vm5, %v2422_v23 }
0x1a65   :  { %4381 = vmatpush3.bf16.msra.mxu0 %v2835_v2  ;;  %4384 = vmatprep.mubr.msk.bf16.mxu0 %vm427_vm3, %v2832_v11  ;;  %v3937_v11 = vld [vmem:[%s5836_s4 + $0x158] sm:$0xf] }
0x1a66   :  { %4382 = vmatprep.subr.bf16.mxu0 %v2837_v54  ;;  %v3144_v47 = vsel %vm1008_vm6, %v3937_v11, 0 }
0x1a69   :  { %4383 = vmatpush3.bf16.msra.mxu0 %v2837_v54  ;;  %v4558_v54 = vld [vmem:[%s5832_s2 + $0x18] sm:$0xff]  }
0x1a6a   :  { %4510 = vmatprep.subr.msk.bf16.mxu0 %vm1008_vm6, %v3936_v44 }
0x1a6c   :  { %4385 = vmatmul.mubr.msk.bf16.vlgmr.msra.gmra.mrb[60].mxu0 %vm427_vm3, %v2833_v16 }
0x1a6d   :  { %4389 = vmatpush3.bf16.msra.mxu0 %v2904_v36 }
0x1ae9   :  { %v3030_v23 = vpop.xlane.xlu1 %3029 }
0x1aea   :  { %v3040_v28 = vsub.f32 %v3014_v31, %v3030_v23 }
0x1aeb   :  { %v3033_v30 = vpop.xlane.xlu0 %3032 }
0x1aec   :  { %v3041_v42 = vsub.f32 %v3017_v15, %v3033_v30  ;;  %v3044_v56 = vmul.f32 1.442695, %v3040_v28  ;;  %v4559_v30 = vld [vmem:[%s5832_s2 + $0x20] sm:$0xff]  }
0x1aed   :  { %v3039_v26 = vpop.xlane.xlu1 %3038 }
0x1aee   :  { %v3043_v59 = vsub.f32 %v3025_v5, %v3039_v26  ;;  %v3046_v34 = vmul.f32 1.442695, %v3041_v42  ;;  %v3960_v42 = vld [vmem:[%s5837_s5 + $0x12] ss:$0 sm:$0xff] }
0x1aef   :  { %v3036_v40 = vpop.xlane.xlu0 %3035 }
0x1af0   :  { %v3050_v8 = vmul.f32 1.442695, %v3043_v59  ;;  %v3042_v53 = vsub.f32 %v3022_v33, %v3036_v40 }
0x1af2   :  { %4723 = vpow2.f32 %v3050_v8  ;;  %v3048_v61 = vmul.f32 1.442695, %v3042_v53 }
0x1af3   :  { %4725 = vpow2.f32 %v3046_v34 }
0x1af4   :  { %4727 = vpow2.f32 %v3048_v61 }
0x1af5   :  { %4729 = vpow2.f32 %v3044_v56 }
0x1afc   :  { %v4724_v62 = vpop.eup %4723 }
0x1afd   :  { %v4726_v4 = vpop.eup %4725  ;;  %v3061_v9 = vsel %vm427_vm3, %v4724_v62, 0.0 }
0x1afe   :  { %v4728_v48 = vpop.eup %4727  ;;  %3062 = vadd.xlane.f32.xlu1 %v3061_v9  ;;  %v3055_v3 = vsel %vm427_vm3, %v4726_v4, 0.0 }
0x1aff   :  { %v3058_v55 = vsel %vm427_vm3, %v4728_v48, 0.0  ;;  %v4730_v32 = vpop.eup %4729 }
0x1b00   :  { %3059 = vadd.xlane.f32.xlu0 %v3058_v55  ;;  %v3052_v7 = vsel %vm427_vm3, %v4730_v32, 0.0 }
0x1b02   :  { %3056 = vadd.xlane.f32.xlu1 %v3055_v3 }
0x1b04   :  { %3053 = vadd.xlane.f32.xlu0 %v3052_v7 }
0x1b13   :  { %3076 = vrot.lane.b32.xlu1 %v5434_v46, %s4789_s22 }
0x1b1a   :  { %3074 = vrot.lane.b32.xlu0 %v5436_v35, %s4789_s22 }
0x1b3f   :  { %v4386_v0 = vpop.f32.mrb[60].mxu0 }
0x1b40   :  { %v2880_v10 = vpop.f32.mrb[61].mxu0 }
0x1b41   :  { %v4387_v29 = vpop.f32.mrb[62].mxu0 }
0x1b42   :  { %v2896_v21 = vpack.c.bf16 %v4387_v29, %v4386_v0  ;;  %v2883_v2 = vpop.f32.mrb[63].mxu0 }
0x1b43   :  { %v2895_v31 = vpack.c.bf16 %v2883_v2, %v2880_v10 }
0x1b45   :  { %4390 = vmatprep.mubr.msk.bf16.mxu0 %vm651_vm5, %v2895_v31 }
0x1b46   :  { %4391 = vmatmul.mubr.msk.bf16.vlgmr.msra.gmra.mrb[56].mxu0 %vm651_vm5, %v2896_v21 }
0x1b8b   :  { %v3063_v13 = vpop.xlane.xlu1 %3062 }
0x1b8d   :  { %v3060_v51 = vpop.xlane.xlu0 %3059 }
0x1b8e   :  { %4731 = vrcp.f32 %v3060_v51 }
0x1b8f   :  { %v3057_v5 = vpop.xlane.xlu1 %3056 }
0x1b90   :  { %4733 = vrcp.f32 %v3057_v5 }
0x1b91   :  { %4735 = vrcp.f32 %v3063_v13  ;;  %v3054_v46 = vpop.xlane.xlu0 %3053 }
0x1b92   :  { %4737 = vrcp.f32 %v3054_v46 }
0x1b93   :  { %v3077_v35 = vpop.permute.xlu1 %3076 }
0x1b95   :  { %v3075_v15 = vpop.permute.xlu0 %3074 }
0x1b96   :  { %4402 = vmatprep.subr.bf16.mxu0 %v3075_v15 }
0x1b97   :  { %4403 = vmatpush3.bf16.msra.mxu0 %v3075_v15 }
0x1b98   :  { %4404 = vmatprep.subr.bf16.mxu0 %v3077_v35  ;;  %v4732_v19 = vpop.eup %4731 }
0x1b99   :  { %v3070_v52 = vmul.f32 %v4732_v19, %v4728_v48 }
0x1b9a   :  { %v4734_v39 = vpop.eup %4733 }
0x1b9b   :  { %v4736_v33 = vpop.eup %4735  ;;  %4405 = vmatpush3.bf16.msra.mxu0 %v3077_v35  ;;  %v3069_v20 = vmul.f32 %v4734_v39, %v4726_v4 }
0x1b9c   :  { %v4738_v50 = vpop.eup %4737  ;;  %v3071_v38 = vmul.f32 %v4736_v33, %v4724_v62  ;;  %4513 = vmatprep.subr.msk.bf16.mxu0 %vm1008_vm6, %v3937_v11 }
0x1b9d   :  { %v3068_v22 = vmul.f32 %v4738_v50, %v4730_v32 }
0x1b9e   :  { %v3073_v45 = vpack.c.bf16 %v3071_v38, %v3070_v52 }
0x1b9f   :  { %v3072_v1 = vpack.c.bf16 %v3069_v20, %v3068_v22 }
0x1ba1   :  { %4406 = vmatprep.mubr.msk.bf16.mxu0 %vm427_vm3, %v3072_v1 }
0x1ba2   :  { %4407 = vmatmul.mubr.msk.bf16.vlgmr.msra.gmra.mrb[64].mxu0 %vm427_vm3, %v3073_v45 }
0x1ba3   :  { %4411 = vmatpush3.bf16.msra.mxu0 %v3144_v47 }
0x1ba4   :  { %4444 = vmatprep.subr.bf16.mxu0 %v4558_v54 }
0x1c75   :  { %v4408_v37 = vpop.f32.mrb[64].mxu0 }
0x1c76   :  { %v3120_v18 = vpop.f32.mrb[65].mxu0 }
0x1c77   :  { %v4409_v16 = vpop.f32.mrb[66].mxu0 }
0x1c78   :  { %v3136_v44 = vpack.c.bf16 %v4409_v16, %v4408_v37  ;;  %v3123_v36 = vpop.f32.mrb[67].mxu0 }
0x1c79   :  { %v3135_v23 = vpack.c.bf16 %v3123_v36, %v3120_v18 }
0x1c7b   :  { %4412 = vmatprep.mubr.msk.bf16.mxu0 %vm651_vm5, %v3135_v23 }
0x1c7c   :  { %4413 = vmatmul.mubr.msk.bf16.vlgmr.msra.gmra.mrb[56].mxu0 %vm651_vm5, %v3136_v44 }
0x1c7d   :  { %4445 = vmatpush3.bf16.msra.mxu0 %v4558_v54  ;;  %4448 = vmatprep.mubr.msk.bf16.mxu0 %vm427_vm3, %v4942_v24  ;;  %v5660_v24 = vld [vmem:[%s5834_s3 + $0x2] ss:$0 sm:$0xff] }
0x1c7e   :  { %4446 = vmatprep.subr.bf16.mxu0 %v4559_v30 }
0x1c81   :  { %4447 = vmatpush3.bf16.msra.mxu0 %v4559_v30 }
0x1c84   :  { %4449 = vmatmul.mubr.msk.bf16.vlgmr.msra.gmra.mrb[68].mxu0 %vm427_vm3, %v4947_v27 }
0x1d4f   :  { %v4414_v26 = vpop.f32.mrb[56].mxu0 }
0x1d50   :  { %v3180_v28 = vpop.f32.mrb[57].mxu0  ;;  %v3201_v53 = vadd.f32 %v4414_v26, %v3960_v42  ;;  %v4561_v26 = vld [vmem:[%s5836_s4 + $0x170] ss:$8 sps:$4 sm:$0xff]  }
0x1d51   :  { %v3199_v59 = vadd.f32 %v3960_v42, %v3180_v28  ;;  %v4415_v34 = vpop.f32.mrb[58].mxu0 }
0x1d52   :  { %v3183_v40 = vpop.f32.mrb[59].mxu0  ;;  %v3202_v27 = vadd.f32 %v4415_v34, %v3960_v42 }
0x1d53   :  { %v3200_v8 = vadd.f32 %v3960_v42, %v3183_v40  ;;  %3207 = vrot.lane.b32.xlu1 %v3199_v59, %s4781_s8  ;;  %v4560_v42 = vld [vmem:[%s5836_s4 + $0x160] ss:$8 sps:$4 sm:$0xff]  }
0x1d54   :  { %4416 = vmatprep.subr.bf16.mxu1 %v4560_v42 }
0x1d55   :  { %3209 = vrot.lane.b32.xlu0 %v3200_v8, %s4781_s8  ;;  %4417 = vmatpush3.bf16.msra.mxu1 %v4560_v42 }
0x1d56   :  { %4418 = vmatprep.subr.bf16.mxu1 %v4561_v26 }
0x1d57   :  { %3211 = vrot.lane.b32.xlu1 %v3201_v53, %s4781_s8  ;;  %v4450_v56 = vpop.f32.mrb[68].mxu0 }
0x1d58   :  { %v5664_v61 = vadd.f32 %v4450_v56, %v5660_v24  ;;  %v3617_v62 = vpop.f32.mrb[69].mxu0 }
0x1d59   :  { %v5667_v4 = vadd.f32 %v5660_v24, %v3617_v62  ;;  %v4451_v9 = vpop.f32.mrb[70].mxu0  ;;  %3213 = vrot.lane.b32.xlu0 %v3202_v27, %s4781_s8  ;;  %4419 = vmatpush3.bf16.msra.mxu1 %v4561_v26 }
0x1d5a   :  { %v5671_v48 = vadd.f32 %v4451_v9, %v5660_v24  ;;  %v5673_v55 = vpop.f32.mrb[71].mxu0 }
0x1dc5   :  { %v3208_v32 = vpop.permute.xlu1 %3207 }
0x1dc6   :  { %v3219_v3 = vmul.f32 %v3208_v32, %v5245_v17 }
0x1dc7   :  { %v3210_v7 = vpop.permute.xlu0 %3209 }
0x1dc8   :  { %v3220_v0 = vmul.f32 %v3210_v7, %v5401_v6  ;;  %3227 = vrot.lane.b32.xlu1 %v3219_v3, %s4781_s8 }
0x1dc9   :  { %v3212_v10 = vpop.permute.xlu1 %3211 }
0x1dca   :  { %v3221_v29 = vmul.f32 %v3212_v10, %v5255_v25  ;;  %3229 = vrot.lane.b32.xlu0 %v3220_v0, %s4781_s8 }
0x1dcb   :  { %v3214_v21 = vpop.permute.xlu0 %3213 }
0x1dcc   :  { %v3222_v2 = vmul.f32 %v3214_v21, %v5260_v57  ;;  %3231 = vrot.lane.b32.xlu1 %v3221_v29, %s4781_s8  ;;  %v3297_v29 = vadd.f32 1.0, %v5257_v60  ;;  %v3298_v21 = vadd.f32 1.0, %v5262_v63 }
0x1dce   :  { %3233 = vrot.lane.b32.xlu0 %v3222_v2, %s4781_s8 }
0x1e3a   :  { %v3228_v31 = vpop.permute.xlu1 %3227 }
0x1e3b   :  { %v5684_v13 = vadd.f32 %v3228_v31, %v5380_v41 }
0x1e3c   :  { %v3230_v51 = vpop.permute.xlu0 %3229 }
0x1e3d   :  { %v5687_v5 = vadd.f32 %v3230_v51, %v5383_v49  ;;  %v3243_v46 = vsel %vm427_vm3, %v5684_v13, 0.0  ;;  %v3296_v51 = vadd.f32 1.0, %v5252_v58 }
0x1e3e   :  { %3244 = vadd.xlane.f32.xlu1 %v3243_v46  ;;  %v3232_v15 = vpop.permute.xlu1 %3231 }
0x1e3f   :  { %v5692_v35 = vadd.f32 %v3232_v15, %v5388_v12  ;;  %v3246_v19 = vsel %vm427_vm3, %v5687_v5, 0.0 }
0x1e40   :  { %3247 = vadd.xlane.f32.xlu0 %v3246_v19  ;;  %v3234_v39 = vpop.permute.xlu0 %3233 }
0x1e41   :  { %v5697_v41 = vadd.f32 %v3234_v39, %v5393_v43  ;;  %v3249_v49 = vsel %vm427_vm3, %v5692_v35, 0.0  ;;  %v3295_v39 = vadd.f32 1.0, %v5247_v14 }
0x1e43   :  { %v3252_v33 = vsel %vm427_vm3, %v5697_v41, 0.0 }
0x1e44   :  { %3250 = vadd.xlane.f32.xlu0 %v3249_v49  ;;  %3253 = vadd.xlane.f32.xlu1 %v3252_v33 }
0x1e55   :  { %3309 = vrot.lane.b32.xlu1 %v5401_v6, %s4790_s20 }
0x1ecb   :  { %v3245_v12 = vpop.xlane.xlu1 %3244 }
0x1ecc   :  { %v3255_v52 = vmul.f32 0.03125, %v3245_v12 }
0x1ecd   :  { %v3248_v50 = vpop.xlane.xlu0 %3247 }
0x1ece   :  { %v3256_v22 = vmul.f32 0.03125, %v3248_v50  ;;  %v3259_v45 = vsub.f32 %v5684_v13, %v3255_v52 }
0x1ed0   :  { %v3260_v11 = vsub.f32 %v5687_v5, %v3256_v22  ;;  %v3263_v36 = vmul.f32 %v3259_v45, %v3259_v45 }
0x1ed1   :  { %v3254_v20 = vpop.xlane.xlu1 %3253  ;;  %v3251_v38 = vpop.xlane.xlu0 %3250 }
0x1ed2   :  { %v3258_v1 = vmul.f32 0.03125, %v3254_v20  ;;  %v3257_v43 = vmul.f32 0.03125, %v3251_v38  ;;  %v3264_v44 = vmul.f32 %v3260_v11, %v3260_v11  ;;  %v3267_v30 = vsel %vm427_vm3, %v3263_v36, 0.0  ;;  %v3961_v36 = vld [vmem:[%s5837_s5 + $0x13] ss:$0 sm:$0xff] }
0x1ed4   :  { %v3262_v47 = vsub.f32 %v5697_v41, %v3258_v1  ;;  %v3261_v54 = vsub.f32 %v5692_v35, %v3257_v43  ;;  %v3270_v23 = vsel %vm427_vm3, %v3264_v44, 0.0  ;;  %v4569_v44 = vld [vmem:[%s5836_s4 + $0x1f0] ss:$8 sps:$4 sm:$0xff]  }
0x1ed5   :  { %v3310_v28 = vpop.permute.xlu1 %3309 }
0x1ed6   :  { %v3266_v37 = vmul.f32 %v3262_v47, %v3262_v47  ;;  %v3265_v18 = vmul.f32 %v3261_v54, %v3261_v54 }
0x1ed8   :  { %v3276_v6 = vsel %vm427_vm3, %v3266_v37, 0.0  ;;  %v3273_v16 = vsel %vm427_vm3, %v3265_v18, 0.0  ;;  %v4565_v37 = vld [vmem:[%s5836_s4 + $0x1b0] ss:$8 sps:$4 sm:$0xff]   ;;  %v4566_v18 = vld [vmem:[%s5836_s4 + $0x1c0] ss:$8 sps:$4 sm:$0xff]  }
0x1ed9   :  { %3277 = vadd.xlane.f32.xlu1 %v3276_v6  ;;  %3274 = vadd.xlane.f32.xlu0 %v3273_v16  ;;  %v4567_v6 = vld [vmem:[%s5836_s4 + $0x1d0] ss:$8 sps:$4 sm:$0xff]   ;;  %v4568_v16 = vld [vmem:[%s5836_s4 + $0x1e0] ss:$8 sps:$4 sm:$0xff]  }
0x1edd   :  { %3271 = vadd.xlane.f32.xlu1 %v3270_v23  ;;  %3268 = vadd.xlane.f32.xlu0 %v3267_v30 }
0x1eee   :  { %3311 = vrot.lane.b32.xlu1 %v5255_v25, %s4790_s20 }
0x1ef3   :  { %3307 = vrot.lane.b32.xlu0 %v5245_v17, %s4790_s20 }
0x1ef7   :  { %3313 = vrot.lane.b32.xlu0 %v5260_v57, %s4790_s20 }
0x1f66   :  { %v3278_v25 = vpop.xlane.xlu1 %3277  ;;  %v3275_v59 = vpop.xlane.xlu0 %3274 }
0x1f67   :  { %v3282_v34 = vmul.f32 0.03125, %v3278_v25  ;;  %v3281_v17 = vmul.f32 0.03125, %v3275_v59 }
0x1f69   :  { %v3286_v40 = vadd.f32 1e-06, %v3282_v34  ;;  %v3285_v8 = vadd.f32 1e-06, %v3281_v17 }
0x1f6a   :  { %v3272_v57 = vpop.xlane.xlu1 %3271  ;;  %v3269_v53 = vpop.xlane.xlu0 %3268 }
0x1f6b   :  { %4739 = vrsqrt.f32 %v3286_v40  ;;  %v3280_v27 = vmul.f32 0.03125, %v3272_v57  ;;  %v3279_v56 = vmul.f32 0.03125, %v3269_v53 }
0x1f6c   :  { %4741 = vrsqrt.f32 %v3285_v8 }
0x1f6d   :  { %v3284_v62 = vadd.f32 1e-06, %v3280_v27  ;;  %v3283_v9 = vadd.f32 1e-06, %v3279_v56 }
0x1f6e   :  { %v3308_v10 = vpop.permute.xlu0 %3307  ;;  %v3312_v12 = vpop.permute.xlu1 %3311 }
0x1f6f   :  { %4743 = vrsqrt.f32 %v3284_v62 }
0x1f70   :  { %4745 = vrsqrt.f32 %v3283_v9 }
0x1f72   :  { %v3314_v52 = vpop.permute.xlu0 %3313 }
0x1f75   :  { %v4740_v32 = vpop.eup %4739 }
0x1f76   :  { %v4742_v3 = vpop.eup %4741  ;;  %v3294_v7 = vmul.f32 %v4740_v32, %v3262_v47 }
0x1f77   :  { %v3293_v0 = vmul.f32 %v4742_v3, %v3261_v54  ;;  %v4564_v54 = vld [vmem:[%s5836_s4 + $0x1a0] ss:$8 sps:$4 sm:$0xff]  }
0x1f78   :  { %v3302_v19 = vmul.f32 %v3298_v21, %v3294_v7 }
0x1f79   :  { %v4744_v2 = vpop.eup %4743  ;;  %v3301_v46 = vmul.f32 %v3297_v29, %v3293_v0 }
0x1f7a   :  { %v4746_v31 = vpop.eup %4745  ;;  %v3292_v15 = vmul.f32 %v4744_v2, %v3260_v11  ;;  %v3322_v38 = vadd.f32 %v3314_v52, %v3302_v19  ;;  %v4562_v11 = vld [vmem:[%s5836_s4 + $0x180] ss:$8 sps:$4 sm:$0xff]  }
0x1f7b   :  { %v3291_v49 = vmul.f32 %v4746_v31, %v3259_v45  ;;  %v3321_v22 = vadd.f32 %v3312_v12, %v3301_v46  ;;  %4424 = vmatprep.subr.bf16.mxu1 %v4562_v11  ;;  %v4563_v45 = vld [vmem:[%s5836_s4 + $0x190] ss:$8 sps:$4 sm:$0xff]  }
0x1f7c   :  { %v3300_v33 = vmul.f32 %v3296_v51, %v3292_v15 }
0x1f7d   :  { %v3299_v50 = vmul.f32 %v3295_v39, %v3291_v49  ;;  %v3324_v47 = vpack.c.bf16 %v3322_v38, %v3321_v22 }
0x1f7e   :  { %v3320_v20 = vadd.f32 %v3310_v28, %v3300_v33 }
0x1f7f   :  { %v3319_v1 = vadd.f32 %v3308_v10, %v3299_v50 }
0x1f81   :  { %v3323_v43 = vpack.c.bf16 %v3320_v20, %v3319_v1 }
0x1f83   :  { %4420 = vmatprep.mubr.msk.bf16.mxu1 %vm427_vm3, %v3323_v43 }
0x1f84   :  { %4421 = vmatmul.mubr.msk.bf16.vlgmr.msra.gmra.mrb[52].mxu1 %vm427_vm3, %v3324_v47 }
0x1f85   :  { %4425 = vmatpush3.bf16.msra.mxu1 %v4562_v11 }
0x1f86   :  { %4426 = vmatprep.subr.bf16.mxu1 %v4563_v45 }
0x1f89   :  { %4427 = vmatpush3.bf16.msra.mxu1 %v4563_v45 }
0x1f8a   :  { %4428 = vmatprep.subr.bf16.mxu1 %v4564_v54 }
0x1f8d   :  { %4429 = vmatpush3.bf16.msra.mxu1 %v4564_v54 }
0x1f8e   :  { %4430 = vmatprep.subr.bf16.mxu1 %v4565_v37 }
0x1f91   :  { %4431 = vmatpush3.bf16.msra.mxu1 %v4565_v37 }
0x1f92   :  { %4432 = vmatprep.subr.bf16.mxu1 %v4566_v18 }
0x1f95   :  { %4433 = vmatpush3.bf16.msra.mxu1 %v4566_v18  ;;  %v3962_v18 = vld [vmem:[%s5837_s5 + $0x14] ss:$0 sm:$0xff] }
0x1f96   :  { %4434 = vmatprep.subr.bf16.mxu1 %v4567_v6 }
0x1f99   :  { %4435 = vmatpush3.bf16.msra.mxu1 %v4567_v6 }
0x1f9a   :  { %4436 = vmatprep.subr.bf16.mxu1 %v4568_v16 }
0x1f9d   :  { %4437 = vmatpush3.bf16.msra.mxu1 %v4568_v16 }
0x1f9e   :  { %4438 = vmatprep.subr.bf16.mxu1 %v4569_v44 }
0x1fa1   :  { %4439 = vmatpush3.bf16.msra.mxu1 %v4569_v44 }
0x2057   :  { %v4422_v23 = vpop.f32.mrb[52].mxu1 }
0x2058   :  { %v3386_v30 = vadd.f32 %v4422_v23, %v3961_v36  ;;  %v3377_v42 = vpop.f32.mrb[53].mxu1 }
0x2059   :  { %v3378_v26 = vadd.f32 %v3961_v36, %v3377_v42  ;;  %v4423_v28 = vpop.f32.mrb[54].mxu1 }
0x205a   :  { %v3394_v25 = vmul.f32 %v3386_v30, %v3386_v30  ;;  %v3389_v59 = vadd.f32 %v4423_v28, %v3961_v36  ;;  %v3380_v34 = vpop.f32.mrb[55].mxu1 }
0x205b   :  { %v3392_v17 = vmul.f32 %v3378_v26, %v3378_v26  ;;  %v3381_v40 = vadd.f32 %v3961_v36, %v3380_v34 }
0x205c   :  { %v3398_v8 = vmul.f32 %v3394_v25, %v3386_v30  ;;  %v3395_v57 = vmul.f32 %v3389_v59, %v3389_v59 }
0x205d   :  { %v3396_v53 = vmul.f32 %v3392_v17, %v3378_v26  ;;  %v3393_v27 = vmul.f32 %v3381_v40, %v3381_v40 }
0x205e   :  { %v3402_v56 = vmul.f32 0.044715, %v3398_v8  ;;  %v3399_v62 = vmul.f32 %v3395_v57, %v3389_v59 }
0x205f   :  { %v3400_v9 = vmul.f32 0.044715, %v3396_v53  ;;  %v3397_v32 = vmul.f32 %v3393_v27, %v3381_v40 }
0x2060   :  { %v3406_v3 = vadd.f32 %v3402_v56, %v3386_v30  ;;  %v3403_v7 = vmul.f32 0.044715, %v3399_v62 }
0x2061   :  { %v3404_v0 = vadd.f32 %v3400_v9, %v3378_v26  ;;  %v3401_v10 = vmul.f32 0.044715, %v3397_v32 }
0x2062   :  { %v3410_v29 = vmul.f32 0.7978846, %v3406_v3  ;;  %v3407_v21 = vadd.f32 %v3403_v7, %v3389_v59 }
0x2063   :  { %v3408_v2 = vmul.f32 0.7978846, %v3404_v0  ;;  %v3405_v31 = vadd.f32 %v3401_v10, %v3381_v40 }
0x2064   :  { %4747 = vtanh.f32 %v3410_v29  ;;  %v3411_v51 = vmul.f32 0.7978846, %v3407_v21 }
0x2065   :  { %4749 = vtanh.f32 %v3408_v2  ;;  %v3409_v46 = vmul.f32 0.7978846, %v3405_v31 }
0x2066   :  { %4751 = vtanh.f32 %v3411_v51 }
0x2067   :  { %4753 = vtanh.f32 %v3409_v46 }
0x206e   :  { %v4748_v15 = vpop.eup %4747 }
0x206f   :  { %v4750_v19 = vpop.eup %4749  ;;  %v3418_v39 = vadd.f32 1.0, %v4748_v15 }
0x2070   :  { %v4752_v49 = vpop.eup %4751  ;;  %v3416_v33 = vadd.f32 1.0, %v4750_v19 }
0x2071   :  { %v4754_v12 = vpop.eup %4753  ;;  %v3422_v50 = vmul.f32 0.5, %v3418_v39  ;;  %v3419_v52 = vadd.f32 1.0, %v4752_v49 }
0x2072   :  { %v3417_v22 = vadd.f32 1.0, %v4754_v12  ;;  %v3420_v20 = vmul.f32 0.5, %v3416_v33 }
0x2073   :  { %v3423_v38 = vmul.f32 0.5, %v3419_v52  ;;  %v3426_v43 = vmul.f32 %v3422_v50, %v3386_v30 }
0x2074   :  { %v3421_v1 = vmul.f32 0.5, %v3417_v22  ;;  %v3424_v11 = vmul.f32 %v3420_v20, %v3378_v26  ;;  %v3686_v22 = vadd.f32 1.0, %v5664_v61  ;;  %v3684_v20 = vadd.f32 1.0, %v5667_v4 }
0x2075   :  { %v3427_v47 = vmul.f32 %v3423_v38, %v3389_v59  ;;  %v3687_v38 = vadd.f32 1.0, %v5671_v48 }
0x2076   :  { %v3425_v45 = vmul.f32 %v3421_v1, %v3381_v40  ;;  %v4570_v1 = vld [vmem:[%s5832_s2 + $0x28] sm:$0xff]  }
0x2077   :  { %v3429_v54 = vpack.c.bf16 %v3427_v47, %v3426_v43  ;;  %4452 = vmatprep.subr.bf16.mxu0 %v4570_v1  ;;  %v4571_v43 = vld [vmem:[%s5832_s2 + $0x30] sm:$0xff]  }
0x2078   :  { %v3428_v37 = vpack.c.bf16 %v3425_v45, %v3424_v11  ;;  %4453 = vmatpush3.bf16.msra.mxu0 %v4570_v1 }
0x2079   :  { %4454 = vmatprep.subr.bf16.mxu0 %v4571_v43 }
0x207a   :  { %4440 = vmatprep.mubr.bf16.mxu1 %v3428_v37 }
0x207b   :  { %4441 = vmatmul.mubr.bf16.vlgmr.msra.gmra.mrb[56].mxu1 %v3429_v54 }
0x207c   :  { %4455 = vmatpush3.bf16.msra.mxu0 %v4571_v43 }
0x214e   :  { %v4442_v6 = vpop.f32.mrb[56].mxu1 }
0x214f   :  { %v3512_v16 = vpop.f32.mrb[57].mxu1  ;;  %v3521_v30 = vadd.f32 %v4442_v6, %v3962_v18 }
0x2150   :  { %v3513_v44 = vadd.f32 %v3962_v18, %v3512_v16  ;;  %v4443_v36 = vpop.f32.mrb[58].mxu1 }
0x2151   :  { %v3515_v23 = vpop.f32.mrb[59].mxu1  ;;  %v3524_v26 = vadd.f32 %v4443_v36, %v3962_v18 }
0x2152   :  { %v3516_v42 = vadd.f32 %v3962_v18, %v3515_v23  ;;  %3531 = vrot.lane.b32.xlu1 %v3513_v44, %s4790_s20 }
0x2154   :  { %3533 = vrot.lane.b32.xlu0 %v3516_v42, %s4790_s20 }
0x2156   :  { %3535 = vrot.lane.b32.xlu1 %v3521_v30, %s4790_s20 }
0x2158   :  { %3537 = vrot.lane.b32.xlu0 %v3524_v26, %s4790_s20 }
0x21c4   :  { %v3532_v28 = vpop.permute.xlu1 %3531 }
0x21c5   :  { %v3543_v25 = vmul.f32 %v3532_v28, %v5247_v14 }
0x21c6   :  { %v3534_v59 = vpop.permute.xlu0 %3533 }
0x21c7   :  { %v3544_v34 = vmul.f32 %v3534_v59, %v5252_v58  ;;  %3551 = vrot.lane.b32.xlu1 %v3543_v25, %s4780_s21 }
0x21c8   :  { %v3536_v17 = vpop.permute.xlu1 %3535 }
0x21c9   :  { %v3545_v40 = vmul.f32 %v3536_v17, %v5257_v60  ;;  %3553 = vrot.lane.b32.xlu0 %v3544_v34, %s4780_s21 }
0x21ca   :  { %v3538_v8 = vpop.permute.xlu0 %3537 }
0x21cb   :  { %v3546_v57 = vmul.f32 %v3538_v8, %v5262_v63  ;;  %3555 = vrot.lane.b32.xlu1 %v3545_v40, %s4780_s21 }
0x21cd   :  { %3557 = vrot.lane.b32.xlu0 %v3546_v57, %s4780_s21 }
0x2239   :  { %v3552_v53 = vpop.permute.xlu1 %3551 }
0x223a   :  { %v3563_v14 = vadd.f32 %v3552_v53, %v5684_v13  ;;  %v5783_v13 = vadd.f32 %v5660_v24, %v5673_v55 }
0x223b   :  { %v3554_v27 = vpop.permute.xlu0 %3553 }
0x223c   :  { %v3564_v58 = vadd.f32 %v3554_v27, %v5687_v5  ;;  %v3632_v56 = vsel %vm427_vm3, %v3563_v14, 0.0  ;;  %v3685_v5 = vadd.f32 1.0, %v5783_v13 }
0x223d   :  { %3633 = vadd.xlane.f32.xlu1 %v3632_v56  ;;  %v3556_v62 = vpop.permute.xlu1 %3555 }
0x223e   :  { %v3565_v60 = vadd.f32 %v3556_v62, %v5692_v35  ;;  %v3635_v9 = vsel %vm427_vm3, %v3564_v58, 0.0 }
0x223f   :  { %3636 = vadd.xlane.f32.xlu0 %v3635_v9  ;;  %v3558_v63 = vpop.permute.xlu0 %3557 }
0x2240   :  { %v3566_v32 = vadd.f32 %v3558_v63, %v5697_v41  ;;  %v3638_v7 = vsel %vm427_vm3, %v3565_v60, 0.0 }
0x2242   :  { %v3641_v3 = vsel %vm427_vm3, %v3566_v32, 0.0 }
0x2243   :  { %3642 = vadd.xlane.f32.xlu1 %v3641_v3  ;;  %3639 = vadd.xlane.f32.xlu0 %v3638_v7 }
0x2254   :  { %3694 = vrot.lane.b32.xlu1 %v3685_v5, %s4780_s21  ;;  %v4572_v5 = vld [vmem:[%s5832_s2 + $0x38] sm:$0xff]  }
0x2255   :  { %4460 = vmatprep.subr.bf16.mxu0 %v4572_v5 }
0x22ca   :  { %v3634_v35 = vpop.xlane.xlu1 %3633 }
0x22cb   :  { %v3644_v10 = vmul.f32 0.03125, %v3634_v35 }
0x22cc   :  { %v3637_v0 = vpop.xlane.xlu0 %3636 }
0x22cd   :  { %v3645_v29 = vmul.f32 0.03125, %v3637_v0  ;;  %v3648_v51 = vsub.f32 %v3563_v14, %v3644_v10 }
0x22cf   :  { %v3649_v46 = vsub.f32 %v3564_v58, %v3645_v29  ;;  %v3652_v33 = vmul.f32 %v3648_v51, %v3648_v51 }
0x22d0   :  { %v3640_v21 = vpop.xlane.xlu0 %3639  ;;  %v3643_v41 = vpop.xlane.xlu1 %3642 }
0x22d1   :  { %v3646_v2 = vmul.f32 0.03125, %v3640_v21  ;;  %v3647_v31 = vmul.f32 0.03125, %v3643_v41  ;;  %v3653_v12 = vmul.f32 %v3649_v46, %v3649_v46  ;;  %v3656_v50 = vsel %vm427_vm3, %v3652_v33, 0.0 }
0x22d3   :  { %v3650_v15 = vsub.f32 %v3565_v60, %v3646_v2  ;;  %v3651_v19 = vsub.f32 %v3566_v32, %v3647_v31  ;;  %v3659_v52 = vsel %vm427_vm3, %v3653_v12, 0.0 }
0x22d4   :  { %v3695_v47 = vpop.permute.xlu1 %3694 }
0x22d5   :  { %v3654_v39 = vmul.f32 %v3650_v15, %v3650_v15  ;;  %v3655_v49 = vmul.f32 %v3651_v19, %v3651_v19 }
0x22d7   :  { %v3662_v24 = vsel %vm427_vm3, %v3654_v39, 0.0  ;;  %v3665_v55 = vsel %vm427_vm3, %v3655_v49, 0.0 }
0x22d8   :  { %3663 = vadd.xlane.f32.xlu0 %v3662_v24  ;;  %3666 = vadd.xlane.f32.xlu1 %v3665_v55 }
0x22dc   :  { %3657 = vadd.xlane.f32.xlu0 %v3656_v50  ;;  %3660 = vadd.xlane.f32.xlu1 %v3659_v52 }
0x22ed   :  { %3696 = vrot.lane.b32.xlu1 %v3686_v22, %s4780_s21 }
0x22f2   :  { %3692 = vrot.lane.b32.xlu0 %v3684_v20, %s4780_s21 }
0x22f6   :  { %3698 = vrot.lane.b32.xlu0 %v3687_v38, %s4780_s21 }
0x2365   :  { %v3664_v11 = vpop.xlane.xlu0 %3663  ;;  %v3667_v45 = vpop.xlane.xlu1 %3666 }
0x2366   :  { %v3670_v54 = vmul.f32 0.03125, %v3664_v11  ;;  %v3671_v37 = vmul.f32 0.03125, %v3667_v45 }
0x2368   :  { %v3674_v18 = vadd.f32 1e-06, %v3670_v54  ;;  %v3675_v6 = vadd.f32 1e-06, %v3671_v37 }
0x2369   :  { %v3658_v16 = vpop.xlane.xlu0 %3657  ;;  %v3661_v44 = vpop.xlane.xlu1 %3660 }
0x236a   :  { %4755 = vrsqrt.f32 %v3674_v18  ;;  %v3668_v36 = vmul.f32 0.03125, %v3658_v16  ;;  %v3669_v23 = vmul.f32 0.03125, %v3661_v44 }
0x236b   :  { %4757 = vrsqrt.f32 %v3675_v6 }
0x236c   :  { %v3672_v42 = vadd.f32 1e-06, %v3668_v36  ;;  %v3673_v30 = vadd.f32 1e-06, %v3669_v23 }
0x236d   :  { %v3693_v26 = vpop.permute.xlu0 %3692  ;;  %v3697_v40 = vpop.permute.xlu1 %3696 }
0x236e   :  { %4759 = vrsqrt.f32 %v3672_v42 }
0x236f   :  { %4761 = vrsqrt.f32 %v3673_v30 }
0x2371   :  { %v3699_v8 = vpop.permute.xlu0 %3698 }
0x2374   :  { %v4756_v28 = vpop.eup %4755 }
0x2375   :  { %v4758_v25 = vpop.eup %4757  ;;  %v3682_v59 = vmul.f32 %v4756_v28, %v3650_v15 }
0x2376   :  { %v3683_v34 = vmul.f32 %v4758_v25, %v3651_v19  ;;  %v4019_v19 = vld [vmem:[%s5834_s3 + $0x4] ss:$0 sm:$0xff] }
0x2377   :  { %v3706_v14 = vmul.f32 %v3697_v40, %v3682_v59 }
0x2378   :  { %v4760_v17 = vpop.eup %4759  ;;  %v3707_v27 = vmul.f32 %v3699_v8, %v3683_v34 }
0x2379   :  { %v4762_v57 = vpop.eup %4761  ;;  %v3680_v53 = vmul.f32 %v4760_v17, %v3648_v51  ;;  %v3710_v9 = vadd.f32 %v3706_v14, %v5664_v61  ;;  %v4014_v61 = vld [vmem:[%s5834_s3 + $0x3] ss:$0 sm:$0xff] }
0x237a   :  { %v3681_v58 = vmul.f32 %v4762_v57, %v3649_v46  ;;  %v3711_v63 = vadd.f32 %v3707_v27, %v5671_v48 }
0x237b   :  { %v3704_v56 = vmul.f32 %v3693_v26, %v3680_v53 }
0x237c   :  { %v3705_v62 = vmul.f32 %v3695_v47, %v3681_v58  ;;  %v3713_v7 = vpack.c.bf16 %v3711_v63, %v3710_v9 }
0x237d   :  { %v3708_v60 = vadd.f32 %v3704_v56, %v5667_v4 }
0x237e   :  { %v3709_v32 = vadd.f32 %v3705_v62, %v5783_v13 }
0x2380   :  { %v3712_v3 = vpack.c.bf16 %v3709_v32, %v3708_v60 }
0x2382   :  { %4456 = vmatprep.mubr.msk.bf16.mxu0 %vm427_vm3, %v3712_v3 }
0x2383   :  { %4457 = vmatmul.mubr.msk.bf16.vlgmr.msra.gmra.mrb[72].mxu0 %vm427_vm3, %v3713_v7 }
0x2384   :  { %4461 = vmatpush3.bf16.msra.mxu0 %v4572_v5 }
0x2456   :  { %v4458_v4 = vpop.f32.mrb[72].mxu0 }
0x2457   :  { %v3779_v48 = vadd.f32 %v4458_v4, %v4014_v61  ;;  %v3770_v35 = vpop.f32.mrb[73].mxu0 }
0x2458   :  { %v3771_v13 = vadd.f32 %v4014_v61, %v3770_v35  ;;  %v4459_v0 = vpop.f32.mrb[74].mxu0 }
0x2459   :  { %4763 = vtanh.f32 %v3779_v48  ;;  %v3782_v10 = vadd.f32 %v4459_v0, %v4014_v61  ;;  %v3773_v29 = vpop.f32.mrb[75].mxu0 }
0x245a   :  { %4765 = vtanh.f32 %v3771_v13  ;;  %v3774_v21 = vadd.f32 %v4014_v61, %v3773_v29 }
0x245b   :  { %4767 = vtanh.f32 %v3782_v10 }
0x245c   :  { %4769 = vtanh.f32 %v3774_v21 }
0x2463   :  { %v4764_v41 = vpop.eup %4763 }
0x2464   :  { %v4766_v2 = vpop.eup %4765 }
0x2465   :  { %v4768_v31 = vpop.eup %4767 }
0x2466   :  { %v4770_v51 = vpop.eup %4769  ;;  %v3790_v46 = vpack.c.bf16 %v4768_v31, %v4764_v41 }
0x2467   :  { %v3789_v15 = vpack.c.bf16 %v4770_v51, %v4766_v2 }
0x2469   :  { %4462 = vmatprep.mubr.msk.bf16.mxu0 %vm69_vm1, %v3789_v15 }
0x246a   :  { %4463 = vmatmul.mubr.msk.bf16.vlgmr.msra.gmra.mrb[76].mxu0 %vm69_vm1, %v3790_v46 }
0x253d   :  { %v4464_v39 = vpop.f32.mrb[76].mxu0 }
0x253e   :  { %v3850_v49 = vadd.f32 %v4464_v39, %v4019_v19  ;;  %v3841_v24 = vpop.f32.mrb[77].mxu0 }
0x253f   :  { %v3842_v55 = vadd.f32 %v4019_v19, %v3841_v24  ;;  %v4465_v33 = vpop.f32.mrb[78].mxu0 }
0x2540   :  { %3859 = vst.msk [vmem:[%s5838_s6 + $0x10] sm:$0xff] %vm3856_vm7, %v3850_v49  ;;  %v3853_v12 = vadd.f32 %v4465_v33, %v4019_v19  ;;  %v3844_v50 = vpop.f32.mrb[79].mxu0 }
0x2541   :  { %3857 = vst.msk [vmem:[%s5838_s6] sm:$0xff] %vm3856_vm7, %v3842_v55  ;;  %v3845_v52 = vadd.f32 %v4019_v19, %v3844_v50 }
0x2542   :  { %3860 = vst.msk [vmem:[%s5838_s6 + $0x18] sm:$0xff] %vm3856_vm7, %v3853_v12 }
0x2543   :  { %3858 = vst.msk [vmem:[%s5838_s6 + $0x8] sm:$0xff] %vm3856_vm7, %v3845_v52 }

</bundles_post_ra>
